<compile_context>
chip_gen: v6e
topology: v6e:2x2x1
jax: 0.10.0
libtpu: 0.0.40
codegen_flags: <defaults>
</compile_context>

<pallas_src>
import functools

import jax
import jax.numpy as jnp
from jax import lax
from jax.experimental import pallas as pl
from jax.experimental.pallas import tpu as pltpu


# ---------------------------------------------------------------------------
# Pallas kernel: whole recurrence in one invocation.
# ---------------------------------------------------------------------------
def memory_ram_kernel(
    xa_ref, xm_ref,            # (T, I) full input streams
    w_xa_ref, b_xa_ref,        # (I, 2H+M), (1, 2H+M): [rtha_x | wpa_x | hca_x]
    w_xm_ref, b_xm_ref,        # (I, 2H+M), (1, 2H+M): [rthm_x | wpm_x | hcm_x]
    w_ha_ref,                  # (H, (M+3)+H+(M+H)): fused weights applied to h_t_a
    w_hm_ref,                  # (H, (M+3)+H+(M+H)): fused weights applied to h_t_m
    w_h_ref,                   # (H, (M+3)+H):       fused weights applied to h_t
    w_r_ref,                   # (H, 3H):            fused weights applied to r
    b_rw_ref,                  # (1, M+3): read_prob | write_prob bias
    b_rth_ref,                 # (1, H):   read_to_hidden bias
    out_ref,                   # (T, H) hiddens output
    xaproj_ref, xmproj_ref,    # VMEM scratch (T, 2H+M)
    *, nImg, H, M,
):
    RW = M + 3  # fused read_prob|write_prob logit width

    # ---- hoisted batched input projections (one MXU matmul per stream) -----
    xaproj_ref[...] = (
        jnp.dot(xa_ref[...], w_xa_ref[...], preferred_element_type=jnp.float32)
        + b_xa_ref[...])
    xmproj_ref[...] = (
        jnp.dot(xm_ref[...], w_xm_ref[...], preferred_element_type=jnp.float32)
        + b_xm_ref[...])

    def softmax_row(z):
        z = z - jnp.max(z, axis=1, keepdims=True)
        e = jnp.exp(z)
        return e * pl.reciprocal(jnp.sum(e, axis=1, keepdims=True), approx=True)

    def body(t, carry):
        mem, h, ha, hm = carry

        w_HA = w_ha_ref[...]
        w_HM = w_hm_ref[...]
        w_H = w_h_ref[...]
        w_R = w_r_ref[...]
        b_rw = b_rw_ref[...]
        b_rth = b_rth_ref[...]

        pa = xaproj_ref[pl.ds(t, 1), :]   # (1, 2H+M)
        pm = xmproj_ref[pl.ds(t, 1), :]

        # One fused matmul per recurrent-state row (shared-LHS weight fusion;
        # no lane-axis concatenation of activations).
        za = jnp.dot(ha, w_HA, preferred_element_type=jnp.float32)  # (1, RW+H+M+H)
        zm = jnp.dot(hm, w_HM, preferred_element_type=jnp.float32)  # (1, RW+H+M+H)
        zh = jnp.dot(h, w_H, preferred_element_type=jnp.float32)    # (1, RW+H)

        # ---- read / write gates --------------------------------------------
        z_rw = za[:, 0:RW] + zm[:, 0:RW] + zh[:, 0:RW] + b_rw        # (1, M+3)
        ar = softmax_row(z_rw[:, 0:M])                               # (1, M)
        aw = softmax_row(z_rw[:, M:RW])                              # (1, 3)

        # ---- read from memory & hidden updates -----------------------------
        r = jnp.dot(ar, mem, preferred_element_type=jnp.float32)     # (1, H)
        zr = jnp.dot(r, w_R, preferred_element_type=jnp.float32)     # (1, 3H)

        h1 = jnp.maximum(zr[:, 0:H] + zh[:, RW:RW + H] + b_rth, 0.0)
        ha1 = jnp.maximum(zr[:, H:2 * H] + za[:, RW:RW + H] + pa[:, 0:H], 0.0)
        hm1 = jnp.maximum(zr[:, 2 * H:3 * H] + zm[:, RW:RW + H] + pm[:, 0:H], 0.0)

        # ---- write to memory -------------------------------------------------
        z_wca = za[:, RW + H:RW + 2 * H + M] + pa[:, H:2 * H + M]     # (1, M+H)
        z_wcm = zm[:, RW + H:RW + 2 * H + M] + pm[:, H:2 * H + M]
        aw_a = softmax_row(z_wca[:, 0:M])                             # (1, M)
        aw_m = softmax_row(z_wcm[:, 0:M])
        c_a = jnp.maximum(z_wca[:, M:M + H], 0.0)                     # (1, H)
        c_m = jnp.maximum(z_wcm[:, M:M + H], 0.0)

        # Fused K=2 outer product: aw1*outer(aw_a,c_a) + aw2*outer(aw_m,c_m)
        A = jnp.concatenate([aw_a, aw_m], axis=0)                         # (2, M)
        C = jnp.concatenate([aw[:, 1:2] * c_a, aw[:, 2:3] * c_m], axis=0)  # (2, H)
        delta = lax.dot_general(A, C, (((0,), (0,)), ((), ())),
                                preferred_element_type=jnp.float32)        # (M, H)
        mem_new = aw[:, 0:1] * mem + delta

        out_ref[pl.ds(t, 1), :] = h1
        return (mem_new, h1, ha1, hm1)

    init = (jnp.zeros((M, H), jnp.float32),
            jnp.zeros((1, H), jnp.float32),
            jnp.zeros((1, H), jnp.float32),
            jnp.zeros((1, H), jnp.float32))
    lax.fori_loop(0, nImg, body, init, unroll=(nImg <= 16))


# ---------------------------------------------------------------------------
# Wrapper: host-side weight fusion + single pallas_call.
# ---------------------------------------------------------------------------
def memory_ram_two_stream(hidden_out_a, hidden_out_m, params,
                          hidden_size, memory_bank_size):
    nImg, I = hidden_out_a.shape
    H, M = hidden_size, memory_bank_size
    f32 = jnp.float32

    xa = hidden_out_a.astype(f32)
    xm = hidden_out_m.astype(f32)

    p = {k: v.astype(f32) for k, v in params.items()}
    w_rp, b_rp = p["read_prob_w"], p["read_prob_b"]                   # (3H, M)
    w_wp, b_wp = p["write_prob_w"], p["write_prob_b"]                 # (3H, 3)
    w_rth, b_rth = p["read_to_hidden_w"], p["read_to_hidden_b"]       # (2H, H)
    w_rtha, b_rtha = p["read_to_hidden_a_w"], p["read_to_hidden_a_b"]  # (I+2H, H)
    w_rthm, b_rthm = p["read_to_hidden_m_w"], p["read_to_hidden_m_b"]
    w_wpa, b_wpa = p["write_prob_a_w"], p["write_prob_a_b"]           # (H+I, M)
    w_wpm, b_wpm = p["write_prob_m_w"], p["write_prob_m_b"]
    w_hca, b_hca = p["hidden_to_content_a_w"], p["hidden_to_content_a_b"]  # (H+I, H)
    w_hcm, b_hcm = p["hidden_to_content_m_w"], p["hidden_to_content_m_b"]

    # fused read_prob | write_prob (shared LHS [ha, hm, h])
    w_rw = jnp.concatenate([w_rp, w_wp], axis=1)          # (3H, M+3)
    b_rw = jnp.concatenate([b_rp, b_wp], axis=1)          # (1, M+3)

    # Per-recurrent-LHS fused weights (row-split of each Linear => no in-kernel
    # lane concat; column-concat => one matmul per LHS).
    w_HA = jnp.concatenate(
        [w_rw[0:H], w_rtha[I + H:I + 2 * H], w_wpa[0:H], w_hca[0:H]], axis=1)
    w_HM = jnp.concatenate(
        [w_rw[H:2 * H], w_rthm[I + H:I + 2 * H], w_wpm[0:H], w_hcm[0:H]], axis=1)
    w_H = jnp.concatenate([w_rw[2 * H:3 * H], w_rth[H:2 * H]], axis=1)
    w_R = jnp.concatenate([w_rth[0:H], w_rtha[I:I + H], w_rthm[I:I + H]], axis=1)

    # Hoisted x-projection weights (input rows of the x-consuming Linears),
    # biases folded in here so they are added exactly once.
    w_XA = jnp.concatenate([w_rtha[0:I], w_wpa[H:H + I], w_hca[H:H + I]], axis=1)
    b_XA = jnp.concatenate([b_rtha, b_wpa, b_hca], axis=1)            # (1, 2H+M)
    w_XM = jnp.concatenate([w_rthm[0:I], w_wpm[H:H + I], w_hcm[H:H + I]], axis=1)
    b_XM = jnp.concatenate([b_rthm, b_wpm, b_hcm], axis=1)

    args = [xa, xm, w_XA, b_XA, w_XM, b_XM, w_HA, w_HM, w_H, w_R, b_rw, b_rth]
    in_specs = [pl.BlockSpec(a.shape, lambda i: (0, 0)) for a in args]
    out_specs = pl.BlockSpec((nImg, H), lambda i: (0, 0))

    kernel = functools.partial(memory_ram_kernel, nImg=nImg, H=H, M=M)

    hiddens = pl.pallas_call(
        kernel,
        out_shape=jax.ShapeDtypeStruct((nImg, H), f32),
        grid=(1,),
        in_specs=in_specs,
        out_specs=out_specs,
        scratch_shapes=[
            pltpu.VMEM((nImg, 2 * H + M), f32),   # hoisted a-stream projections
            pltpu.VMEM((nImg, 2 * H + M), f32),   # hoisted m-stream projections
        ],
        compiler_params=pltpu.CompilerParams(
            dimension_semantics=("arbitrary",)),   # recurrence is serial
    )(*args)
    return hiddens


# ---------------------------------------------------------------------------
# Deterministic parameter init (PyTorch-Linear-style uniform bounds),
# weights stored (in_features, out_features).
# ---------------------------------------------------------------------------
def init_params(key, input_size, hidden_size, memory_bank_size):
    H, I, M = hidden_size, input_size, memory_bank_size
    shapes = {
        "hidden_to_content_a": (H + I, H),
        "hidden_to_content_m": (H + I, H),
        "write_prob": (3 * H, 3),
        "write_prob_a": (H + I, M),
        "write_prob_m": (H + I, M),
        "read_prob": (3 * H, M),
        "read_to_hidden": (2 * H, H),
        "read_to_hidden_a": (2 * H + I, H),
        "read_to_hidden_m": (2 * H + I, H),
    }
    params = {}
    for name, (fan_in, fan_out) in sorted(shapes.items()):
        key, kw, kb = jax.random.split(key, 3)
        bound = 1.0 / float(fan_in) ** 0.5
        params[name + "_w"] = jax.random.uniform(
            kw, (fan_in, fan_out), jnp.float32, -bound, bound)
        params[name + "_b"] = jax.random.uniform(
            kb, (1, fan_out), jnp.float32, -bound, bound)
    return params


# ---------------------------------------------------------------------------
# Pure-JAX reference (mirrors the PyTorch forward exactly)
# ---------------------------------------------------------------------------
def reference_forward(hidden_out_a, hidden_out_m, params, H, M):
    nImg = hidden_out_a.shape[0]
    mem = jnp.zeros((M, H), jnp.float32)
    h = jnp.zeros((1, H), jnp.float32)
    ha = jnp.zeros((1, H), jnp.float32)
    hm = jnp.zeros((1, H), jnp.float32)

    def lin(x, name):
        return x @ params[name + "_w"] + params[name + "_b"]

    outs = []
    for t in range(nImg):
        x_a = hidden_out_a[t:t + 1]
        x_m = hidden_out_m[t:t + 1]
        x_h_am = jnp.concatenate([ha, hm, h], axis=1)
        ar = jax.nn.softmax(lin(x_h_am, "read_prob"), axis=1)
        r = ar @ mem
        f0 = jnp.concatenate([r, h], axis=1)
        fa = jnp.concatenate([x_a, r, ha], axis=1)
        fm = jnp.concatenate([x_m, r, hm], axis=1)
        h1 = jax.nn.relu(lin(f0, "read_to_hidden"))
        ha1 = jax.nn.relu(lin(fa, "read_to_hidden_a"))
        hm1 = jax.nn.relu(lin(fm, "read_to_hidden_m"))
        aw = jax.nn.softmax(lin(x_h_am, "write_prob"), axis=1)
        xh_a = jnp.concatenate([ha, x_a], axis=1)
        xh_m = jnp.concatenate([hm, x_m], axis=1)
        c_a = jax.nn.relu(lin(xh_a, "hidden_to_content_a"))
        c_m = jax.nn.relu(lin(xh_m, "hidden_to_content_m"))
        aw_a = jax.nn.softmax(lin(xh_a, "write_prob_a"), axis=1).reshape(M, 1)
        aw_m = jax.nn.softmax(lin(xh_m, "write_prob_m"), axis=1).reshape(M, 1)
        mem = aw[0, 0] * mem + aw[0, 1] * aw_a * c_a + aw[0, 2] * aw_m * c_m
        h, ha, hm = h1, ha1, hm1
        outs.append(h)
    return jnp.concatenate(outs, axis=0)


if __name__ == "__main__":
    input_size = 32
    hidden_size = 32
    memory_bank_size = 8
    nImg = 8

    key = jax.random.PRNGKey(0)
    k_params, k_a, k_m = jax.random.split(key, 3)
    params = init_params(k_params, input_size, hidden_size, memory_bank_size)
    hidden_out_a = jax.random.normal(k_a, (nImg, input_size), jnp.float32)
    hidden_out_m = jax.random.normal(k_m, (nImg, input_size), jnp.float32)

    out = memory_ram_two_stream(hidden_out_a, hidden_out_m, params,
                                hidden_size, memory_bank_size)
    jax.block_until_ready(out)

    ref = reference_forward(hidden_out_a, hidden_out_m, params,
                            hidden_size, memory_bank_size)
    assert out.shape == (nImg, hidden_size)
    assert jnp.allclose(out, ref, rtol=5e-3, atol=5e-3), (
        f"max abs diff {float(jnp.max(jnp.abs(out - ref)))}")

    print("KERNEL_OK")
</pallas_src>

<mosaic_0001>
module attributes {stable_mosaic.version = 11 : i64} {
  func.func @memory_ram_kernel(%arg0: i32, %arg1: memref<8x32xf32, #tpu.memory_space<vmem>>, %arg2: memref<8x32xf32, #tpu.memory_space<vmem>>, %arg3: memref<32x72xf32, #tpu.memory_space<vmem>>, %arg4: memref<1x72xf32, #tpu.memory_space<vmem>>, %arg5: memref<32x72xf32, #tpu.memory_space<vmem>>, %arg6: memref<1x72xf32, #tpu.memory_space<vmem>>, %arg7: memref<32x83xf32, #tpu.memory_space<vmem>>, %arg8: memref<32x83xf32, #tpu.memory_space<vmem>>, %arg9: memref<32x43xf32, #tpu.memory_space<vmem>>, %arg10: memref<32x96xf32, #tpu.memory_space<vmem>>, %arg11: memref<1x11xf32, #tpu.memory_space<vmem>>, %arg12: memref<1x32xf32, #tpu.memory_space<vmem>>, %arg13: memref<8x32xf32, #tpu.memory_space<vmem>>, %arg14: memref<8x72xf32, #tpu.memory_space<vmem>>, %arg15: memref<8x72xf32, #tpu.memory_space<vmem>>) attributes {dimension_semantics = [#tpu.dimension_semantics<arbitrary>], iteration_bounds = array<i64: 1>, scalar_prefetch = 0 : i64, scratch_operands = 2 : i64, tpu.core_type = #tpu.core_type<tc>, window_params = [{pipeline_mode = #tpu.pipeline_mode<synchronous>, transform_indices = @transform_0, window_bounds = array<i64: 8, 32>}, {pipeline_mode = #tpu.pipeline_mode<synchronous>, transform_indices = @transform_1, window_bounds = array<i64: 8, 32>}, {pipeline_mode = #tpu.pipeline_mode<synchronous>, transform_indices = @transform_2, window_bounds = array<i64: 32, 72>}, {pipeline_mode = #tpu.pipeline_mode<synchronous>, transform_indices = @transform_3, window_bounds = array<i64: 1, 72>}, {pipeline_mode = #tpu.pipeline_mode<synchronous>, transform_indices = @transform_4, window_bounds = array<i64: 32, 72>}, {pipeline_mode = #tpu.pipeline_mode<synchronous>, transform_indices = @transform_5, window_bounds = array<i64: 1, 72>}, {pipeline_mode = #tpu.pipeline_mode<synchronous>, transform_indices = @transform_6, window_bounds = array<i64: 32, 83>}, {pipeline_mode = #tpu.pipeline_mode<synchronous>, transform_indices = @transform_7, window_bounds = array<i64: 32, 83>}, {pipeline_mode = #tpu.pipeline_mode<synchronous>, transform_indices = @transform_8, window_bounds = array<i64: 32, 43>}, {pipeline_mode = #tpu.pipeline_mode<synchronous>, transform_indices = @transform_9, window_bounds = array<i64: 32, 96>}, {pipeline_mode = #tpu.pipeline_mode<synchronous>, transform_indices = @transform_10, window_bounds = array<i64: 1, 11>}, {pipeline_mode = #tpu.pipeline_mode<synchronous>, transform_indices = @transform_11, window_bounds = array<i64: 1, 32>}, {pipeline_mode = #tpu.pipeline_mode<synchronous>, transform_indices = @transform_12, window_bounds = array<i64: 8, 32>}]} {
    %c0 = arith.constant 0 : index
    %c0_0 = arith.constant 0 : index
    %0 = vector.load %arg1[%c0, %c0_0] : memref<8x32xf32, #tpu.memory_space<vmem>>, vector<8x32xf32>
    %c0_1 = arith.constant 0 : index
    %c0_2 = arith.constant 0 : index
    %1 = vector.load %arg3[%c0_1, %c0_2] : memref<32x72xf32, #tpu.memory_space<vmem>>, vector<32x72xf32>
    %cst = arith.constant dense<0.000000e+00> : vector<8x72xf32>
    %2 = tpu.matmul %0, %1, %cst {dimension_numbers = #tpu.dot_dimension_numbers<[1], [0], [0], [1], [0, 0, 1, 1], [], []>} : vector<8x32xf32>, vector<32x72xf32>, vector<8x72xf32> -> vector<8x72xf32>
    %c0_3 = arith.constant 0 : index
    %c0_4 = arith.constant 0 : index
    %3 = vector.load %arg4[%c0_3, %c0_4] : memref<1x72xf32, #tpu.memory_space<vmem>>, vector<1x72xf32>
    %4 = vector.broadcast %3 : vector<1x72xf32> to vector<8x72xf32>
    %5 = arith.addf %2, %4 : vector<8x72xf32>
    %c0_5 = arith.constant 0 : index
    %c0_6 = arith.constant 0 : index
    %6 = vector.load %arg14[%c0_5, %c0_6] : memref<8x72xf32, #tpu.memory_space<vmem>>, vector<8x72xf32>
    tpu.vector_store %arg14[%c0_5, %c0_6], %5 {strides = array<i32>} : memref<8x72xf32, #tpu.memory_space<vmem>>, vector<8x72xf32>,
    %c0_7 = arith.constant 0 : index
    %c0_8 = arith.constant 0 : index
    %7 = vector.load %arg2[%c0_7, %c0_8] : memref<8x32xf32, #tpu.memory_space<vmem>>, vector<8x32xf32>
    %c0_9 = arith.constant 0 : index
    %c0_10 = arith.constant 0 : index
    %8 = vector.load %arg5[%c0_9, %c0_10] : memref<32x72xf32, #tpu.memory_space<vmem>>, vector<32x72xf32>
    %cst_11 = arith.constant dense<0.000000e+00> : vector<8x72xf32>
    %9 = tpu.matmul %7, %8, %cst_11 {dimension_numbers = #tpu.dot_dimension_numbers<[1], [0], [0], [1], [0, 0, 1, 1], [], []>} : vector<8x32xf32>, vector<32x72xf32>, vector<8x72xf32> -> vector<8x72xf32>
    %c0_12 = arith.constant 0 : index
    %c0_13 = arith.constant 0 : index
    %10 = vector.load %arg6[%c0_12, %c0_13] : memref<1x72xf32, #tpu.memory_space<vmem>>, vector<1x72xf32>
    %11 = vector.broadcast %10 : vector<1x72xf32> to vector<8x72xf32>
    %12 = arith.addf %9, %11 : vector<8x72xf32>
    %c0_14 = arith.constant 0 : index
    %c0_15 = arith.constant 0 : index
    %13 = vector.load %arg15[%c0_14, %c0_15] : memref<8x72xf32, #tpu.memory_space<vmem>>, vector<8x72xf32>
    tpu.vector_store %arg15[%c0_14, %c0_15], %12 {strides = array<i32>} : memref<8x72xf32, #tpu.memory_space<vmem>>, vector<8x72xf32>,
    %cst_16 = arith.constant 0.000000e+00 : f32
    %14 = vector.broadcast %cst_16 : f32 to vector<8x32xf32>
    %cst_17 = arith.constant 0.000000e+00 : f32
    %15 = vector.broadcast %cst_17 : f32 to vector<1x32xf32>
    %cst_18 = arith.constant 0.000000e+00 : f32
    %16 = vector.broadcast %cst_18 : f32 to vector<1x32xf32>
    %cst_19 = arith.constant 0.000000e+00 : f32
    %17 = vector.broadcast %cst_19 : f32 to vector<1x32xf32>
    %c0_i32 = arith.constant 0 : i32
    %c0_20 = arith.constant 0 : index
    %c0_21 = arith.constant 0 : index
    %18 = vector.load %arg7[%c0_20, %c0_21] : memref<32x83xf32, #tpu.memory_space<vmem>>, vector<32x83xf32>
    %c0_22 = arith.constant 0 : index
    %c0_23 = arith.constant 0 : index
    %19 = vector.load %arg8[%c0_22, %c0_23] : memref<32x83xf32, #tpu.memory_space<vmem>>, vector<32x83xf32>
    %c0_24 = arith.constant 0 : index
    %c0_25 = arith.constant 0 : index
    %20 = vector.load %arg9[%c0_24, %c0_25] : memref<32x43xf32, #tpu.memory_space<vmem>>, vector<32x43xf32>
    %c0_26 = arith.constant 0 : index
    %c0_27 = arith.constant 0 : index
    %21 = vector.load %arg10[%c0_26, %c0_27] : memref<32x96xf32, #tpu.memory_space<vmem>>, vector<32x96xf32>
    %c0_28 = arith.constant 0 : index
    %c0_29 = arith.constant 0 : index
    %22 = vector.load %arg11[%c0_28, %c0_29] : memref<1x11xf32, #tpu.memory_space<vmem>>, vector<1x11xf32>
    %c0_30 = arith.constant 0 : index
    %c0_31 = arith.constant 0 : index
    %23 = vector.load %arg12[%c0_30, %c0_31] : memref<1x32xf32, #tpu.memory_space<vmem>>, vector<1x32xf32>
    %24 = arith.index_cast %c0_i32 : i32 to index
    %c0_32 = arith.constant 0 : index
    %25 = vector.load %arg14[%24, %c0_32] : memref<8x72xf32, #tpu.memory_space<vmem>>, vector<1x72xf32>
    %26 = arith.index_cast %c0_i32 : i32 to index
    %c0_33 = arith.constant 0 : index
    %27 = vector.load %arg15[%26, %c0_33] : memref<8x72xf32, #tpu.memory_space<vmem>>, vector<1x72xf32>
    %cst_34 = arith.constant dense<0.000000e+00> : vector<1x83xf32>
    %28 = tpu.matmul %16, %18, %cst_34 {dimension_numbers = #tpu.dot_dimension_numbers<[1], [0], [0], [1], [0, 0, 1, 1], [], []>} : vector<1x32xf32>, vector<32x83xf32>, vector<1x83xf32> -> vector<1x83xf32>
    %cst_35 = arith.constant dense<0.000000e+00> : vector<1x83xf32>
    %29 = tpu.matmul %17, %19, %cst_35 {dimension_numbers = #tpu.dot_dimension_numbers<[1], [0], [0], [1], [0, 0, 1, 1], [], []>} : vector<1x32xf32>, vector<32x83xf32>, vector<1x83xf32> -> vector<1x83xf32>
    %cst_36 = arith.constant dense<0.000000e+00> : vector<1x43xf32>
    %30 = tpu.matmul %15, %20, %cst_36 {dimension_numbers = #tpu.dot_dimension_numbers<[1], [0], [0], [1], [0, 0, 1, 1], [], []>} : vector<1x32xf32>, vector<32x43xf32>, vector<1x43xf32> -> vector<1x43xf32>
    %31 = vector.extract_strided_slice %28 {offsets = [0, 0], sizes = [1, 11], strides = [1, 1]} : vector<1x83xf32> to vector<1x11xf32>
    %32 = vector.extract_strided_slice %29 {offsets = [0, 0], sizes = [1, 11], strides = [1, 1]} : vector<1x83xf32> to vector<1x11xf32>
    %33 = arith.addf %31, %32 : vector<1x11xf32>
    %34 = vector.extract_strided_slice %30 {offsets = [0, 0], sizes = [1, 11], strides = [1, 1]} : vector<1x43xf32> to vector<1x11xf32>
    %35 = arith.addf %33, %34 : vector<1x11xf32>
    %36 = arith.addf %35, %22 : vector<1x11xf32>
    %37 = vector.extract_strided_slice %36 {offsets = [0, 0], sizes = [1, 8], strides = [1, 1]} : vector<1x11xf32> to vector<1x8xf32>
    %cst_37 = arith.constant dense<0xFF800000> : vector<1xf32>
    %38 = vector.multi_reduction <maximumf>, %37, %cst_37 [1] : vector<1x8xf32> to vector<1xf32>
    %39 = vector.shape_cast %38 : vector<1xf32> to vector<1x1xf32>
    %40 = vector.broadcast %39 : vector<1x1xf32> to vector<1x8xf32>
    %41 = arith.subf %37, %40 : vector<1x8xf32>
    %42 = math.exp %41 : vector<1x8xf32>
    %cst_38 = arith.constant dense<0.000000e+00> : vector<1xf32>
    %43 = vector.multi_reduction <add>, %42, %cst_38 [1] : vector<1x8xf32> to vector<1xf32>
    %44 = vector.shape_cast %43 : vector<1xf32> to vector<1x1xf32>
    %45 = tpu.reciprocal %44 {approx = true} : vector<1x1xf32> -> vector<1x1xf32>
    %46 = vector.broadcast %45 : vector<1x1xf32> to vector<1x8xf32>
    %47 = arith.mulf %42, %46 : vector<1x8xf32>
    %48 = vector.extract_strided_slice %36 {offsets = [0, 8], sizes = [1, 3], strides = [1, 1]} : vector<1x11xf32> to vector<1x3xf32>
    %cst_39 = arith.constant dense<0xFF800000> : vector<1xf32>
    %49 = vector.multi_reduction <maximumf>, %48, %cst_39 [1] : vector<1x3xf32> to vector<1xf32>
    %50 = vector.shape_cast %49 : vector<1xf32> to vector<1x1xf32>
    %51 = vector.broadcast %50 : vector<1x1xf32> to vector<1x3xf32>
    %52 = arith.subf %48, %51 : vector<1x3xf32>
    %53 = math.exp %52 : vector<1x3xf32>
    %cst_40 = arith.constant dense<0.000000e+00> : vector<1xf32>
    %54 = vector.multi_reduction <add>, %53, %cst_40 [1] : vector<1x3xf32> to vector<1xf32>
    %55 = vector.shape_cast %54 : vector<1xf32> to vector<1x1xf32>
    %56 = tpu.reciprocal %55 {approx = true} : vector<1x1xf32> -> vector<1x1xf32>
    %57 = vector.broadcast %56 : vector<1x1xf32> to vector<1x3xf32>
    %58 = arith.mulf %53, %57 : vector<1x3xf32>
    %cst_41 = arith.constant dense<0.000000e+00> : vector<1x32xf32>
    %59 = tpu.matmul %47, %14, %cst_41 {dimension_numbers = #tpu.dot_dimension_numbers<[1], [0], [0], [1], [0, 0, 1, 1], [], []>} : vector<1x8xf32>, vector<8x32xf32>, vector<1x32xf32> -> vector<1x32xf32>
    %cst_42 = arith.constant dense<0.000000e+00> : vector<1x96xf32>
    %60 = tpu.matmul %59, %21, %cst_42 {dimension_numbers = #tpu.dot_dimension_numbers<[1], [0], [0], [1], [0, 0, 1, 1], [], []>} : vector<1x32xf32>, vector<32x96xf32>, vector<1x96xf32> -> vector<1x96xf32>
    %61 = vector.extract_strided_slice %60 {offsets = [0, 0], sizes = [1, 32], strides = [1, 1]} : vector<1x96xf32> to vector<1x32xf32>
    %62 = vector.extract_strided_slice %30 {offsets = [0, 11], sizes = [1, 32], strides = [1, 1]} : vector<1x43xf32> to vector<1x32xf32>
    %63 = arith.addf %61, %62 : vector<1x32xf32>
    %64 = arith.addf %63, %23 : vector<1x32xf32>
    %cst_43 = arith.constant 0.000000e+00 : f32
    %65 = vector.broadcast %cst_43 : f32 to vector<1x32xf32>
    %66 = arith.maximumf %64, %65 : vector<1x32xf32>
    %67 = vector.extract_strided_slice %60 {offsets = [0, 32], sizes = [1, 32], strides = [1, 1]} : vector<1x96xf32> to vector<1x32xf32>
    %68 = vector.extract_strided_slice %28 {offsets = [0, 11], sizes = [1, 32], strides = [1, 1]} : vector<1x83xf32> to vector<1x32xf32>
    %69 = arith.addf %67, %68 : vector<1x32xf32>
    %70 = vector.extract_strided_slice %25 {offsets = [0, 0], sizes = [1, 32], strides = [1, 1]} : vector<1x72xf32> to vector<1x32xf32>
    %71 = arith.addf %69, %70 : vector<1x32xf32>
    %cst_44 = arith.constant 0.000000e+00 : f32
    %72 = vector.broadcast %cst_44 : f32 to vector<1x32xf32>
    %73 = arith.maximumf %71, %72 : vector<1x32xf32>
    %74 = vector.extract_strided_slice %60 {offsets = [0, 64], sizes = [1, 32], strides = [1, 1]} : vector<1x96xf32> to vector<1x32xf32>
    %75 = vector.extract_strided_slice %29 {offsets = [0, 11], sizes = [1, 32], strides = [1, 1]} : vector<1x83xf32> to vector<1x32xf32>
    %76 = arith.addf %74, %75 : vector<1x32xf32>
    %77 = vector.extract_strided_slice %27 {offsets = [0, 0], sizes = [1, 32], strides = [1, 1]} : vector<1x72xf32> to vector<1x32xf32>
    %78 = arith.addf %76, %77 : vector<1x32xf32>
    %cst_45 = arith.constant 0.000000e+00 : f32
    %79 = vector.broadcast %cst_45 : f32 to vector<1x32xf32>
    %80 = arith.maximumf %78, %79 : vector<1x32xf32>
    %81 = vector.extract_strided_slice %28 {offsets = [0, 43], sizes = [1, 40], strides = [1, 1]} : vector<1x83xf32> to vector<1x40xf32>
    %82 = vector.extract_strided_slice %25 {offsets = [0, 32], sizes = [1, 40], strides = [1, 1]} : vector<1x72xf32> to vector<1x40xf32>
    %83 = arith.addf %81, %82 : vector<1x40xf32>
    %84 = vector.extract_strided_slice %29 {offsets = [0, 43], sizes = [1, 40], strides = [1, 1]} : vector<1x83xf32> to vector<1x40xf32>
    %85 = vector.extract_strided_slice %27 {offsets = [0, 32], sizes = [1, 40], strides = [1, 1]} : vector<1x72xf32> to vector<1x40xf32>
    %86 = arith.addf %84, %85 : vector<1x40xf32>
    %87 = vector.extract_strided_slice %83 {offsets = [0, 0], sizes = [1, 8], strides = [1, 1]} : vector<1x40xf32> to vector<1x8xf32>
    %cst_46 = arith.constant dense<0xFF800000> : vector<1xf32>
    %88 = vector.multi_reduction <maximumf>, %87, %cst_46 [1] : vector<1x8xf32> to vector<1xf32>
    %89 = vector.shape_cast %88 : vector<1xf32> to vector<1x1xf32>
    %90 = vector.broadcast %89 : vector<1x1xf32> to vector<1x8xf32>
    %91 = arith.subf %87, %90 : vector<1x8xf32>
    %92 = math.exp %91 : vector<1x8xf32>
    %cst_47 = arith.constant dense<0.000000e+00> : vector<1xf32>
    %93 = vector.multi_reduction <add>, %92, %cst_47 [1] : vector<1x8xf32> to vector<1xf32>
    %94 = vector.shape_cast %93 : vector<1xf32> to vector<1x1xf32>
    %95 = tpu.reciprocal %94 {approx = true} : vector<1x1xf32> -> vector<1x1xf32>
    %96 = vector.broadcast %95 : vector<1x1xf32> to vector<1x8xf32>
    %97 = arith.mulf %92, %96 : vector<1x8xf32>
    %98 = vector.extract_strided_slice %86 {offsets = [0, 0], sizes = [1, 8], strides = [1, 1]} : vector<1x40xf32> to vector<1x8xf32>
    %cst_48 = arith.constant dense<0xFF800000> : vector<1xf32>
    %99 = vector.multi_reduction <maximumf>, %98, %cst_48 [1] : vector<1x8xf32> to vector<1xf32>
    %100 = vector.shape_cast %99 : vector<1xf32> to vector<1x1xf32>
    %101 = vector.broadcast %100 : vector<1x1xf32> to vector<1x8xf32>
    %102 = arith.subf %98, %101 : vector<1x8xf32>
    %103 = math.exp %102 : vector<1x8xf32>
    %cst_49 = arith.constant dense<0.000000e+00> : vector<1xf32>
    %104 = vector.multi_reduction <add>, %103, %cst_49 [1] : vector<1x8xf32> to vector<1xf32>
    %105 = vector.shape_cast %104 : vector<1xf32> to vector<1x1xf32>
    %106 = tpu.reciprocal %105 {approx = true} : vector<1x1xf32> -> vector<1x1xf32>
    %107 = vector.broadcast %106 : vector<1x1xf32> to vector<1x8xf32>
    %108 = arith.mulf %103, %107 : vector<1x8xf32>
    %109 = vector.extract_strided_slice %83 {offsets = [0, 8], sizes = [1, 32], strides = [1, 1]} : vector<1x40xf32> to vector<1x32xf32>
    %cst_50 = arith.constant 0.000000e+00 : f32
    %110 = vector.broadcast %cst_50 : f32 to vector<1x32xf32>
    %111 = arith.maximumf %109, %110 : vector<1x32xf32>
    %112 = vector.extract_strided_slice %86 {offsets = [0, 8], sizes = [1, 32], strides = [1, 1]} : vector<1x40xf32> to vector<1x32xf32>
    %cst_51 = arith.constant 0.000000e+00 : f32
    %113 = vector.broadcast %cst_51 : f32 to vector<1x32xf32>
    %114 = arith.maximumf %112, %113 : vector<1x32xf32>
    %115 = tpu.concatenate %97, %108 in 0 : vector<1x8xf32>, vector<1x8xf32> -> vector<2x8xf32>
    %116 = vector.extract_strided_slice %58 {offsets = [0, 1], sizes = [1, 1], strides = [1, 1]} : vector<1x3xf32> to vector<1x1xf32>
    %117 = vector.broadcast %116 : vector<1x1xf32> to vector<1x32xf32>
    %118 = arith.mulf %117, %111 : vector<1x32xf32>
    %119 = vector.extract_strided_slice %58 {offsets = [0, 2], sizes = [1, 1], strides = [1, 1]} : vector<1x3xf32> to vector<1x1xf32>
    %120 = vector.broadcast %119 : vector<1x1xf32> to vector<1x32xf32>
    %121 = arith.mulf %120, %114 : vector<1x32xf32>
    %122 = tpu.concatenate %118, %121 in 0 : vector<1x32xf32>, vector<1x32xf32> -> vector<2x32xf32>
    %cst_52 = arith.constant dense<0.000000e+00> : vector<8x32xf32>
    %123 = tpu.matmul %115, %122, %cst_52 {dimension_numbers = #tpu.dot_dimension_numbers<[0], [0], [1], [1], [0, 1, 1, 1], [], []>} : vector<2x8xf32>, vector<2x32xf32>, vector<8x32xf32> -> vector<8x32xf32>
    %124 = vector.extract_strided_slice %58 {offsets = [0, 0], sizes = [1, 1], strides = [1, 1]} : vector<1x3xf32> to vector<1x1xf32>
    %125 = vector.broadcast %124 : vector<1x1xf32> to vector<8x32xf32>
    %126 = arith.mulf %125, %14 : vector<8x32xf32>
    %127 = arith.addf %126, %123 : vector<8x32xf32>
    %128 = arith.index_cast %c0_i32 : i32 to index
    %c0_53 = arith.constant 0 : index
    %129 = vector.load %arg13[%128, %c0_53] : memref<8x32xf32, #tpu.memory_space<vmem>>, vector<1x32xf32>
    tpu.vector_store %arg13[%128, %c0_53], %66 {strides = array<i32>} : memref<8x32xf32, #tpu.memory_space<vmem>>, vector<1x32xf32>,
    %c1_i32 = arith.constant 1 : i32
    %c0_54 = arith.constant 0 : index
    %c0_55 = arith.constant 0 : index
    %130 = vector.load %arg7[%c0_54, %c0_55] : memref<32x83xf32, #tpu.memory_space<vmem>>, vector<32x83xf32>
    %c0_56 = arith.constant 0 : index
    %c0_57 = arith.constant 0 : index
    %131 = vector.load %arg8[%c0_56, %c0_57] : memref<32x83xf32, #tpu.memory_space<vmem>>, vector<32x83xf32>
    %c0_58 = arith.constant 0 : index
    %c0_59 = arith.constant 0 : index
    %132 = vector.load %arg9[%c0_58, %c0_59] : memref<32x43xf32, #tpu.memory_space<vmem>>, vector<32x43xf32>
    %c0_60 = arith.constant 0 : index
    %c0_61 = arith.constant 0 : index
    %133 = vector.load %arg10[%c0_60, %c0_61] : memref<32x96xf32, #tpu.memory_space<vmem>>, vector<32x96xf32>
    %c0_62 = arith.constant 0 : index
    %c0_63 = arith.constant 0 : index
    %134 = vector.load %arg11[%c0_62, %c0_63] : memref<1x11xf32, #tpu.memory_space<vmem>>, vector<1x11xf32>
    %c0_64 = arith.constant 0 : index
    %c0_65 = arith.constant 0 : index
    %135 = vector.load %arg12[%c0_64, %c0_65] : memref<1x32xf32, #tpu.memory_space<vmem>>, vector<1x32xf32>
    %136 = arith.index_cast %c1_i32 : i32 to index
    %c0_66 = arith.constant 0 : index
    %137 = vector.load %arg14[%136, %c0_66] : memref<8x72xf32, #tpu.memory_space<vmem>>, vector<1x72xf32>
    %138 = arith.index_cast %c1_i32 : i32 to index
    %c0_67 = arith.constant 0 : index
    %139 = vector.load %arg15[%138, %c0_67] : memref<8x72xf32, #tpu.memory_space<vmem>>, vector<1x72xf32>
    %cst_68 = arith.constant dense<0.000000e+00> : vector<1x83xf32>
    %140 = tpu.matmul %73, %130, %cst_68 {dimension_numbers = #tpu.dot_dimension_numbers<[1], [0], [0], [1], [0, 0, 1, 1], [], []>} : vector<1x32xf32>, vector<32x83xf32>, vector<1x83xf32> -> vector<1x83xf32>
    %cst_69 = arith.constant dense<0.000000e+00> : vector<1x83xf32>
    %141 = tpu.matmul %80, %131, %cst_69 {dimension_numbers = #tpu.dot_dimension_numbers<[1], [0], [0], [1], [0, 0, 1, 1], [], []>} : vector<1x32xf32>, vector<32x83xf32>, vector<1x83xf32> -> vector<1x83xf32>
    %cst_70 = arith.constant dense<0.000000e+00> : vector<1x43xf32>
    %142 = tpu.matmul %66, %132, %cst_70 {dimension_numbers = #tpu.dot_dimension_numbers<[1], [0], [0], [1], [0, 0, 1, 1], [], []>} : vector<1x32xf32>, vector<32x43xf32>, vector<1x43xf32> -> vector<1x43xf32>
    %143 = vector.extract_strided_slice %140 {offsets = [0, 0], sizes = [1, 11], strides = [1, 1]} : vector<1x83xf32> to vector<1x11xf32>
    %144 = vector.extract_strided_slice %141 {offsets = [0, 0], sizes = [1, 11], strides = [1, 1]} : vector<1x83xf32> to vector<1x11xf32>
    %145 = arith.addf %143, %144 : vector<1x11xf32>
    %146 = vector.extract_strided_slice %142 {offsets = [0, 0], sizes = [1, 11], strides = [1, 1]} : vector<1x43xf32> to vector<1x11xf32>
    %147 = arith.addf %145, %146 : vector<1x11xf32>
    %148 = arith.addf %147, %134 : vector<1x11xf32>
    %149 = vector.extract_strided_slice %148 {offsets = [0, 0], sizes = [1, 8], strides = [1, 1]} : vector<1x11xf32> to vector<1x8xf32>
    %cst_71 = arith.constant dense<0xFF800000> : vector<1xf32>
    %150 = vector.multi_reduction <maximumf>, %149, %cst_71 [1] : vector<1x8xf32> to vector<1xf32>
    %151 = vector.shape_cast %150 : vector<1xf32> to vector<1x1xf32>
    %152 = vector.broadcast %151 : vector<1x1xf32> to vector<1x8xf32>
    %153 = arith.subf %149, %152 : vector<1x8xf32>
    %154 = math.exp %153 : vector<1x8xf32>
    %cst_72 = arith.constant dense<0.000000e+00> : vector<1xf32>
    %155 = vector.multi_reduction <add>, %154, %cst_72 [1] : vector<1x8xf32> to vector<1xf32>
    %156 = vector.shape_cast %155 : vector<1xf32> to vector<1x1xf32>
    %157 = tpu.reciprocal %156 {approx = true} : vector<1x1xf32> -> vector<1x1xf32>
    %158 = vector.broadcast %157 : vector<1x1xf32> to vector<1x8xf32>
    %159 = arith.mulf %154, %158 : vector<1x8xf32>
    %160 = vector.extract_strided_slice %148 {offsets = [0, 8], sizes = [1, 3], strides = [1, 1]} : vector<1x11xf32> to vector<1x3xf32>
    %cst_73 = arith.constant dense<0xFF800000> : vector<1xf32>
    %161 = vector.multi_reduction <maximumf>, %160, %cst_73 [1] : vector<1x3xf32> to vector<1xf32>
    %162 = vector.shape_cast %161 : vector<1xf32> to vector<1x1xf32>
    %163 = vector.broadcast %162 : vector<1x1xf32> to vector<1x3xf32>
    %164 = arith.subf %160, %163 : vector<1x3xf32>
    %165 = math.exp %164 : vector<1x3xf32>
    %cst_74 = arith.constant dense<0.000000e+00> : vector<1xf32>
    %166 = vector.multi_reduction <add>, %165, %cst_74 [1] : vector<1x3xf32> to vector<1xf32>
    %167 = vector.shape_cast %166 : vector<1xf32> to vector<1x1xf32>
    %168 = tpu.reciprocal %167 {approx = true} : vector<1x1xf32> -> vector<1x1xf32>
    %169 = vector.broadcast %168 : vector<1x1xf32> to vector<1x3xf32>
    %170 = arith.mulf %165, %169 : vector<1x3xf32>
    %cst_75 = arith.constant dense<0.000000e+00> : vector<1x32xf32>
    %171 = tpu.matmul %159, %127, %cst_75 {dimension_numbers = #tpu.dot_dimension_numbers<[1], [0], [0], [1], [0, 0, 1, 1], [], []>} : vector<1x8xf32>, vector<8x32xf32>, vector<1x32xf32> -> vector<1x32xf32>
    %cst_76 = arith.constant dense<0.000000e+00> : vector<1x96xf32>
    %172 = tpu.matmul %171, %133, %cst_76 {dimension_numbers = #tpu.dot_dimension_numbers<[1], [0], [0], [1], [0, 0, 1, 1], [], []>} : vector<1x32xf32>, vector<32x96xf32>, vector<1x96xf32> -> vector<1x96xf32>
    %173 = vector.extract_strided_slice %172 {offsets = [0, 0], sizes = [1, 32], strides = [1, 1]} : vector<1x96xf32> to vector<1x32xf32>
    %174 = vector.extract_strided_slice %142 {offsets = [0, 11], sizes = [1, 32], strides = [1, 1]} : vector<1x43xf32> to vector<1x32xf32>
    %175 = arith.addf %173, %174 : vector<1x32xf32>
    %176 = arith.addf %175, %135 : vector<1x32xf32>
    %cst_77 = arith.constant 0.000000e+00 : f32
    %177 = vector.broadcast %cst_77 : f32 to vector<1x32xf32>
    %178 = arith.maximumf %176, %177 : vector<1x32xf32>
    %179 = vector.extract_strided_slice %172 {offsets = [0, 32], sizes = [1, 32], strides = [1, 1]} : vector<1x96xf32> to vector<1x32xf32>
    %180 = vector.extract_strided_slice %140 {offsets = [0, 11], sizes = [1, 32], strides = [1, 1]} : vector<1x83xf32> to vector<1x32xf32>
    %181 = arith.addf %179, %180 : vector<1x32xf32>
    %182 = vector.extract_strided_slice %137 {offsets = [0, 0], sizes = [1, 32], strides = [1, 1]} : vector<1x72xf32> to vector<1x32xf32>
    %183 = arith.addf %181, %182 : vector<1x32xf32>
    %cst_78 = arith.constant 0.000000e+00 : f32
    %184 = vector.broadcast %cst_78 : f32 to vector<1x32xf32>
    %185 = arith.maximumf %183, %184 : vector<1x32xf32>
    %186 = vector.extract_strided_slice %172 {offsets = [0, 64], sizes = [1, 32], strides = [1, 1]} : vector<1x96xf32> to vector<1x32xf32>
    %187 = vector.extract_strided_slice %141 {offsets = [0, 11], sizes = [1, 32], strides = [1, 1]} : vector<1x83xf32> to vector<1x32xf32>
    %188 = arith.addf %186, %187 : vector<1x32xf32>
    %189 = vector.extract_strided_slice %139 {offsets = [0, 0], sizes = [1, 32], strides = [1, 1]} : vector<1x72xf32> to vector<1x32xf32>
    %190 = arith.addf %188, %189 : vector<1x32xf32>
    %cst_79 = arith.constant 0.000000e+00 : f32
    %191 = vector.broadcast %cst_79 : f32 to vector<1x32xf32>
    %192 = arith.maximumf %190, %191 : vector<1x32xf32>
    %193 = vector.extract_strided_slice %140 {offsets = [0, 43], sizes = [1, 40], strides = [1, 1]} : vector<1x83xf32> to vector<1x40xf32>
    %194 = vector.extract_strided_slice %137 {offsets = [0, 32], sizes = [1, 40], strides = [1, 1]} : vector<1x72xf32> to vector<1x40xf32>
    %195 = arith.addf %193, %194 : vector<1x40xf32>
    %196 = vector.extract_strided_slice %141 {offsets = [0, 43], sizes = [1, 40], strides = [1, 1]} : vector<1x83xf32> to vector<1x40xf32>
    %197 = vector.extract_strided_slice %139 {offsets = [0, 32], sizes = [1, 40], strides = [1, 1]} : vector<1x72xf32> to vector<1x40xf32>
    %198 = arith.addf %196, %197 : vector<1x40xf32>
    %199 = vector.extract_strided_slice %195 {offsets = [0, 0], sizes = [1, 8], strides = [1, 1]} : vector<1x40xf32> to vector<1x8xf32>
    %cst_80 = arith.constant dense<0xFF800000> : vector<1xf32>
    %200 = vector.multi_reduction <maximumf>, %199, %cst_80 [1] : vector<1x8xf32> to vector<1xf32>
    %201 = vector.shape_cast %200 : vector<1xf32> to vector<1x1xf32>
    %202 = vector.broadcast %201 : vector<1x1xf32> to vector<1x8xf32>
    %203 = arith.subf %199, %202 : vector<1x8xf32>
    %204 = math.exp %203 : vector<1x8xf32>
    %cst_81 = arith.constant dense<0.000000e+00> : vector<1xf32>
    %205 = vector.multi_reduction <add>, %204, %cst_81 [1] : vector<1x8xf32> to vector<1xf32>
    %206 = vector.shape_cast %205 : vector<1xf32> to vector<1x1xf32>
    %207 = tpu.reciprocal %206 {approx = true} : vector<1x1xf32> -> vector<1x1xf32>
    %208 = vector.broadcast %207 : vector<1x1xf32> to vector<1x8xf32>
    %209 = arith.mulf %204, %208 : vector<1x8xf32>
    %210 = vector.extract_strided_slice %198 {offsets = [0, 0], sizes = [1, 8], strides = [1, 1]} : vector<1x40xf32> to vector<1x8xf32>
    %cst_82 = arith.constant dense<0xFF800000> : vector<1xf32>
    %211 = vector.multi_reduction <maximumf>, %210, %cst_82 [1] : vector<1x8xf32> to vector<1xf32>
    %212 = vector.shape_cast %211 : vector<1xf32> to vector<1x1xf32>
    %213 = vector.broadcast %212 : vector<1x1xf32> to vector<1x8xf32>
    %214 = arith.subf %210, %213 : vector<1x8xf32>
    %215 = math.exp %214 : vector<1x8xf32>
    %cst_83 = arith.constant dense<0.000000e+00> : vector<1xf32>
    %216 = vector.multi_reduction <add>, %215, %cst_83 [1] : vector<1x8xf32> to vector<1xf32>
    %217 = vector.shape_cast %216 : vector<1xf32> to vector<1x1xf32>
    %218 = tpu.reciprocal %217 {approx = true} : vector<1x1xf32> -> vector<1x1xf32>
    %219 = vector.broadcast %218 : vector<1x1xf32> to vector<1x8xf32>
    %220 = arith.mulf %215, %219 : vector<1x8xf32>
    %221 = vector.extract_strided_slice %195 {offsets = [0, 8], sizes = [1, 32], strides = [1, 1]} : vector<1x40xf32> to vector<1x32xf32>
    %cst_84 = arith.constant 0.000000e+00 : f32
    %222 = vector.broadcast %cst_84 : f32 to vector<1x32xf32>
    %223 = arith.maximumf %221, %222 : vector<1x32xf32>
    %224 = vector.extract_strided_slice %198 {offsets = [0, 8], sizes = [1, 32], strides = [1, 1]} : vector<1x40xf32> to vector<1x32xf32>
    %cst_85 = arith.constant 0.000000e+00 : f32
    %225 = vector.broadcast %cst_85 : f32 to vector<1x32xf32>
    %226 = arith.maximumf %224, %225 : vector<1x32xf32>
    %227 = tpu.concatenate %209, %220 in 0 : vector<1x8xf32>, vector<1x8xf32> -> vector<2x8xf32>
    %228 = vector.extract_strided_slice %170 {offsets = [0, 1], sizes = [1, 1], strides = [1, 1]} : vector<1x3xf32> to vector<1x1xf32>
    %229 = vector.broadcast %228 : vector<1x1xf32> to vector<1x32xf32>
    %230 = arith.mulf %229, %223 : vector<1x32xf32>
    %231 = vector.extract_strided_slice %170 {offsets = [0, 2], sizes = [1, 1], strides = [1, 1]} : vector<1x3xf32> to vector<1x1xf32>
    %232 = vector.broadcast %231 : vector<1x1xf32> to vector<1x32xf32>
    %233 = arith.mulf %232, %226 : vector<1x32xf32>
    %234 = tpu.concatenate %230, %233 in 0 : vector<1x32xf32>, vector<1x32xf32> -> vector<2x32xf32>
    %cst_86 = arith.constant dense<0.000000e+00> : vector<8x32xf32>
    %235 = tpu.matmul %227, %234, %cst_86 {dimension_numbers = #tpu.dot_dimension_numbers<[0], [0], [1], [1], [0, 1, 1, 1], [], []>} : vector<2x8xf32>, vector<2x32xf32>, vector<8x32xf32> -> vector<8x32xf32>
    %236 = vector.extract_strided_slice %170 {offsets = [0, 0], sizes = [1, 1], strides = [1, 1]} : vector<1x3xf32> to vector<1x1xf32>
    %237 = vector.broadcast %236 : vector<1x1xf32> to vector<8x32xf32>
    %238 = arith.mulf %237, %127 : vector<8x32xf32>
    %239 = arith.addf %238, %235 : vector<8x32xf32>
    %240 = arith.index_cast %c1_i32 : i32 to index
    %c0_87 = arith.constant 0 : index
    %241 = vector.load %arg13[%240, %c0_87] : memref<8x32xf32, #tpu.memory_space<vmem>>, vector<1x32xf32>
    tpu.vector_store %arg13[%240, %c0_87], %178 {strides = array<i32>} : memref<8x32xf32, #tpu.memory_space<vmem>>, vector<1x32xf32>,
    %c2_i32 = arith.constant 2 : i32
    %c0_88 = arith.constant 0 : index
    %c0_89 = arith.constant 0 : index
    %242 = vector.load %arg7[%c0_88, %c0_89] : memref<32x83xf32, #tpu.memory_space<vmem>>, vector<32x83xf32>
    %c0_90 = arith.constant 0 : index
    %c0_91 = arith.constant 0 : index
    %243 = vector.load %arg8[%c0_90, %c0_91] : memref<32x83xf32, #tpu.memory_space<vmem>>, vector<32x83xf32>
    %c0_92 = arith.constant 0 : index
    %c0_93 = arith.constant 0 : index
    %244 = vector.load %arg9[%c0_92, %c0_93] : memref<32x43xf32, #tpu.memory_space<vmem>>, vector<32x43xf32>
    %c0_94 = arith.constant 0 : index
    %c0_95 = arith.constant 0 : index
    %245 = vector.load %arg10[%c0_94, %c0_95] : memref<32x96xf32, #tpu.memory_space<vmem>>, vector<32x96xf32>
    %c0_96 = arith.constant 0 : index
    %c0_97 = arith.constant 0 : index
    %246 = vector.load %arg11[%c0_96, %c0_97] : memref<1x11xf32, #tpu.memory_space<vmem>>, vector<1x11xf32>
    %c0_98 = arith.constant 0 : index
    %c0_99 = arith.constant 0 : index
    %247 = vector.load %arg12[%c0_98, %c0_99] : memref<1x32xf32, #tpu.memory_space<vmem>>, vector<1x32xf32>
    %248 = arith.index_cast %c2_i32 : i32 to index
    %c0_100 = arith.constant 0 : index
    %249 = vector.load %arg14[%248, %c0_100] : memref<8x72xf32, #tpu.memory_space<vmem>>, vector<1x72xf32>
    %250 = arith.index_cast %c2_i32 : i32 to index
    %c0_101 = arith.constant 0 : index
    %251 = vector.load %arg15[%250, %c0_101] : memref<8x72xf32, #tpu.memory_space<vmem>>, vector<1x72xf32>
    %cst_102 = arith.constant dense<0.000000e+00> : vector<1x83xf32>
    %252 = tpu.matmul %185, %242, %cst_102 {dimension_numbers = #tpu.dot_dimension_numbers<[1], [0], [0], [1], [0, 0, 1, 1], [], []>} : vector<1x32xf32>, vector<32x83xf32>, vector<1x83xf32> -> vector<1x83xf32>
    %cst_103 = arith.constant dense<0.000000e+00> : vector<1x83xf32>
    %253 = tpu.matmul %192, %243, %cst_103 {dimension_numbers = #tpu.dot_dimension_numbers<[1], [0], [0], [1], [0, 0, 1, 1], [], []>} : vector<1x32xf32>, vector<32x83xf32>, vector<1x83xf32> -> vector<1x83xf32>
    %cst_104 = arith.constant dense<0.000000e+00> : vector<1x43xf32>
    %254 = tpu.matmul %178, %244, %cst_104 {dimension_numbers = #tpu.dot_dimension_numbers<[1], [0], [0], [1], [0, 0, 1, 1], [], []>} : vector<1x32xf32>, vector<32x43xf32>, vector<1x43xf32> -> vector<1x43xf32>
    %255 = vector.extract_strided_slice %252 {offsets = [0, 0], sizes = [1, 11], strides = [1, 1]} : vector<1x83xf32> to vector<1x11xf32>
    %256 = vector.extract_strided_slice %253 {offsets = [0, 0], sizes = [1, 11], strides = [1, 1]} : vector<1x83xf32> to vector<1x11xf32>
    %257 = arith.addf %255, %256 : vector<1x11xf32>
    %258 = vector.extract_strided_slice %254 {offsets = [0, 0], sizes = [1, 11], strides = [1, 1]} : vector<1x43xf32> to vector<1x11xf32>
    %259 = arith.addf %257, %258 : vector<1x11xf32>
    %260 = arith.addf %259, %246 : vector<1x11xf32>
    %261 = vector.extract_strided_slice %260 {offsets = [0, 0], sizes = [1, 8], strides = [1, 1]} : vector<1x11xf32> to vector<1x8xf32>
    %cst_105 = arith.constant dense<0xFF800000> : vector<1xf32>
    %262 = vector.multi_reduction <maximumf>, %261, %cst_105 [1] : vector<1x8xf32> to vector<1xf32>
    %263 = vector.shape_cast %262 : vector<1xf32> to vector<1x1xf32>
    %264 = vector.broadcast %263 : vector<1x1xf32> to vector<1x8xf32>
    %265 = arith.subf %261, %264 : vector<1x8xf32>
    %266 = math.exp %265 : vector<1x8xf32>
    %cst_106 = arith.constant dense<0.000000e+00> : vector<1xf32>
    %267 = vector.multi_reduction <add>, %266, %cst_106 [1] : vector<1x8xf32> to vector<1xf32>
    %268 = vector.shape_cast %267 : vector<1xf32> to vector<1x1xf32>
    %269 = tpu.reciprocal %268 {approx = true} : vector<1x1xf32> -> vector<1x1xf32>
    %270 = vector.broadcast %269 : vector<1x1xf32> to vector<1x8xf32>
    %271 = arith.mulf %266, %270 : vector<1x8xf32>
    %272 = vector.extract_strided_slice %260 {offsets = [0, 8], sizes = [1, 3], strides = [1, 1]} : vector<1x11xf32> to vector<1x3xf32>
    %cst_107 = arith.constant dense<0xFF800000> : vector<1xf32>
    %273 = vector.multi_reduction <maximumf>, %272, %cst_107 [1] : vector<1x3xf32> to vector<1xf32>
    %274 = vector.shape_cast %273 : vector<1xf32> to vector<1x1xf32>
    %275 = vector.broadcast %274 : vector<1x1xf32> to vector<1x3xf32>
    %276 = arith.subf %272, %275 : vector<1x3xf32>
    %277 = math.exp %276 : vector<1x3xf32>
    %cst_108 = arith.constant dense<0.000000e+00> : vector<1xf32>
    %278 = vector.multi_reduction <add>, %277, %cst_108 [1] : vector<1x3xf32> to vector<1xf32>
    %279 = vector.shape_cast %278 : vector<1xf32> to vector<1x1xf32>
    %280 = tpu.reciprocal %279 {approx = true} : vector<1x1xf32> -> vector<1x1xf32>
    %281 = vector.broadcast %280 : vector<1x1xf32> to vector<1x3xf32>
    %282 = arith.mulf %277, %281 : vector<1x3xf32>
    %cst_109 = arith.constant dense<0.000000e+00> : vector<1x32xf32>
    %283 = tpu.matmul %271, %239, %cst_109 {dimension_numbers = #tpu.dot_dimension_numbers<[1], [0], [0], [1], [0, 0, 1, 1], [], []>} : vector<1x8xf32>, vector<8x32xf32>, vector<1x32xf32> -> vector<1x32xf32>
    %cst_110 = arith.constant dense<0.000000e+00> : vector<1x96xf32>
    %284 = tpu.matmul %283, %245, %cst_110 {dimension_numbers = #tpu.dot_dimension_numbers<[1], [0], [0], [1], [0, 0, 1, 1], [], []>} : vector<1x32xf32>, vector<32x96xf32>, vector<1x96xf32> -> vector<1x96xf32>
    %285 = vector.extract_strided_slice %284 {offsets = [0, 0], sizes = [1, 32], strides = [1, 1]} : vector<1x96xf32> to vector<1x32xf32>
    %286 = vector.extract_strided_slice %254 {offsets = [0, 11], sizes = [1, 32], strides = [1, 1]} : vector<1x43xf32> to vector<1x32xf32>
    %287 = arith.addf %285, %286 : vector<1x32xf32>
    %288 = arith.addf %287, %247 : vector<1x32xf32>
    %cst_111 = arith.constant 0.000000e+00 : f32
    %289 = vector.broadcast %cst_111 : f32 to vector<1x32xf32>
    %290 = arith.maximumf %288, %289 : vector<1x32xf32>
    %291 = vector.extract_strided_slice %284 {offsets = [0, 32], sizes = [1, 32], strides = [1, 1]} : vector<1x96xf32> to vector<1x32xf32>
    %292 = vector.extract_strided_slice %252 {offsets = [0, 11], sizes = [1, 32], strides = [1, 1]} : vector<1x83xf32> to vector<1x32xf32>
    %293 = arith.addf %291, %292 : vector<1x32xf32>
    %294 = vector.extract_strided_slice %249 {offsets = [0, 0], sizes = [1, 32], strides = [1, 1]} : vector<1x72xf32> to vector<1x32xf32>
    %295 = arith.addf %293, %294 : vector<1x32xf32>
    %cst_112 = arith.constant 0.000000e+00 : f32
    %296 = vector.broadcast %cst_112 : f32 to vector<1x32xf32>
    %297 = arith.maximumf %295, %296 : vector<1x32xf32>
    %298 = vector.extract_strided_slice %284 {offsets = [0, 64], sizes = [1, 32], strides = [1, 1]} : vector<1x96xf32> to vector<1x32xf32>
    %299 = vector.extract_strided_slice %253 {offsets = [0, 11], sizes = [1, 32], strides = [1, 1]} : vector<1x83xf32> to vector<1x32xf32>
    %300 = arith.addf %298, %299 : vector<1x32xf32>
    %301 = vector.extract_strided_slice %251 {offsets = [0, 0], sizes = [1, 32], strides = [1, 1]} : vector<1x72xf32> to vector<1x32xf32>
    %302 = arith.addf %300, %301 : vector<1x32xf32>
    %cst_113 = arith.constant 0.000000e+00 : f32
    %303 = vector.broadcast %cst_113 : f32 to vector<1x32xf32>
    %304 = arith.maximumf %302, %303 : vector<1x32xf32>
    %305 = vector.extract_strided_slice %252 {offsets = [0, 43], sizes = [1, 40], strides = [1, 1]} : vector<1x83xf32> to vector<1x40xf32>
    %306 = vector.extract_strided_slice %249 {offsets = [0, 32], sizes = [1, 40], strides = [1, 1]} : vector<1x72xf32> to vector<1x40xf32>
    %307 = arith.addf %305, %306 : vector<1x40xf32>
    %308 = vector.extract_strided_slice %253 {offsets = [0, 43], sizes = [1, 40], strides = [1, 1]} : vector<1x83xf32> to vector<1x40xf32>
    %309 = vector.extract_strided_slice %251 {offsets = [0, 32], sizes = [1, 40], strides = [1, 1]} : vector<1x72xf32> to vector<1x40xf32>
    %310 = arith.addf %308, %309 : vector<1x40xf32>
    %311 = vector.extract_strided_slice %307 {offsets = [0, 0], sizes = [1, 8], strides = [1, 1]} : vector<1x40xf32> to vector<1x8xf32>
    %cst_114 = arith.constant dense<0xFF800000> : vector<1xf32>
    %312 = vector.multi_reduction <maximumf>, %311, %cst_114 [1] : vector<1x8xf32> to vector<1xf32>
    %313 = vector.shape_cast %312 : vector<1xf32> to vector<1x1xf32>
    %314 = vector.broadcast %313 : vector<1x1xf32> to vector<1x8xf32>
    %315 = arith.subf %311, %314 : vector<1x8xf32>
    %316 = math.exp %315 : vector<1x8xf32>
    %cst_115 = arith.constant dense<0.000000e+00> : vector<1xf32>
    %317 = vector.multi_reduction <add>, %316, %cst_115 [1] : vector<1x8xf32> to vector<1xf32>
    %318 = vector.shape_cast %317 : vector<1xf32> to vector<1x1xf32>
    %319 = tpu.reciprocal %318 {approx = true} : vector<1x1xf32> -> vector<1x1xf32>
    %320 = vector.broadcast %319 : vector<1x1xf32> to vector<1x8xf32>
    %321 = arith.mulf %316, %320 : vector<1x8xf32>
    %322 = vector.extract_strided_slice %310 {offsets = [0, 0], sizes = [1, 8], strides = [1, 1]} : vector<1x40xf32> to vector<1x8xf32>
    %cst_116 = arith.constant dense<0xFF800000> : vector<1xf32>
    %323 = vector.multi_reduction <maximumf>, %322, %cst_116 [1] : vector<1x8xf32> to vector<1xf32>
    %324 = vector.shape_cast %323 : vector<1xf32> to vector<1x1xf32>
    %325 = vector.broadcast %324 : vector<1x1xf32> to vector<1x8xf32>
    %326 = arith.subf %322, %325 : vector<1x8xf32>
    %327 = math.exp %326 : vector<1x8xf32>
    %cst_117 = arith.constant dense<0.000000e+00> : vector<1xf32>
    %328 = vector.multi_reduction <add>, %327, %cst_117 [1] : vector<1x8xf32> to vector<1xf32>
    %329 = vector.shape_cast %328 : vector<1xf32> to vector<1x1xf32>
    %330 = tpu.reciprocal %329 {approx = true} : vector<1x1xf32> -> vector<1x1xf32>
    %331 = vector.broadcast %330 : vector<1x1xf32> to vector<1x8xf32>
    %332 = arith.mulf %327, %331 : vector<1x8xf32>
    %333 = vector.extract_strided_slice %307 {offsets = [0, 8], sizes = [1, 32], strides = [1, 1]} : vector<1x40xf32> to vector<1x32xf32>
    %cst_118 = arith.constant 0.000000e+00 : f32
    %334 = vector.broadcast %cst_118 : f32 to vector<1x32xf32>
    %335 = arith.maximumf %333, %334 : vector<1x32xf32>
    %336 = vector.extract_strided_slice %310 {offsets = [0, 8], sizes = [1, 32], strides = [1, 1]} : vector<1x40xf32> to vector<1x32xf32>
    %cst_119 = arith.constant 0.000000e+00 : f32
    %337 = vector.broadcast %cst_119 : f32 to vector<1x32xf32>
    %338 = arith.maximumf %336, %337 : vector<1x32xf32>
    %339 = tpu.concatenate %321, %332 in 0 : vector<1x8xf32>, vector<1x8xf32> -> vector<2x8xf32>
    %340 = vector.extract_strided_slice %282 {offsets = [0, 1], sizes = [1, 1], strides = [1, 1]} : vector<1x3xf32> to vector<1x1xf32>
    %341 = vector.broadcast %340 : vector<1x1xf32> to vector<1x32xf32>
    %342 = arith.mulf %341, %335 : vector<1x32xf32>
    %343 = vector.extract_strided_slice %282 {offsets = [0, 2], sizes = [1, 1], strides = [1, 1]} : vector<1x3xf32> to vector<1x1xf32>
    %344 = vector.broadcast %343 : vector<1x1xf32> to vector<1x32xf32>
    %345 = arith.mulf %344, %338 : vector<1x32xf32>
    %346 = tpu.concatenate %342, %345 in 0 : vector<1x32xf32>, vector<1x32xf32> -> vector<2x32xf32>
    %cst_120 = arith.constant dense<0.000000e+00> : vector<8x32xf32>
    %347 = tpu.matmul %339, %346, %cst_120 {dimension_numbers = #tpu.dot_dimension_numbers<[0], [0], [1], [1], [0, 1, 1, 1], [], []>} : vector<2x8xf32>, vector<2x32xf32>, vector<8x32xf32> -> vector<8x32xf32>
    %348 = vector.extract_strided_slice %282 {offsets = [0, 0], sizes = [1, 1], strides = [1, 1]} : vector<1x3xf32> to vector<1x1xf32>
    %349 = vector.broadcast %348 : vector<1x1xf32> to vector<8x32xf32>
    %350 = arith.mulf %349, %239 : vector<8x32xf32>
    %351 = arith.addf %350, %347 : vector<8x32xf32>
    %352 = arith.index_cast %c2_i32 : i32 to index
    %c0_121 = arith.constant 0 : index
    %353 = vector.load %arg13[%352, %c0_121] : memref<8x32xf32, #tpu.memory_space<vmem>>, vector<1x32xf32>
    tpu.vector_store %arg13[%352, %c0_121], %290 {strides = array<i32>} : memref<8x32xf32, #tpu.memory_space<vmem>>, vector<1x32xf32>,
    %c3_i32 = arith.constant 3 : i32
    %c0_122 = arith.constant 0 : index
    %c0_123 = arith.constant 0 : index
    %354 = vector.load %arg7[%c0_122, %c0_123] : memref<32x83xf32, #tpu.memory_space<vmem>>, vector<32x83xf32>
    %c0_124 = arith.constant 0 : index
    %c0_125 = arith.constant 0 : index
    %355 = vector.load %arg8[%c0_124, %c0_125] : memref<32x83xf32, #tpu.memory_space<vmem>>, vector<32x83xf32>
    %c0_126 = arith.constant 0 : index
    %c0_127 = arith.constant 0 : index
    %356 = vector.load %arg9[%c0_126, %c0_127] : memref<32x43xf32, #tpu.memory_space<vmem>>, vector<32x43xf32>
    %c0_128 = arith.constant 0 : index
    %c0_129 = arith.constant 0 : index
    %357 = vector.load %arg10[%c0_128, %c0_129] : memref<32x96xf32, #tpu.memory_space<vmem>>, vector<32x96xf32>
    %c0_130 = arith.constant 0 : index
    %c0_131 = arith.constant 0 : index
    %358 = vector.load %arg11[%c0_130, %c0_131] : memref<1x11xf32, #tpu.memory_space<vmem>>, vector<1x11xf32>
    %c0_132 = arith.constant 0 : index
    %c0_133 = arith.constant 0 : index
    %359 = vector.load %arg12[%c0_132, %c0_133] : memref<1x32xf32, #tpu.memory_space<vmem>>, vector<1x32xf32>
    %360 = arith.index_cast %c3_i32 : i32 to index
    %c0_134 = arith.constant 0 : index
    %361 = vector.load %arg14[%360, %c0_134] : memref<8x72xf32, #tpu.memory_space<vmem>>, vector<1x72xf32>
    %362 = arith.index_cast %c3_i32 : i32 to index
    %c0_135 = arith.constant 0 : index
    %363 = vector.load %arg15[%362, %c0_135] : memref<8x72xf32, #tpu.memory_space<vmem>>, vector<1x72xf32>
    %cst_136 = arith.constant dense<0.000000e+00> : vector<1x83xf32>
    %364 = tpu.matmul %297, %354, %cst_136 {dimension_numbers = #tpu.dot_dimension_numbers<[1], [0], [0], [1], [0, 0, 1, 1], [], []>} : vector<1x32xf32>, vector<32x83xf32>, vector<1x83xf32> -> vector<1x83xf32>
    %cst_137 = arith.constant dense<0.000000e+00> : vector<1x83xf32>
    %365 = tpu.matmul %304, %355, %cst_137 {dimension_numbers = #tpu.dot_dimension_numbers<[1], [0], [0], [1], [0, 0, 1, 1], [], []>} : vector<1x32xf32>, vector<32x83xf32>, vector<1x83xf32> -> vector<1x83xf32>
    %cst_138 = arith.constant dense<0.000000e+00> : vector<1x43xf32>
    %366 = tpu.matmul %290, %356, %cst_138 {dimension_numbers = #tpu.dot_dimension_numbers<[1], [0], [0], [1], [0, 0, 1, 1], [], []>} : vector<1x32xf32>, vector<32x43xf32>, vector<1x43xf32> -> vector<1x43xf32>
    %367 = vector.extract_strided_slice %364 {offsets = [0, 0], sizes = [1, 11], strides = [1, 1]} : vector<1x83xf32> to vector<1x11xf32>
    %368 = vector.extract_strided_slice %365 {offsets = [0, 0], sizes = [1, 11], strides = [1, 1]} : vector<1x83xf32> to vector<1x11xf32>
    %369 = arith.addf %367, %368 : vector<1x11xf32>
    %370 = vector.extract_strided_slice %366 {offsets = [0, 0], sizes = [1, 11], strides = [1, 1]} : vector<1x43xf32> to vector<1x11xf32>
    %371 = arith.addf %369, %370 : vector<1x11xf32>
    %372 = arith.addf %371, %358 : vector<1x11xf32>
    %373 = vector.extract_strided_slice %372 {offsets = [0, 0], sizes = [1, 8], strides = [1, 1]} : vector<1x11xf32> to vector<1x8xf32>
    %cst_139 = arith.constant dense<0xFF800000> : vector<1xf32>
    %374 = vector.multi_reduction <maximumf>, %373, %cst_139 [1] : vector<1x8xf32> to vector<1xf32>
    %375 = vector.shape_cast %374 : vector<1xf32> to vector<1x1xf32>
    %376 = vector.broadcast %375 : vector<1x1xf32> to vector<1x8xf32>
    %377 = arith.subf %373, %376 : vector<1x8xf32>
    %378 = math.exp %377 : vector<1x8xf32>
    %cst_140 = arith.constant dense<0.000000e+00> : vector<1xf32>
    %379 = vector.multi_reduction <add>, %378, %cst_140 [1] : vector<1x8xf32> to vector<1xf32>
    %380 = vector.shape_cast %379 : vector<1xf32> to vector<1x1xf32>
    %381 = tpu.reciprocal %380 {approx = true} : vector<1x1xf32> -> vector<1x1xf32>
    %382 = vector.broadcast %381 : vector<1x1xf32> to vector<1x8xf32>
    %383 = arith.mulf %378, %382 : vector<1x8xf32>
    %384 = vector.extract_strided_slice %372 {offsets = [0, 8], sizes = [1, 3], strides = [1, 1]} : vector<1x11xf32> to vector<1x3xf32>
    %cst_141 = arith.constant dense<0xFF800000> : vector<1xf32>
    %385 = vector.multi_reduction <maximumf>, %384, %cst_141 [1] : vector<1x3xf32> to vector<1xf32>
    %386 = vector.shape_cast %385 : vector<1xf32> to vector<1x1xf32>
    %387 = vector.broadcast %386 : vector<1x1xf32> to vector<1x3xf32>
    %388 = arith.subf %384, %387 : vector<1x3xf32>
    %389 = math.exp %388 : vector<1x3xf32>
    %cst_142 = arith.constant dense<0.000000e+00> : vector<1xf32>
    %390 = vector.multi_reduction <add>, %389, %cst_142 [1] : vector<1x3xf32> to vector<1xf32>
    %391 = vector.shape_cast %390 : vector<1xf32> to vector<1x1xf32>
    %392 = tpu.reciprocal %391 {approx = true} : vector<1x1xf32> -> vector<1x1xf32>
    %393 = vector.broadcast %392 : vector<1x1xf32> to vector<1x3xf32>
    %394 = arith.mulf %389, %393 : vector<1x3xf32>
    %cst_143 = arith.constant dense<0.000000e+00> : vector<1x32xf32>
    %395 = tpu.matmul %383, %351, %cst_143 {dimension_numbers = #tpu.dot_dimension_numbers<[1], [0], [0], [1], [0, 0, 1, 1], [], []>} : vector<1x8xf32>, vector<8x32xf32>, vector<1x32xf32> -> vector<1x32xf32>
    %cst_144 = arith.constant dense<0.000000e+00> : vector<1x96xf32>
    %396 = tpu.matmul %395, %357, %cst_144 {dimension_numbers = #tpu.dot_dimension_numbers<[1], [0], [0], [1], [0, 0, 1, 1], [], []>} : vector<1x32xf32>, vector<32x96xf32>, vector<1x96xf32> -> vector<1x96xf32>
    %397 = vector.extract_strided_slice %396 {offsets = [0, 0], sizes = [1, 32], strides = [1, 1]} : vector<1x96xf32> to vector<1x32xf32>
    %398 = vector.extract_strided_slice %366 {offsets = [0, 11], sizes = [1, 32], strides = [1, 1]} : vector<1x43xf32> to vector<1x32xf32>
    %399 = arith.addf %397, %398 : vector<1x32xf32>
    %400 = arith.addf %399, %359 : vector<1x32xf32>
    %cst_145 = arith.constant 0.000000e+00 : f32
    %401 = vector.broadcast %cst_145 : f32 to vector<1x32xf32>
    %402 = arith.maximumf %400, %401 : vector<1x32xf32>
    %403 = vector.extract_strided_slice %396 {offsets = [0, 32], sizes = [1, 32], strides = [1, 1]} : vector<1x96xf32> to vector<1x32xf32>
    %404 = vector.extract_strided_slice %364 {offsets = [0, 11], sizes = [1, 32], strides = [1, 1]} : vector<1x83xf32> to vector<1x32xf32>
    %405 = arith.addf %403, %404 : vector<1x32xf32>
    %406 = vector.extract_strided_slice %361 {offsets = [0, 0], sizes = [1, 32], strides = [1, 1]} : vector<1x72xf32> to vector<1x32xf32>
    %407 = arith.addf %405, %406 : vector<1x32xf32>
    %cst_146 = arith.constant 0.000000e+00 : f32
    %408 = vector.broadcast %cst_146 : f32 to vector<1x32xf32>
    %409 = arith.maximumf %407, %408 : vector<1x32xf32>
    %410 = vector.extract_strided_slice %396 {offsets = [0, 64], sizes = [1, 32], strides = [1, 1]} : vector<1x96xf32> to vector<1x32xf32>
    %411 = vector.extract_strided_slice %365 {offsets = [0, 11], sizes = [1, 32], strides = [1, 1]} : vector<1x83xf32> to vector<1x32xf32>
    %412 = arith.addf %410, %411 : vector<1x32xf32>
    %413 = vector.extract_strided_slice %363 {offsets = [0, 0], sizes = [1, 32], strides = [1, 1]} : vector<1x72xf32> to vector<1x32xf32>
    %414 = arith.addf %412, %413 : vector<1x32xf32>
    %cst_147 = arith.constant 0.000000e+00 : f32
    %415 = vector.broadcast %cst_147 : f32 to vector<1x32xf32>
    %416 = arith.maximumf %414, %415 : vector<1x32xf32>
    %417 = vector.extract_strided_slice %364 {offsets = [0, 43], sizes = [1, 40], strides = [1, 1]} : vector<1x83xf32> to vector<1x40xf32>
    %418 = vector.extract_strided_slice %361 {offsets = [0, 32], sizes = [1, 40], strides = [1, 1]} : vector<1x72xf32> to vector<1x40xf32>
    %419 = arith.addf %417, %418 : vector<1x40xf32>
    %420 = vector.extract_strided_slice %365 {offsets = [0, 43], sizes = [1, 40], strides = [1, 1]} : vector<1x83xf32> to vector<1x40xf32>
    %421 = vector.extract_strided_slice %363 {offsets = [0, 32], sizes = [1, 40], strides = [1, 1]} : vector<1x72xf32> to vector<1x40xf32>
    %422 = arith.addf %420, %421 : vector<1x40xf32>
    %423 = vector.extract_strided_slice %419 {offsets = [0, 0], sizes = [1, 8], strides = [1, 1]} : vector<1x40xf32> to vector<1x8xf32>
    %cst_148 = arith.constant dense<0xFF800000> : vector<1xf32>
    %424 = vector.multi_reduction <maximumf>, %423, %cst_148 [1] : vector<1x8xf32> to vector<1xf32>
    %425 = vector.shape_cast %424 : vector<1xf32> to vector<1x1xf32>
    %426 = vector.broadcast %425 : vector<1x1xf32> to vector<1x8xf32>
    %427 = arith.subf %423, %426 : vector<1x8xf32>
    %428 = math.exp %427 : vector<1x8xf32>
    %cst_149 = arith.constant dense<0.000000e+00> : vector<1xf32>
    %429 = vector.multi_reduction <add>, %428, %cst_149 [1] : vector<1x8xf32> to vector<1xf32>
    %430 = vector.shape_cast %429 : vector<1xf32> to vector<1x1xf32>
    %431 = tpu.reciprocal %430 {approx = true} : vector<1x1xf32> -> vector<1x1xf32>
    %432 = vector.broadcast %431 : vector<1x1xf32> to vector<1x8xf32>
    %433 = arith.mulf %428, %432 : vector<1x8xf32>
    %434 = vector.extract_strided_slice %422 {offsets = [0, 0], sizes = [1, 8], strides = [1, 1]} : vector<1x40xf32> to vector<1x8xf32>
    %cst_150 = arith.constant dense<0xFF800000> : vector<1xf32>
    %435 = vector.multi_reduction <maximumf>, %434, %cst_150 [1] : vector<1x8xf32> to vector<1xf32>
    %436 = vector.shape_cast %435 : vector<1xf32> to vector<1x1xf32>
    %437 = vector.broadcast %436 : vector<1x1xf32> to vector<1x8xf32>
    %438 = arith.subf %434, %437 : vector<1x8xf32>
    %439 = math.exp %438 : vector<1x8xf32>
    %cst_151 = arith.constant dense<0.000000e+00> : vector<1xf32>
    %440 = vector.multi_reduction <add>, %439, %cst_151 [1] : vector<1x8xf32> to vector<1xf32>
    %441 = vector.shape_cast %440 : vector<1xf32> to vector<1x1xf32>
    %442 = tpu.reciprocal %441 {approx = true} : vector<1x1xf32> -> vector<1x1xf32>
    %443 = vector.broadcast %442 : vector<1x1xf32> to vector<1x8xf32>
    %444 = arith.mulf %439, %443 : vector<1x8xf32>
    %445 = vector.extract_strided_slice %419 {offsets = [0, 8], sizes = [1, 32], strides = [1, 1]} : vector<1x40xf32> to vector<1x32xf32>
    %cst_152 = arith.constant 0.000000e+00 : f32
    %446 = vector.broadcast %cst_152 : f32 to vector<1x32xf32>
    %447 = arith.maximumf %445, %446 : vector<1x32xf32>
    %448 = vector.extract_strided_slice %422 {offsets = [0, 8], sizes = [1, 32], strides = [1, 1]} : vector<1x40xf32> to vector<1x32xf32>
    %cst_153 = arith.constant 0.000000e+00 : f32
    %449 = vector.broadcast %cst_153 : f32 to vector<1x32xf32>
    %450 = arith.maximumf %448, %449 : vector<1x32xf32>
    %451 = tpu.concatenate %433, %444 in 0 : vector<1x8xf32>, vector<1x8xf32> -> vector<2x8xf32>
    %452 = vector.extract_strided_slice %394 {offsets = [0, 1], sizes = [1, 1], strides = [1, 1]} : vector<1x3xf32> to vector<1x1xf32>
    %453 = vector.broadcast %452 : vector<1x1xf32> to vector<1x32xf32>
    %454 = arith.mulf %453, %447 : vector<1x32xf32>
    %455 = vector.extract_strided_slice %394 {offsets = [0, 2], sizes = [1, 1], strides = [1, 1]} : vector<1x3xf32> to vector<1x1xf32>
    %456 = vector.broadcast %455 : vector<1x1xf32> to vector<1x32xf32>
    %457 = arith.mulf %456, %450 : vector<1x32xf32>
    %458 = tpu.concatenate %454, %457 in 0 : vector<1x32xf32>, vector<1x32xf32> -> vector<2x32xf32>
    %cst_154 = arith.constant dense<0.000000e+00> : vector<8x32xf32>
    %459 = tpu.matmul %451, %458, %cst_154 {dimension_numbers = #tpu.dot_dimension_numbers<[0], [0], [1], [1], [0, 1, 1, 1], [], []>} : vector<2x8xf32>, vector<2x32xf32>, vector<8x32xf32> -> vector<8x32xf32>
    %460 = vector.extract_strided_slice %394 {offsets = [0, 0], sizes = [1, 1], strides = [1, 1]} : vector<1x3xf32> to vector<1x1xf32>
    %461 = vector.broadcast %460 : vector<1x1xf32> to vector<8x32xf32>
    %462 = arith.mulf %461, %351 : vector<8x32xf32>
    %463 = arith.addf %462, %459 : vector<8x32xf32>
    %464 = arith.index_cast %c3_i32 : i32 to index
    %c0_155 = arith.constant 0 : index
    %465 = vector.load %arg13[%464, %c0_155] : memref<8x32xf32, #tpu.memory_space<vmem>>, vector<1x32xf32>
    tpu.vector_store %arg13[%464, %c0_155], %402 {strides = array<i32>} : memref<8x32xf32, #tpu.memory_space<vmem>>, vector<1x32xf32>,
    %c4_i32 = arith.constant 4 : i32
    %c0_156 = arith.constant 0 : index
    %c0_157 = arith.constant 0 : index
    %466 = vector.load %arg7[%c0_156, %c0_157] : memref<32x83xf32, #tpu.memory_space<vmem>>, vector<32x83xf32>
    %c0_158 = arith.constant 0 : index
    %c0_159 = arith.constant 0 : index
    %467 = vector.load %arg8[%c0_158, %c0_159] : memref<32x83xf32, #tpu.memory_space<vmem>>, vector<32x83xf32>
    %c0_160 = arith.constant 0 : index
    %c0_161 = arith.constant 0 : index
    %468 = vector.load %arg9[%c0_160, %c0_161] : memref<32x43xf32, #tpu.memory_space<vmem>>, vector<32x43xf32>
    %c0_162 = arith.constant 0 : index
    %c0_163 = arith.constant 0 : index
    %469 = vector.load %arg10[%c0_162, %c0_163] : memref<32x96xf32, #tpu.memory_space<vmem>>, vector<32x96xf32>
    %c0_164 = arith.constant 0 : index
    %c0_165 = arith.constant 0 : index
    %470 = vector.load %arg11[%c0_164, %c0_165] : memref<1x11xf32, #tpu.memory_space<vmem>>, vector<1x11xf32>
    %c0_166 = arith.constant 0 : index
    %c0_167 = arith.constant 0 : index
    %471 = vector.load %arg12[%c0_166, %c0_167] : memref<1x32xf32, #tpu.memory_space<vmem>>, vector<1x32xf32>
    %472 = arith.index_cast %c4_i32 : i32 to index
    %c0_168 = arith.constant 0 : index
    %473 = vector.load %arg14[%472, %c0_168] : memref<8x72xf32, #tpu.memory_space<vmem>>, vector<1x72xf32>
    %474 = arith.index_cast %c4_i32 : i32 to index
    %c0_169 = arith.constant 0 : index
    %475 = vector.load %arg15[%474, %c0_169] : memref<8x72xf32, #tpu.memory_space<vmem>>, vector<1x72xf32>
    %cst_170 = arith.constant dense<0.000000e+00> : vector<1x83xf32>
    %476 = tpu.matmul %409, %466, %cst_170 {dimension_numbers = #tpu.dot_dimension_numbers<[1], [0], [0], [1], [0, 0, 1, 1], [], []>} : vector<1x32xf32>, vector<32x83xf32>, vector<1x83xf32> -> vector<1x83xf32>
    %cst_171 = arith.constant dense<0.000000e+00> : vector<1x83xf32>
    %477 = tpu.matmul %416, %467, %cst_171 {dimension_numbers = #tpu.dot_dimension_numbers<[1], [0], [0], [1], [0, 0, 1, 1], [], []>} : vector<1x32xf32>, vector<32x83xf32>, vector<1x83xf32> -> vector<1x83xf32>
    %cst_172 = arith.constant dense<0.000000e+00> : vector<1x43xf32>
    %478 = tpu.matmul %402, %468, %cst_172 {dimension_numbers = #tpu.dot_dimension_numbers<[1], [0], [0], [1], [0, 0, 1, 1], [], []>} : vector<1x32xf32>, vector<32x43xf32>, vector<1x43xf32> -> vector<1x43xf32>
    %479 = vector.extract_strided_slice %476 {offsets = [0, 0], sizes = [1, 11], strides = [1, 1]} : vector<1x83xf32> to vector<1x11xf32>
    %480 = vector.extract_strided_slice %477 {offsets = [0, 0], sizes = [1, 11], strides = [1, 1]} : vector<1x83xf32> to vector<1x11xf32>
    %481 = arith.addf %479, %480 : vector<1x11xf32>
    %482 = vector.extract_strided_slice %478 {offsets = [0, 0], sizes = [1, 11], strides = [1, 1]} : vector<1x43xf32> to vector<1x11xf32>
    %483 = arith.addf %481, %482 : vector<1x11xf32>
    %484 = arith.addf %483, %470 : vector<1x11xf32>
    %485 = vector.extract_strided_slice %484 {offsets = [0, 0], sizes = [1, 8], strides = [1, 1]} : vector<1x11xf32> to vector<1x8xf32>
    %cst_173 = arith.constant dense<0xFF800000> : vector<1xf32>
    %486 = vector.multi_reduction <maximumf>, %485, %cst_173 [1] : vector<1x8xf32> to vector<1xf32>
    %487 = vector.shape_cast %486 : vector<1xf32> to vector<1x1xf32>
    %488 = vector.broadcast %487 : vector<1x1xf32> to vector<1x8xf32>
    %489 = arith.subf %485, %488 : vector<1x8xf32>
    %490 = math.exp %489 : vector<1x8xf32>
    %cst_174 = arith.constant dense<0.000000e+00> : vector<1xf32>
    %491 = vector.multi_reduction <add>, %490, %cst_174 [1] : vector<1x8xf32> to vector<1xf32>
    %492 = vector.shape_cast %491 : vector<1xf32> to vector<1x1xf32>
    %493 = tpu.reciprocal %492 {approx = true} : vector<1x1xf32> -> vector<1x1xf32>
    %494 = vector.broadcast %493 : vector<1x1xf32> to vector<1x8xf32>
    %495 = arith.mulf %490, %494 : vector<1x8xf32>
    %496 = vector.extract_strided_slice %484 {offsets = [0, 8], sizes = [1, 3], strides = [1, 1]} : vector<1x11xf32> to vector<1x3xf32>
    %cst_175 = arith.constant dense<0xFF800000> : vector<1xf32>
    %497 = vector.multi_reduction <maximumf>, %496, %cst_175 [1] : vector<1x3xf32> to vector<1xf32>
    %498 = vector.shape_cast %497 : vector<1xf32> to vector<1x1xf32>
    %499 = vector.broadcast %498 : vector<1x1xf32> to vector<1x3xf32>
    %500 = arith.subf %496, %499 : vector<1x3xf32>
    %501 = math.exp %500 : vector<1x3xf32>
    %cst_176 = arith.constant dense<0.000000e+00> : vector<1xf32>
    %502 = vector.multi_reduction <add>, %501, %cst_176 [1] : vector<1x3xf32> to vector<1xf32>
    %503 = vector.shape_cast %502 : vector<1xf32> to vector<1x1xf32>
    %504 = tpu.reciprocal %503 {approx = true} : vector<1x1xf32> -> vector<1x1xf32>
    %505 = vector.broadcast %504 : vector<1x1xf32> to vector<1x3xf32>
    %506 = arith.mulf %501, %505 : vector<1x3xf32>
    %cst_177 = arith.constant dense<0.000000e+00> : vector<1x32xf32>
    %507 = tpu.matmul %495, %463, %cst_177 {dimension_numbers = #tpu.dot_dimension_numbers<[1], [0], [0], [1], [0, 0, 1, 1], [], []>} : vector<1x8xf32>, vector<8x32xf32>, vector<1x32xf32> -> vector<1x32xf32>
    %cst_178 = arith.constant dense<0.000000e+00> : vector<1x96xf32>
    %508 = tpu.matmul %507, %469, %cst_178 {dimension_numbers = #tpu.dot_dimension_numbers<[1], [0], [0], [1], [0, 0, 1, 1], [], []>} : vector<1x32xf32>, vector<32x96xf32>, vector<1x96xf32> -> vector<1x96xf32>
    %509 = vector.extract_strided_slice %508 {offsets = [0, 0], sizes = [1, 32], strides = [1, 1]} : vector<1x96xf32> to vector<1x32xf32>
    %510 = vector.extract_strided_slice %478 {offsets = [0, 11], sizes = [1, 32], strides = [1, 1]} : vector<1x43xf32> to vector<1x32xf32>
    %511 = arith.addf %509, %510 : vector<1x32xf32>
    %512 = arith.addf %511, %471 : vector<1x32xf32>
    %cst_179 = arith.constant 0.000000e+00 : f32
    %513 = vector.broadcast %cst_179 : f32 to vector<1x32xf32>
    %514 = arith.maximumf %512, %513 : vector<1x32xf32>
    %515 = vector.extract_strided_slice %508 {offsets = [0, 32], sizes = [1, 32], strides = [1, 1]} : vector<1x96xf32> to vector<1x32xf32>
    %516 = vector.extract_strided_slice %476 {offsets = [0, 11], sizes = [1, 32], strides = [1, 1]} : vector<1x83xf32> to vector<1x32xf32>
    %517 = arith.addf %515, %516 : vector<1x32xf32>
    %518 = vector.extract_strided_slice %473 {offsets = [0, 0], sizes = [1, 32], strides = [1, 1]} : vector<1x72xf32> to vector<1x32xf32>
    %519 = arith.addf %517, %518 : vector<1x32xf32>
    %cst_180 = arith.constant 0.000000e+00 : f32
    %520 = vector.broadcast %cst_180 : f32 to vector<1x32xf32>
    %521 = arith.maximumf %519, %520 : vector<1x32xf32>
    %522 = vector.extract_strided_slice %508 {offsets = [0, 64], sizes = [1, 32], strides = [1, 1]} : vector<1x96xf32> to vector<1x32xf32>
    %523 = vector.extract_strided_slice %477 {offsets = [0, 11], sizes = [1, 32], strides = [1, 1]} : vector<1x83xf32> to vector<1x32xf32>
    %524 = arith.addf %522, %523 : vector<1x32xf32>
    %525 = vector.extract_strided_slice %475 {offsets = [0, 0], sizes = [1, 32], strides = [1, 1]} : vector<1x72xf32> to vector<1x32xf32>
    %526 = arith.addf %524, %525 : vector<1x32xf32>
    %cst_181 = arith.constant 0.000000e+00 : f32
    %527 = vector.broadcast %cst_181 : f32 to vector<1x32xf32>
    %528 = arith.maximumf %526, %527 : vector<1x32xf32>
    %529 = vector.extract_strided_slice %476 {offsets = [0, 43], sizes = [1, 40], strides = [1, 1]} : vector<1x83xf32> to vector<1x40xf32>
    %530 = vector.extract_strided_slice %473 {offsets = [0, 32], sizes = [1, 40], strides = [1, 1]} : vector<1x72xf32> to vector<1x40xf32>
    %531 = arith.addf %529, %530 : vector<1x40xf32>
    %532 = vector.extract_strided_slice %477 {offsets = [0, 43], sizes = [1, 40], strides = [1, 1]} : vector<1x83xf32> to vector<1x40xf32>
    %533 = vector.extract_strided_slice %475 {offsets = [0, 32], sizes = [1, 40], strides = [1, 1]} : vector<1x72xf32> to vector<1x40xf32>
    %534 = arith.addf %532, %533 : vector<1x40xf32>
    %535 = vector.extract_strided_slice %531 {offsets = [0, 0], sizes = [1, 8], strides = [1, 1]} : vector<1x40xf32> to vector<1x8xf32>
    %cst_182 = arith.constant dense<0xFF800000> : vector<1xf32>
    %536 = vector.multi_reduction <maximumf>, %535, %cst_182 [1] : vector<1x8xf32> to vector<1xf32>
    %537 = vector.shape_cast %536 : vector<1xf32> to vector<1x1xf32>
    %538 = vector.broadcast %537 : vector<1x1xf32> to vector<1x8xf32>
    %539 = arith.subf %535, %538 : vector<1x8xf32>
    %540 = math.exp %539 : vector<1x8xf32>
    %cst_183 = arith.constant dense<0.000000e+00> : vector<1xf32>
    %541 = vector.multi_reduction <add>, %540, %cst_183 [1] : vector<1x8xf32> to vector<1xf32>
    %542 = vector.shape_cast %541 : vector<1xf32> to vector<1x1xf32>
    %543 = tpu.reciprocal %542 {approx = true} : vector<1x1xf32> -> vector<1x1xf32>
    %544 = vector.broadcast %543 : vector<1x1xf32> to vector<1x8xf32>
    %545 = arith.mulf %540, %544 : vector<1x8xf32>
    %546 = vector.extract_strided_slice %534 {offsets = [0, 0], sizes = [1, 8], strides = [1, 1]} : vector<1x40xf32> to vector<1x8xf32>
    %cst_184 = arith.constant dense<0xFF800000> : vector<1xf32>
    %547 = vector.multi_reduction <maximumf>, %546, %cst_184 [1] : vector<1x8xf32> to vector<1xf32>
    %548 = vector.shape_cast %547 : vector<1xf32> to vector<1x1xf32>
    %549 = vector.broadcast %548 : vector<1x1xf32> to vector<1x8xf32>
    %550 = arith.subf %546, %549 : vector<1x8xf32>
    %551 = math.exp %550 : vector<1x8xf32>
    %cst_185 = arith.constant dense<0.000000e+00> : vector<1xf32>
    %552 = vector.multi_reduction <add>, %551, %cst_185 [1] : vector<1x8xf32> to vector<1xf32>
    %553 = vector.shape_cast %552 : vector<1xf32> to vector<1x1xf32>
    %554 = tpu.reciprocal %553 {approx = true} : vector<1x1xf32> -> vector<1x1xf32>
    %555 = vector.broadcast %554 : vector<1x1xf32> to vector<1x8xf32>
    %556 = arith.mulf %551, %555 : vector<1x8xf32>
    %557 = vector.extract_strided_slice %531 {offsets = [0, 8], sizes = [1, 32], strides = [1, 1]} : vector<1x40xf32> to vector<1x32xf32>
    %cst_186 = arith.constant 0.000000e+00 : f32
    %558 = vector.broadcast %cst_186 : f32 to vector<1x32xf32>
    %559 = arith.maximumf %557, %558 : vector<1x32xf32>
    %560 = vector.extract_strided_slice %534 {offsets = [0, 8], sizes = [1, 32], strides = [1, 1]} : vector<1x40xf32> to vector<1x32xf32>
    %cst_187 = arith.constant 0.000000e+00 : f32
    %561 = vector.broadcast %cst_187 : f32 to vector<1x32xf32>
    %562 = arith.maximumf %560, %561 : vector<1x32xf32>
    %563 = tpu.concatenate %545, %556 in 0 : vector<1x8xf32>, vector<1x8xf32> -> vector<2x8xf32>
    %564 = vector.extract_strided_slice %506 {offsets = [0, 1], sizes = [1, 1], strides = [1, 1]} : vector<1x3xf32> to vector<1x1xf32>
    %565 = vector.broadcast %564 : vector<1x1xf32> to vector<1x32xf32>
    %566 = arith.mulf %565, %559 : vector<1x32xf32>
    %567 = vector.extract_strided_slice %506 {offsets = [0, 2], sizes = [1, 1], strides = [1, 1]} : vector<1x3xf32> to vector<1x1xf32>
    %568 = vector.broadcast %567 : vector<1x1xf32> to vector<1x32xf32>
    %569 = arith.mulf %568, %562 : vector<1x32xf32>
    %570 = tpu.concatenate %566, %569 in 0 : vector<1x32xf32>, vector<1x32xf32> -> vector<2x32xf32>
    %cst_188 = arith.constant dense<0.000000e+00> : vector<8x32xf32>
    %571 = tpu.matmul %563, %570, %cst_188 {dimension_numbers = #tpu.dot_dimension_numbers<[0], [0], [1], [1], [0, 1, 1, 1], [], []>} : vector<2x8xf32>, vector<2x32xf32>, vector<8x32xf32> -> vector<8x32xf32>
    %572 = vector.extract_strided_slice %506 {offsets = [0, 0], sizes = [1, 1], strides = [1, 1]} : vector<1x3xf32> to vector<1x1xf32>
    %573 = vector.broadcast %572 : vector<1x1xf32> to vector<8x32xf32>
    %574 = arith.mulf %573, %463 : vector<8x32xf32>
    %575 = arith.addf %574, %571 : vector<8x32xf32>
    %576 = arith.index_cast %c4_i32 : i32 to index
    %c0_189 = arith.constant 0 : index
    %577 = vector.load %arg13[%576, %c0_189] : memref<8x32xf32, #tpu.memory_space<vmem>>, vector<1x32xf32>
    tpu.vector_store %arg13[%576, %c0_189], %514 {strides = array<i32>} : memref<8x32xf32, #tpu.memory_space<vmem>>, vector<1x32xf32>,
    %c5_i32 = arith.constant 5 : i32
    %c0_190 = arith.constant 0 : index
    %c0_191 = arith.constant 0 : index
    %578 = vector.load %arg7[%c0_190, %c0_191] : memref<32x83xf32, #tpu.memory_space<vmem>>, vector<32x83xf32>
    %c0_192 = arith.constant 0 : index
    %c0_193 = arith.constant 0 : index
    %579 = vector.load %arg8[%c0_192, %c0_193] : memref<32x83xf32, #tpu.memory_space<vmem>>, vector<32x83xf32>
    %c0_194 = arith.constant 0 : index
    %c0_195 = arith.constant 0 : index
    %580 = vector.load %arg9[%c0_194, %c0_195] : memref<32x43xf32, #tpu.memory_space<vmem>>, vector<32x43xf32>
    %c0_196 = arith.constant 0 : index
    %c0_197 = arith.constant 0 : index
    %581 = vector.load %arg10[%c0_196, %c0_197] : memref<32x96xf32, #tpu.memory_space<vmem>>, vector<32x96xf32>
    %c0_198 = arith.constant 0 : index
    %c0_199 = arith.constant 0 : index
    %582 = vector.load %arg11[%c0_198, %c0_199] : memref<1x11xf32, #tpu.memory_space<vmem>>, vector<1x11xf32>
    %c0_200 = arith.constant 0 : index
    %c0_201 = arith.constant 0 : index
    %583 = vector.load %arg12[%c0_200, %c0_201] : memref<1x32xf32, #tpu.memory_space<vmem>>, vector<1x32xf32>
    %584 = arith.index_cast %c5_i32 : i32 to index
    %c0_202 = arith.constant 0 : index
    %585 = vector.load %arg14[%584, %c0_202] : memref<8x72xf32, #tpu.memory_space<vmem>>, vector<1x72xf32>
    %586 = arith.index_cast %c5_i32 : i32 to index
    %c0_203 = arith.constant 0 : index
    %587 = vector.load %arg15[%586, %c0_203] : memref<8x72xf32, #tpu.memory_space<vmem>>, vector<1x72xf32>
    %cst_204 = arith.constant dense<0.000000e+00> : vector<1x83xf32>
    %588 = tpu.matmul %521, %578, %cst_204 {dimension_numbers = #tpu.dot_dimension_numbers<[1], [0], [0], [1], [0, 0, 1, 1], [], []>} : vector<1x32xf32>, vector<32x83xf32>, vector<1x83xf32> -> vector<1x83xf32>
    %cst_205 = arith.constant dense<0.000000e+00> : vector<1x83xf32>
    %589 = tpu.matmul %528, %579, %cst_205 {dimension_numbers = #tpu.dot_dimension_numbers<[1], [0], [0], [1], [0, 0, 1, 1], [], []>} : vector<1x32xf32>, vector<32x83xf32>, vector<1x83xf32> -> vector<1x83xf32>
    %cst_206 = arith.constant dense<0.000000e+00> : vector<1x43xf32>
    %590 = tpu.matmul %514, %580, %cst_206 {dimension_numbers = #tpu.dot_dimension_numbers<[1], [0], [0], [1], [0, 0, 1, 1], [], []>} : vector<1x32xf32>, vector<32x43xf32>, vector<1x43xf32> -> vector<1x43xf32>
    %591 = vector.extract_strided_slice %588 {offsets = [0, 0], sizes = [1, 11], strides = [1, 1]} : vector<1x83xf32> to vector<1x11xf32>
    %592 = vector.extract_strided_slice %589 {offsets = [0, 0], sizes = [1, 11], strides = [1, 1]} : vector<1x83xf32> to vector<1x11xf32>
    %593 = arith.addf %591, %592 : vector<1x11xf32>
    %594 = vector.extract_strided_slice %590 {offsets = [0, 0], sizes = [1, 11], strides = [1, 1]} : vector<1x43xf32> to vector<1x11xf32>
    %595 = arith.addf %593, %594 : vector<1x11xf32>
    %596 = arith.addf %595, %582 : vector<1x11xf32>
    %597 = vector.extract_strided_slice %596 {offsets = [0, 0], sizes = [1, 8], strides = [1, 1]} : vector<1x11xf32> to vector<1x8xf32>
    %cst_207 = arith.constant dense<0xFF800000> : vector<1xf32>
    %598 = vector.multi_reduction <maximumf>, %597, %cst_207 [1] : vector<1x8xf32> to vector<1xf32>
    %599 = vector.shape_cast %598 : vector<1xf32> to vector<1x1xf32>
    %600 = vector.broadcast %599 : vector<1x1xf32> to vector<1x8xf32>
    %601 = arith.subf %597, %600 : vector<1x8xf32>
    %602 = math.exp %601 : vector<1x8xf32>
    %cst_208 = arith.constant dense<0.000000e+00> : vector<1xf32>
    %603 = vector.multi_reduction <add>, %602, %cst_208 [1] : vector<1x8xf32> to vector<1xf32>
    %604 = vector.shape_cast %603 : vector<1xf32> to vector<1x1xf32>
    %605 = tpu.reciprocal %604 {approx = true} : vector<1x1xf32> -> vector<1x1xf32>
    %606 = vector.broadcast %605 : vector<1x1xf32> to vector<1x8xf32>
    %607 = arith.mulf %602, %606 : vector<1x8xf32>
    %608 = vector.extract_strided_slice %596 {offsets = [0, 8], sizes = [1, 3], strides = [1, 1]} : vector<1x11xf32> to vector<1x3xf32>
    %cst_209 = arith.constant dense<0xFF800000> : vector<1xf32>
    %609 = vector.multi_reduction <maximumf>, %608, %cst_209 [1] : vector<1x3xf32> to vector<1xf32>
    %610 = vector.shape_cast %609 : vector<1xf32> to vector<1x1xf32>
    %611 = vector.broadcast %610 : vector<1x1xf32> to vector<1x3xf32>
    %612 = arith.subf %608, %611 : vector<1x3xf32>
    %613 = math.exp %612 : vector<1x3xf32>
    %cst_210 = arith.constant dense<0.000000e+00> : vector<1xf32>
    %614 = vector.multi_reduction <add>, %613, %cst_210 [1] : vector<1x3xf32> to vector<1xf32>
    %615 = vector.shape_cast %614 : vector<1xf32> to vector<1x1xf32>
    %616 = tpu.reciprocal %615 {approx = true} : vector<1x1xf32> -> vector<1x1xf32>
    %617 = vector.broadcast %616 : vector<1x1xf32> to vector<1x3xf32>
    %618 = arith.mulf %613, %617 : vector<1x3xf32>
    %cst_211 = arith.constant dense<0.000000e+00> : vector<1x32xf32>
    %619 = tpu.matmul %607, %575, %cst_211 {dimension_numbers = #tpu.dot_dimension_numbers<[1], [0], [0], [1], [0, 0, 1, 1], [], []>} : vector<1x8xf32>, vector<8x32xf32>, vector<1x32xf32> -> vector<1x32xf32>
    %cst_212 = arith.constant dense<0.000000e+00> : vector<1x96xf32>
    %620 = tpu.matmul %619, %581, %cst_212 {dimension_numbers = #tpu.dot_dimension_numbers<[1], [0], [0], [1], [0, 0, 1, 1], [], []>} : vector<1x32xf32>, vector<32x96xf32>, vector<1x96xf32> -> vector<1x96xf32>
    %621 = vector.extract_strided_slice %620 {offsets = [0, 0], sizes = [1, 32], strides = [1, 1]} : vector<1x96xf32> to vector<1x32xf32>
    %622 = vector.extract_strided_slice %590 {offsets = [0, 11], sizes = [1, 32], strides = [1, 1]} : vector<1x43xf32> to vector<1x32xf32>
    %623 = arith.addf %621, %622 : vector<1x32xf32>
    %624 = arith.addf %623, %583 : vector<1x32xf32>
    %cst_213 = arith.constant 0.000000e+00 : f32
    %625 = vector.broadcast %cst_213 : f32 to vector<1x32xf32>
    %626 = arith.maximumf %624, %625 : vector<1x32xf32>
    %627 = vector.extract_strided_slice %620 {offsets = [0, 32], sizes = [1, 32], strides = [1, 1]} : vector<1x96xf32> to vector<1x32xf32>
    %628 = vector.extract_strided_slice %588 {offsets = [0, 11], sizes = [1, 32], strides = [1, 1]} : vector<1x83xf32> to vector<1x32xf32>
    %629 = arith.addf %627, %628 : vector<1x32xf32>
    %630 = vector.extract_strided_slice %585 {offsets = [0, 0], sizes = [1, 32], strides = [1, 1]} : vector<1x72xf32> to vector<1x32xf32>
    %631 = arith.addf %629, %630 : vector<1x32xf32>
    %cst_214 = arith.constant 0.000000e+00 : f32
    %632 = vector.broadcast %cst_214 : f32 to vector<1x32xf32>
    %633 = arith.maximumf %631, %632 : vector<1x32xf32>
    %634 = vector.extract_strided_slice %620 {offsets = [0, 64], sizes = [1, 32], strides = [1, 1]} : vector<1x96xf32> to vector<1x32xf32>
    %635 = vector.extract_strided_slice %589 {offsets = [0, 11], sizes = [1, 32], strides = [1, 1]} : vector<1x83xf32> to vector<1x32xf32>
    %636 = arith.addf %634, %635 : vector<1x32xf32>
    %637 = vector.extract_strided_slice %587 {offsets = [0, 0], sizes = [1, 32], strides = [1, 1]} : vector<1x72xf32> to vector<1x32xf32>
    %638 = arith.addf %636, %637 : vector<1x32xf32>
    %cst_215 = arith.constant 0.000000e+00 : f32
    %639 = vector.broadcast %cst_215 : f32 to vector<1x32xf32>
    %640 = arith.maximumf %638, %639 : vector<1x32xf32>
    %641 = vector.extract_strided_slice %588 {offsets = [0, 43], sizes = [1, 40], strides = [1, 1]} : vector<1x83xf32> to vector<1x40xf32>
    %642 = vector.extract_strided_slice %585 {offsets = [0, 32], sizes = [1, 40], strides = [1, 1]} : vector<1x72xf32> to vector<1x40xf32>
    %643 = arith.addf %641, %642 : vector<1x40xf32>
    %644 = vector.extract_strided_slice %589 {offsets = [0, 43], sizes = [1, 40], strides = [1, 1]} : vector<1x83xf32> to vector<1x40xf32>
    %645 = vector.extract_strided_slice %587 {offsets = [0, 32], sizes = [1, 40], strides = [1, 1]} : vector<1x72xf32> to vector<1x40xf32>
    %646 = arith.addf %644, %645 : vector<1x40xf32>
    %647 = vector.extract_strided_slice %643 {offsets = [0, 0], sizes = [1, 8], strides = [1, 1]} : vector<1x40xf32> to vector<1x8xf32>
    %cst_216 = arith.constant dense<0xFF800000> : vector<1xf32>
    %648 = vector.multi_reduction <maximumf>, %647, %cst_216 [1] : vector<1x8xf32> to vector<1xf32>
    %649 = vector.shape_cast %648 : vector<1xf32> to vector<1x1xf32>
    %650 = vector.broadcast %649 : vector<1x1xf32> to vector<1x8xf32>
    %651 = arith.subf %647, %650 : vector<1x8xf32>
    %652 = math.exp %651 : vector<1x8xf32>
    %cst_217 = arith.constant dense<0.000000e+00> : vector<1xf32>
    %653 = vector.multi_reduction <add>, %652, %cst_217 [1] : vector<1x8xf32> to vector<1xf32>
    %654 = vector.shape_cast %653 : vector<1xf32> to vector<1x1xf32>
    %655 = tpu.reciprocal %654 {approx = true} : vector<1x1xf32> -> vector<1x1xf32>
    %656 = vector.broadcast %655 : vector<1x1xf32> to vector<1x8xf32>
    %657 = arith.mulf %652, %656 : vector<1x8xf32>
    %658 = vector.extract_strided_slice %646 {offsets = [0, 0], sizes = [1, 8], strides = [1, 1]} : vector<1x40xf32> to vector<1x8xf32>
    %cst_218 = arith.constant dense<0xFF800000> : vector<1xf32>
    %659 = vector.multi_reduction <maximumf>, %658, %cst_218 [1] : vector<1x8xf32> to vector<1xf32>
    %660 = vector.shape_cast %659 : vector<1xf32> to vector<1x1xf32>
    %661 = vector.broadcast %660 : vector<1x1xf32> to vector<1x8xf32>
    %662 = arith.subf %658, %661 : vector<1x8xf32>
    %663 = math.exp %662 : vector<1x8xf32>
    %cst_219 = arith.constant dense<0.000000e+00> : vector<1xf32>
    %664 = vector.multi_reduction <add>, %663, %cst_219 [1] : vector<1x8xf32> to vector<1xf32>
    %665 = vector.shape_cast %664 : vector<1xf32> to vector<1x1xf32>
    %666 = tpu.reciprocal %665 {approx = true} : vector<1x1xf32> -> vector<1x1xf32>
    %667 = vector.broadcast %666 : vector<1x1xf32> to vector<1x8xf32>
    %668 = arith.mulf %663, %667 : vector<1x8xf32>
    %669 = vector.extract_strided_slice %643 {offsets = [0, 8], sizes = [1, 32], strides = [1, 1]} : vector<1x40xf32> to vector<1x32xf32>
    %cst_220 = arith.constant 0.000000e+00 : f32
    %670 = vector.broadcast %cst_220 : f32 to vector<1x32xf32>
    %671 = arith.maximumf %669, %670 : vector<1x32xf32>
    %672 = vector.extract_strided_slice %646 {offsets = [0, 8], sizes = [1, 32], strides = [1, 1]} : vector<1x40xf32> to vector<1x32xf32>
    %cst_221 = arith.constant 0.000000e+00 : f32
    %673 = vector.broadcast %cst_221 : f32 to vector<1x32xf32>
    %674 = arith.maximumf %672, %673 : vector<1x32xf32>
    %675 = tpu.concatenate %657, %668 in 0 : vector<1x8xf32>, vector<1x8xf32> -> vector<2x8xf32>
    %676 = vector.extract_strided_slice %618 {offsets = [0, 1], sizes = [1, 1], strides = [1, 1]} : vector<1x3xf32> to vector<1x1xf32>
    %677 = vector.broadcast %676 : vector<1x1xf32> to vector<1x32xf32>
    %678 = arith.mulf %677, %671 : vector<1x32xf32>
    %679 = vector.extract_strided_slice %618 {offsets = [0, 2], sizes = [1, 1], strides = [1, 1]} : vector<1x3xf32> to vector<1x1xf32>
    %680 = vector.broadcast %679 : vector<1x1xf32> to vector<1x32xf32>
    %681 = arith.mulf %680, %674 : vector<1x32xf32>
    %682 = tpu.concatenate %678, %681 in 0 : vector<1x32xf32>, vector<1x32xf32> -> vector<2x32xf32>
    %cst_222 = arith.constant dense<0.000000e+00> : vector<8x32xf32>
    %683 = tpu.matmul %675, %682, %cst_222 {dimension_numbers = #tpu.dot_dimension_numbers<[0], [0], [1], [1], [0, 1, 1, 1], [], []>} : vector<2x8xf32>, vector<2x32xf32>, vector<8x32xf32> -> vector<8x32xf32>
    %684 = vector.extract_strided_slice %618 {offsets = [0, 0], sizes = [1, 1], strides = [1, 1]} : vector<1x3xf32> to vector<1x1xf32>
    %685 = vector.broadcast %684 : vector<1x1xf32> to vector<8x32xf32>
    %686 = arith.mulf %685, %575 : vector<8x32xf32>
    %687 = arith.addf %686, %683 : vector<8x32xf32>
    %688 = arith.index_cast %c5_i32 : i32 to index
    %c0_223 = arith.constant 0 : index
    %689 = vector.load %arg13[%688, %c0_223] : memref<8x32xf32, #tpu.memory_space<vmem>>, vector<1x32xf32>
    tpu.vector_store %arg13[%688, %c0_223], %626 {strides = array<i32>} : memref<8x32xf32, #tpu.memory_space<vmem>>, vector<1x32xf32>,
    %c6_i32 = arith.constant 6 : i32
    %c0_224 = arith.constant 0 : index
    %c0_225 = arith.constant 0 : index
    %690 = vector.load %arg7[%c0_224, %c0_225] : memref<32x83xf32, #tpu.memory_space<vmem>>, vector<32x83xf32>
    %c0_226 = arith.constant 0 : index
    %c0_227 = arith.constant 0 : index
    %691 = vector.load %arg8[%c0_226, %c0_227] : memref<32x83xf32, #tpu.memory_space<vmem>>, vector<32x83xf32>
    %c0_228 = arith.constant 0 : index
    %c0_229 = arith.constant 0 : index
    %692 = vector.load %arg9[%c0_228, %c0_229] : memref<32x43xf32, #tpu.memory_space<vmem>>, vector<32x43xf32>
    %c0_230 = arith.constant 0 : index
    %c0_231 = arith.constant 0 : index
    %693 = vector.load %arg10[%c0_230, %c0_231] : memref<32x96xf32, #tpu.memory_space<vmem>>, vector<32x96xf32>
    %c0_232 = arith.constant 0 : index
    %c0_233 = arith.constant 0 : index
    %694 = vector.load %arg11[%c0_232, %c0_233] : memref<1x11xf32, #tpu.memory_space<vmem>>, vector<1x11xf32>
    %c0_234 = arith.constant 0 : index
    %c0_235 = arith.constant 0 : index
    %695 = vector.load %arg12[%c0_234, %c0_235] : memref<1x32xf32, #tpu.memory_space<vmem>>, vector<1x32xf32>
    %696 = arith.index_cast %c6_i32 : i32 to index
    %c0_236 = arith.constant 0 : index
    %697 = vector.load %arg14[%696, %c0_236] : memref<8x72xf32, #tpu.memory_space<vmem>>, vector<1x72xf32>
    %698 = arith.index_cast %c6_i32 : i32 to index
    %c0_237 = arith.constant 0 : index
    %699 = vector.load %arg15[%698, %c0_237] : memref<8x72xf32, #tpu.memory_space<vmem>>, vector<1x72xf32>
    %cst_238 = arith.constant dense<0.000000e+00> : vector<1x83xf32>
    %700 = tpu.matmul %633, %690, %cst_238 {dimension_numbers = #tpu.dot_dimension_numbers<[1], [0], [0], [1], [0, 0, 1, 1], [], []>} : vector<1x32xf32>, vector<32x83xf32>, vector<1x83xf32> -> vector<1x83xf32>
    %cst_239 = arith.constant dense<0.000000e+00> : vector<1x83xf32>
    %701 = tpu.matmul %640, %691, %cst_239 {dimension_numbers = #tpu.dot_dimension_numbers<[1], [0], [0], [1], [0, 0, 1, 1], [], []>} : vector<1x32xf32>, vector<32x83xf32>, vector<1x83xf32> -> vector<1x83xf32>
    %cst_240 = arith.constant dense<0.000000e+00> : vector<1x43xf32>
    %702 = tpu.matmul %626, %692, %cst_240 {dimension_numbers = #tpu.dot_dimension_numbers<[1], [0], [0], [1], [0, 0, 1, 1], [], []>} : vector<1x32xf32>, vector<32x43xf32>, vector<1x43xf32> -> vector<1x43xf32>
    %703 = vector.extract_strided_slice %700 {offsets = [0, 0], sizes = [1, 11], strides = [1, 1]} : vector<1x83xf32> to vector<1x11xf32>
    %704 = vector.extract_strided_slice %701 {offsets = [0, 0], sizes = [1, 11], strides = [1, 1]} : vector<1x83xf32> to vector<1x11xf32>
    %705 = arith.addf %703, %704 : vector<1x11xf32>
    %706 = vector.extract_strided_slice %702 {offsets = [0, 0], sizes = [1, 11], strides = [1, 1]} : vector<1x43xf32> to vector<1x11xf32>
    %707 = arith.addf %705, %706 : vector<1x11xf32>
    %708 = arith.addf %707, %694 : vector<1x11xf32>
    %709 = vector.extract_strided_slice %708 {offsets = [0, 0], sizes = [1, 8], strides = [1, 1]} : vector<1x11xf32> to vector<1x8xf32>
    %cst_241 = arith.constant dense<0xFF800000> : vector<1xf32>
    %710 = vector.multi_reduction <maximumf>, %709, %cst_241 [1] : vector<1x8xf32> to vector<1xf32>
    %711 = vector.shape_cast %710 : vector<1xf32> to vector<1x1xf32>
    %712 = vector.broadcast %711 : vector<1x1xf32> to vector<1x8xf32>
    %713 = arith.subf %709, %712 : vector<1x8xf32>
    %714 = math.exp %713 : vector<1x8xf32>
    %cst_242 = arith.constant dense<0.000000e+00> : vector<1xf32>
    %715 = vector.multi_reduction <add>, %714, %cst_242 [1] : vector<1x8xf32> to vector<1xf32>
    %716 = vector.shape_cast %715 : vector<1xf32> to vector<1x1xf32>
    %717 = tpu.reciprocal %716 {approx = true} : vector<1x1xf32> -> vector<1x1xf32>
    %718 = vector.broadcast %717 : vector<1x1xf32> to vector<1x8xf32>
    %719 = arith.mulf %714, %718 : vector<1x8xf32>
    %720 = vector.extract_strided_slice %708 {offsets = [0, 8], sizes = [1, 3], strides = [1, 1]} : vector<1x11xf32> to vector<1x3xf32>
    %cst_243 = arith.constant dense<0xFF800000> : vector<1xf32>
    %721 = vector.multi_reduction <maximumf>, %720, %cst_243 [1] : vector<1x3xf32> to vector<1xf32>
    %722 = vector.shape_cast %721 : vector<1xf32> to vector<1x1xf32>
    %723 = vector.broadcast %722 : vector<1x1xf32> to vector<1x3xf32>
    %724 = arith.subf %720, %723 : vector<1x3xf32>
    %725 = math.exp %724 : vector<1x3xf32>
    %cst_244 = arith.constant dense<0.000000e+00> : vector<1xf32>
    %726 = vector.multi_reduction <add>, %725, %cst_244 [1] : vector<1x3xf32> to vector<1xf32>
    %727 = vector.shape_cast %726 : vector<1xf32> to vector<1x1xf32>
    %728 = tpu.reciprocal %727 {approx = true} : vector<1x1xf32> -> vector<1x1xf32>
    %729 = vector.broadcast %728 : vector<1x1xf32> to vector<1x3xf32>
    %730 = arith.mulf %725, %729 : vector<1x3xf32>
    %cst_245 = arith.constant dense<0.000000e+00> : vector<1x32xf32>
    %731 = tpu.matmul %719, %687, %cst_245 {dimension_numbers = #tpu.dot_dimension_numbers<[1], [0], [0], [1], [0, 0, 1, 1], [], []>} : vector<1x8xf32>, vector<8x32xf32>, vector<1x32xf32> -> vector<1x32xf32>
    %cst_246 = arith.constant dense<0.000000e+00> : vector<1x96xf32>
    %732 = tpu.matmul %731, %693, %cst_246 {dimension_numbers = #tpu.dot_dimension_numbers<[1], [0], [0], [1], [0, 0, 1, 1], [], []>} : vector<1x32xf32>, vector<32x96xf32>, vector<1x96xf32> -> vector<1x96xf32>
    %733 = vector.extract_strided_slice %732 {offsets = [0, 0], sizes = [1, 32], strides = [1, 1]} : vector<1x96xf32> to vector<1x32xf32>
    %734 = vector.extract_strided_slice %702 {offsets = [0, 11], sizes = [1, 32], strides = [1, 1]} : vector<1x43xf32> to vector<1x32xf32>
    %735 = arith.addf %733, %734 : vector<1x32xf32>
    %736 = arith.addf %735, %695 : vector<1x32xf32>
    %cst_247 = arith.constant 0.000000e+00 : f32
    %737 = vector.broadcast %cst_247 : f32 to vector<1x32xf32>
    %738 = arith.maximumf %736, %737 : vector<1x32xf32>
    %739 = vector.extract_strided_slice %732 {offsets = [0, 32], sizes = [1, 32], strides = [1, 1]} : vector<1x96xf32> to vector<1x32xf32>
    %740 = vector.extract_strided_slice %700 {offsets = [0, 11], sizes = [1, 32], strides = [1, 1]} : vector<1x83xf32> to vector<1x32xf32>
    %741 = arith.addf %739, %740 : vector<1x32xf32>
    %742 = vector.extract_strided_slice %697 {offsets = [0, 0], sizes = [1, 32], strides = [1, 1]} : vector<1x72xf32> to vector<1x32xf32>
    %743 = arith.addf %741, %742 : vector<1x32xf32>
    %cst_248 = arith.constant 0.000000e+00 : f32
    %744 = vector.broadcast %cst_248 : f32 to vector<1x32xf32>
    %745 = arith.maximumf %743, %744 : vector<1x32xf32>
    %746 = vector.extract_strided_slice %732 {offsets = [0, 64], sizes = [1, 32], strides = [1, 1]} : vector<1x96xf32> to vector<1x32xf32>
    %747 = vector.extract_strided_slice %701 {offsets = [0, 11], sizes = [1, 32], strides = [1, 1]} : vector<1x83xf32> to vector<1x32xf32>
    %748 = arith.addf %746, %747 : vector<1x32xf32>
    %749 = vector.extract_strided_slice %699 {offsets = [0, 0], sizes = [1, 32], strides = [1, 1]} : vector<1x72xf32> to vector<1x32xf32>
    %750 = arith.addf %748, %749 : vector<1x32xf32>
    %cst_249 = arith.constant 0.000000e+00 : f32
    %751 = vector.broadcast %cst_249 : f32 to vector<1x32xf32>
    %752 = arith.maximumf %750, %751 : vector<1x32xf32>
    %753 = vector.extract_strided_slice %700 {offsets = [0, 43], sizes = [1, 40], strides = [1, 1]} : vector<1x83xf32> to vector<1x40xf32>
    %754 = vector.extract_strided_slice %697 {offsets = [0, 32], sizes = [1, 40], strides = [1, 1]} : vector<1x72xf32> to vector<1x40xf32>
    %755 = arith.addf %753, %754 : vector<1x40xf32>
    %756 = vector.extract_strided_slice %701 {offsets = [0, 43], sizes = [1, 40], strides = [1, 1]} : vector<1x83xf32> to vector<1x40xf32>
    %757 = vector.extract_strided_slice %699 {offsets = [0, 32], sizes = [1, 40], strides = [1, 1]} : vector<1x72xf32> to vector<1x40xf32>
    %758 = arith.addf %756, %757 : vector<1x40xf32>
    %759 = vector.extract_strided_slice %755 {offsets = [0, 0], sizes = [1, 8], strides = [1, 1]} : vector<1x40xf32> to vector<1x8xf32>
    %cst_250 = arith.constant dense<0xFF800000> : vector<1xf32>
    %760 = vector.multi_reduction <maximumf>, %759, %cst_250 [1] : vector<1x8xf32> to vector<1xf32>
    %761 = vector.shape_cast %760 : vector<1xf32> to vector<1x1xf32>
    %762 = vector.broadcast %761 : vector<1x1xf32> to vector<1x8xf32>
    %763 = arith.subf %759, %762 : vector<1x8xf32>
    %764 = math.exp %763 : vector<1x8xf32>
    %cst_251 = arith.constant dense<0.000000e+00> : vector<1xf32>
    %765 = vector.multi_reduction <add>, %764, %cst_251 [1] : vector<1x8xf32> to vector<1xf32>
    %766 = vector.shape_cast %765 : vector<1xf32> to vector<1x1xf32>
    %767 = tpu.reciprocal %766 {approx = true} : vector<1x1xf32> -> vector<1x1xf32>
    %768 = vector.broadcast %767 : vector<1x1xf32> to vector<1x8xf32>
    %769 = arith.mulf %764, %768 : vector<1x8xf32>
    %770 = vector.extract_strided_slice %758 {offsets = [0, 0], sizes = [1, 8], strides = [1, 1]} : vector<1x40xf32> to vector<1x8xf32>
    %cst_252 = arith.constant dense<0xFF800000> : vector<1xf32>
    %771 = vector.multi_reduction <maximumf>, %770, %cst_252 [1] : vector<1x8xf32> to vector<1xf32>
    %772 = vector.shape_cast %771 : vector<1xf32> to vector<1x1xf32>
    %773 = vector.broadcast %772 : vector<1x1xf32> to vector<1x8xf32>
    %774 = arith.subf %770, %773 : vector<1x8xf32>
    %775 = math.exp %774 : vector<1x8xf32>
    %cst_253 = arith.constant dense<0.000000e+00> : vector<1xf32>
    %776 = vector.multi_reduction <add>, %775, %cst_253 [1] : vector<1x8xf32> to vector<1xf32>
    %777 = vector.shape_cast %776 : vector<1xf32> to vector<1x1xf32>
    %778 = tpu.reciprocal %777 {approx = true} : vector<1x1xf32> -> vector<1x1xf32>
    %779 = vector.broadcast %778 : vector<1x1xf32> to vector<1x8xf32>
    %780 = arith.mulf %775, %779 : vector<1x8xf32>
    %781 = vector.extract_strided_slice %755 {offsets = [0, 8], sizes = [1, 32], strides = [1, 1]} : vector<1x40xf32> to vector<1x32xf32>
    %cst_254 = arith.constant 0.000000e+00 : f32
    %782 = vector.broadcast %cst_254 : f32 to vector<1x32xf32>
    %783 = arith.maximumf %781, %782 : vector<1x32xf32>
    %784 = vector.extract_strided_slice %758 {offsets = [0, 8], sizes = [1, 32], strides = [1, 1]} : vector<1x40xf32> to vector<1x32xf32>
    %cst_255 = arith.constant 0.000000e+00 : f32
    %785 = vector.broadcast %cst_255 : f32 to vector<1x32xf32>
    %786 = arith.maximumf %784, %785 : vector<1x32xf32>
    %787 = tpu.concatenate %769, %780 in 0 : vector<1x8xf32>, vector<1x8xf32> -> vector<2x8xf32>
    %788 = vector.extract_strided_slice %730 {offsets = [0, 1], sizes = [1, 1], strides = [1, 1]} : vector<1x3xf32> to vector<1x1xf32>
    %789 = vector.broadcast %788 : vector<1x1xf32> to vector<1x32xf32>
    %790 = arith.mulf %789, %783 : vector<1x32xf32>
    %791 = vector.extract_strided_slice %730 {offsets = [0, 2], sizes = [1, 1], strides = [1, 1]} : vector<1x3xf32> to vector<1x1xf32>
    %792 = vector.broadcast %791 : vector<1x1xf32> to vector<1x32xf32>
    %793 = arith.mulf %792, %786 : vector<1x32xf32>
    %794 = tpu.concatenate %790, %793 in 0 : vector<1x32xf32>, vector<1x32xf32> -> vector<2x32xf32>
    %cst_256 = arith.constant dense<0.000000e+00> : vector<8x32xf32>
    %795 = tpu.matmul %787, %794, %cst_256 {dimension_numbers = #tpu.dot_dimension_numbers<[0], [0], [1], [1], [0, 1, 1, 1], [], []>} : vector<2x8xf32>, vector<2x32xf32>, vector<8x32xf32> -> vector<8x32xf32>
    %796 = vector.extract_strided_slice %730 {offsets = [0, 0], sizes = [1, 1], strides = [1, 1]} : vector<1x3xf32> to vector<1x1xf32>
    %797 = vector.broadcast %796 : vector<1x1xf32> to vector<8x32xf32>
    %798 = arith.mulf %797, %687 : vector<8x32xf32>
    %799 = arith.addf %798, %795 : vector<8x32xf32>
    %800 = arith.index_cast %c6_i32 : i32 to index
    %c0_257 = arith.constant 0 : index
    %801 = vector.load %arg13[%800, %c0_257] : memref<8x32xf32, #tpu.memory_space<vmem>>, vector<1x32xf32>
    tpu.vector_store %arg13[%800, %c0_257], %738 {strides = array<i32>} : memref<8x32xf32, #tpu.memory_space<vmem>>, vector<1x32xf32>,
    %c7_i32 = arith.constant 7 : i32
    %c0_258 = arith.constant 0 : index
    %c0_259 = arith.constant 0 : index
    %802 = vector.load %arg7[%c0_258, %c0_259] : memref<32x83xf32, #tpu.memory_space<vmem>>, vector<32x83xf32>
    %c0_260 = arith.constant 0 : index
    %c0_261 = arith.constant 0 : index
    %803 = vector.load %arg8[%c0_260, %c0_261] : memref<32x83xf32, #tpu.memory_space<vmem>>, vector<32x83xf32>
    %c0_262 = arith.constant 0 : index
    %c0_263 = arith.constant 0 : index
    %804 = vector.load %arg9[%c0_262, %c0_263] : memref<32x43xf32, #tpu.memory_space<vmem>>, vector<32x43xf32>
    %c0_264 = arith.constant 0 : index
    %c0_265 = arith.constant 0 : index
    %805 = vector.load %arg10[%c0_264, %c0_265] : memref<32x96xf32, #tpu.memory_space<vmem>>, vector<32x96xf32>
    %c0_266 = arith.constant 0 : index
    %c0_267 = arith.constant 0 : index
    %806 = vector.load %arg11[%c0_266, %c0_267] : memref<1x11xf32, #tpu.memory_space<vmem>>, vector<1x11xf32>
    %c0_268 = arith.constant 0 : index
    %c0_269 = arith.constant 0 : index
    %807 = vector.load %arg12[%c0_268, %c0_269] : memref<1x32xf32, #tpu.memory_space<vmem>>, vector<1x32xf32>
    %808 = arith.index_cast %c7_i32 : i32 to index
    %c0_270 = arith.constant 0 : index
    %809 = vector.load %arg14[%808, %c0_270] : memref<8x72xf32, #tpu.memory_space<vmem>>, vector<1x72xf32>
    %810 = arith.index_cast %c7_i32 : i32 to index
    %c0_271 = arith.constant 0 : index
    %811 = vector.load %arg15[%810, %c0_271] : memref<8x72xf32, #tpu.memory_space<vmem>>, vector<1x72xf32>
    %cst_272 = arith.constant dense<0.000000e+00> : vector<1x83xf32>
    %812 = tpu.matmul %745, %802, %cst_272 {dimension_numbers = #tpu.dot_dimension_numbers<[1], [0], [0], [1], [0, 0, 1, 1], [], []>} : vector<1x32xf32>, vector<32x83xf32>, vector<1x83xf32> -> vector<1x83xf32>
    %cst_273 = arith.constant dense<0.000000e+00> : vector<1x83xf32>
    %813 = tpu.matmul %752, %803, %cst_273 {dimension_numbers = #tpu.dot_dimension_numbers<[1], [0], [0], [1], [0, 0, 1, 1], [], []>} : vector<1x32xf32>, vector<32x83xf32>, vector<1x83xf32> -> vector<1x83xf32>
    %cst_274 = arith.constant dense<0.000000e+00> : vector<1x43xf32>
    %814 = tpu.matmul %738, %804, %cst_274 {dimension_numbers = #tpu.dot_dimension_numbers<[1], [0], [0], [1], [0, 0, 1, 1], [], []>} : vector<1x32xf32>, vector<32x43xf32>, vector<1x43xf32> -> vector<1x43xf32>
    %815 = vector.extract_strided_slice %812 {offsets = [0, 0], sizes = [1, 11], strides = [1, 1]} : vector<1x83xf32> to vector<1x11xf32>
    %816 = vector.extract_strided_slice %813 {offsets = [0, 0], sizes = [1, 11], strides = [1, 1]} : vector<1x83xf32> to vector<1x11xf32>
    %817 = arith.addf %815, %816 : vector<1x11xf32>
    %818 = vector.extract_strided_slice %814 {offsets = [0, 0], sizes = [1, 11], strides = [1, 1]} : vector<1x43xf32> to vector<1x11xf32>
    %819 = arith.addf %817, %818 : vector<1x11xf32>
    %820 = arith.addf %819, %806 : vector<1x11xf32>
    %821 = vector.extract_strided_slice %820 {offsets = [0, 0], sizes = [1, 8], strides = [1, 1]} : vector<1x11xf32> to vector<1x8xf32>
    %cst_275 = arith.constant dense<0xFF800000> : vector<1xf32>
    %822 = vector.multi_reduction <maximumf>, %821, %cst_275 [1] : vector<1x8xf32> to vector<1xf32>
    %823 = vector.shape_cast %822 : vector<1xf32> to vector<1x1xf32>
    %824 = vector.broadcast %823 : vector<1x1xf32> to vector<1x8xf32>
    %825 = arith.subf %821, %824 : vector<1x8xf32>
    %826 = math.exp %825 : vector<1x8xf32>
    %cst_276 = arith.constant dense<0.000000e+00> : vector<1xf32>
    %827 = vector.multi_reduction <add>, %826, %cst_276 [1] : vector<1x8xf32> to vector<1xf32>
    %828 = vector.shape_cast %827 : vector<1xf32> to vector<1x1xf32>
    %829 = tpu.reciprocal %828 {approx = true} : vector<1x1xf32> -> vector<1x1xf32>
    %830 = vector.broadcast %829 : vector<1x1xf32> to vector<1x8xf32>
    %831 = arith.mulf %826, %830 : vector<1x8xf32>
    %832 = vector.extract_strided_slice %820 {offsets = [0, 8], sizes = [1, 3], strides = [1, 1]} : vector<1x11xf32> to vector<1x3xf32>
    %cst_277 = arith.constant dense<0xFF800000> : vector<1xf32>
    %833 = vector.multi_reduction <maximumf>, %832, %cst_277 [1] : vector<1x3xf32> to vector<1xf32>
    %834 = vector.shape_cast %833 : vector<1xf32> to vector<1x1xf32>
    %835 = vector.broadcast %834 : vector<1x1xf32> to vector<1x3xf32>
    %836 = arith.subf %832, %835 : vector<1x3xf32>
    %837 = math.exp %836 : vector<1x3xf32>
    %cst_278 = arith.constant dense<0.000000e+00> : vector<1xf32>
    %838 = vector.multi_reduction <add>, %837, %cst_278 [1] : vector<1x3xf32> to vector<1xf32>
    %839 = vector.shape_cast %838 : vector<1xf32> to vector<1x1xf32>
    %840 = tpu.reciprocal %839 {approx = true} : vector<1x1xf32> -> vector<1x1xf32>
    %841 = vector.broadcast %840 : vector<1x1xf32> to vector<1x3xf32>
    %842 = arith.mulf %837, %841 : vector<1x3xf32>
    %cst_279 = arith.constant dense<0.000000e+00> : vector<1x32xf32>
    %843 = tpu.matmul %831, %799, %cst_279 {dimension_numbers = #tpu.dot_dimension_numbers<[1], [0], [0], [1], [0, 0, 1, 1], [], []>} : vector<1x8xf32>, vector<8x32xf32>, vector<1x32xf32> -> vector<1x32xf32>
    %cst_280 = arith.constant dense<0.000000e+00> : vector<1x96xf32>
    %844 = tpu.matmul %843, %805, %cst_280 {dimension_numbers = #tpu.dot_dimension_numbers<[1], [0], [0], [1], [0, 0, 1, 1], [], []>} : vector<1x32xf32>, vector<32x96xf32>, vector<1x96xf32> -> vector<1x96xf32>
    %845 = vector.extract_strided_slice %844 {offsets = [0, 0], sizes = [1, 32], strides = [1, 1]} : vector<1x96xf32> to vector<1x32xf32>
    %846 = vector.extract_strided_slice %814 {offsets = [0, 11], sizes = [1, 32], strides = [1, 1]} : vector<1x43xf32> to vector<1x32xf32>
    %847 = arith.addf %845, %846 : vector<1x32xf32>
    %848 = arith.addf %847, %807 : vector<1x32xf32>
    %cst_281 = arith.constant 0.000000e+00 : f32
    %849 = vector.broadcast %cst_281 : f32 to vector<1x32xf32>
    %850 = arith.maximumf %848, %849 : vector<1x32xf32>
    %851 = vector.extract_strided_slice %844 {offsets = [0, 32], sizes = [1, 32], strides = [1, 1]} : vector<1x96xf32> to vector<1x32xf32>
    %852 = vector.extract_strided_slice %812 {offsets = [0, 11], sizes = [1, 32], strides = [1, 1]} : vector<1x83xf32> to vector<1x32xf32>
    %853 = arith.addf %851, %852 : vector<1x32xf32>
    %854 = vector.extract_strided_slice %809 {offsets = [0, 0], sizes = [1, 32], strides = [1, 1]} : vector<1x72xf32> to vector<1x32xf32>
    %855 = arith.addf %853, %854 : vector<1x32xf32>
    %cst_282 = arith.constant 0.000000e+00 : f32
    %856 = vector.broadcast %cst_282 : f32 to vector<1x32xf32>
    %857 = arith.maximumf %855, %856 : vector<1x32xf32>
    %858 = vector.extract_strided_slice %844 {offsets = [0, 64], sizes = [1, 32], strides = [1, 1]} : vector<1x96xf32> to vector<1x32xf32>
    %859 = vector.extract_strided_slice %813 {offsets = [0, 11], sizes = [1, 32], strides = [1, 1]} : vector<1x83xf32> to vector<1x32xf32>
    %860 = arith.addf %858, %859 : vector<1x32xf32>
    %861 = vector.extract_strided_slice %811 {offsets = [0, 0], sizes = [1, 32], strides = [1, 1]} : vector<1x72xf32> to vector<1x32xf32>
    %862 = arith.addf %860, %861 : vector<1x32xf32>
    %cst_283 = arith.constant 0.000000e+00 : f32
    %863 = vector.broadcast %cst_283 : f32 to vector<1x32xf32>
    %864 = arith.maximumf %862, %863 : vector<1x32xf32>
    %865 = vector.extract_strided_slice %812 {offsets = [0, 43], sizes = [1, 40], strides = [1, 1]} : vector<1x83xf32> to vector<1x40xf32>
    %866 = vector.extract_strided_slice %809 {offsets = [0, 32], sizes = [1, 40], strides = [1, 1]} : vector<1x72xf32> to vector<1x40xf32>
    %867 = arith.addf %865, %866 : vector<1x40xf32>
    %868 = vector.extract_strided_slice %813 {offsets = [0, 43], sizes = [1, 40], strides = [1, 1]} : vector<1x83xf32> to vector<1x40xf32>
    %869 = vector.extract_strided_slice %811 {offsets = [0, 32], sizes = [1, 40], strides = [1, 1]} : vector<1x72xf32> to vector<1x40xf32>
    %870 = arith.addf %868, %869 : vector<1x40xf32>
    %871 = vector.extract_strided_slice %867 {offsets = [0, 0], sizes = [1, 8], strides = [1, 1]} : vector<1x40xf32> to vector<1x8xf32>
    %cst_284 = arith.constant dense<0xFF800000> : vector<1xf32>
    %872 = vector.multi_reduction <maximumf>, %871, %cst_284 [1] : vector<1x8xf32> to vector<1xf32>
    %873 = vector.shape_cast %872 : vector<1xf32> to vector<1x1xf32>
    %874 = vector.broadcast %873 : vector<1x1xf32> to vector<1x8xf32>
    %875 = arith.subf %871, %874 : vector<1x8xf32>
    %876 = math.exp %875 : vector<1x8xf32>
    %cst_285 = arith.constant dense<0.000000e+00> : vector<1xf32>
    %877 = vector.multi_reduction <add>, %876, %cst_285 [1] : vector<1x8xf32> to vector<1xf32>
    %878 = vector.shape_cast %877 : vector<1xf32> to vector<1x1xf32>
    %879 = tpu.reciprocal %878 {approx = true} : vector<1x1xf32> -> vector<1x1xf32>
    %880 = vector.broadcast %879 : vector<1x1xf32> to vector<1x8xf32>
    %881 = arith.mulf %876, %880 : vector<1x8xf32>
    %882 = vector.extract_strided_slice %870 {offsets = [0, 0], sizes = [1, 8], strides = [1, 1]} : vector<1x40xf32> to vector<1x8xf32>
    %cst_286 = arith.constant dense<0xFF800000> : vector<1xf32>
    %883 = vector.multi_reduction <maximumf>, %882, %cst_286 [1] : vector<1x8xf32> to vector<1xf32>
    %884 = vector.shape_cast %883 : vector<1xf32> to vector<1x1xf32>
    %885 = vector.broadcast %884 : vector<1x1xf32> to vector<1x8xf32>
    %886 = arith.subf %882, %885 : vector<1x8xf32>
    %887 = math.exp %886 : vector<1x8xf32>
    %cst_287 = arith.constant dense<0.000000e+00> : vector<1xf32>
    %888 = vector.multi_reduction <add>, %887, %cst_287 [1] : vector<1x8xf32> to vector<1xf32>
    %889 = vector.shape_cast %888 : vector<1xf32> to vector<1x1xf32>
    %890 = tpu.reciprocal %889 {approx = true} : vector<1x1xf32> -> vector<1x1xf32>
    %891 = vector.broadcast %890 : vector<1x1xf32> to vector<1x8xf32>
    %892 = arith.mulf %887, %891 : vector<1x8xf32>
    %893 = vector.extract_strided_slice %867 {offsets = [0, 8], sizes = [1, 32], strides = [1, 1]} : vector<1x40xf32> to vector<1x32xf32>
    %cst_288 = arith.constant 0.000000e+00 : f32
    %894 = vector.broadcast %cst_288 : f32 to vector<1x32xf32>
    %895 = arith.maximumf %893, %894 : vector<1x32xf32>
    %896 = vector.extract_strided_slice %870 {offsets = [0, 8], sizes = [1, 32], strides = [1, 1]} : vector<1x40xf32> to vector<1x32xf32>
    %cst_289 = arith.constant 0.000000e+00 : f32
    %897 = vector.broadcast %cst_289 : f32 to vector<1x32xf32>
    %898 = arith.maximumf %896, %897 : vector<1x32xf32>
    %899 = tpu.concatenate %881, %892 in 0 : vector<1x8xf32>, vector<1x8xf32> -> vector<2x8xf32>
    %900 = vector.extract_strided_slice %842 {offsets = [0, 1], sizes = [1, 1], strides = [1, 1]} : vector<1x3xf32> to vector<1x1xf32>
    %901 = vector.broadcast %900 : vector<1x1xf32> to vector<1x32xf32>
    %902 = arith.mulf %901, %895 : vector<1x32xf32>
    %903 = vector.extract_strided_slice %842 {offsets = [0, 2], sizes = [1, 1], strides = [1, 1]} : vector<1x3xf32> to vector<1x1xf32>
    %904 = vector.broadcast %903 : vector<1x1xf32> to vector<1x32xf32>
    %905 = arith.mulf %904, %898 : vector<1x32xf32>
    %906 = tpu.concatenate %902, %905 in 0 : vector<1x32xf32>, vector<1x32xf32> -> vector<2x32xf32>
    %cst_290 = arith.constant dense<0.000000e+00> : vector<8x32xf32>
    %907 = tpu.matmul %899, %906, %cst_290 {dimension_numbers = #tpu.dot_dimension_numbers<[0], [0], [1], [1], [0, 1, 1, 1], [], []>} : vector<2x8xf32>, vector<2x32xf32>, vector<8x32xf32> -> vector<8x32xf32>
    %908 = vector.extract_strided_slice %842 {offsets = [0, 0], sizes = [1, 1], strides = [1, 1]} : vector<1x3xf32> to vector<1x1xf32>
    %909 = vector.broadcast %908 : vector<1x1xf32> to vector<8x32xf32>
    %910 = arith.mulf %909, %799 : vector<8x32xf32>
    %911 = arith.addf %910, %907 : vector<8x32xf32>
    %912 = arith.index_cast %c7_i32 : i32 to index
    %c0_291 = arith.constant 0 : index
    %913 = vector.load %arg13[%912, %c0_291] : memref<8x32xf32, #tpu.memory_space<vmem>>, vector<1x32xf32>
    tpu.vector_store %arg13[%912, %c0_291], %850 {strides = array<i32>} : memref<8x32xf32, #tpu.memory_space<vmem>>, vector<1x32xf32>,
    %c8_i32 = arith.constant 8 : i32
    return
  }
  func.func @transform_0(%arg0: i32) -> (i32, i32) {
    %c0_i32 = arith.constant 0 : i32
    %c0_i32_0 = arith.constant 0 : i32
    %c0_i32_1 = arith.constant 0 : i32
    return %c0_i32, %c0_i32_0 : i32, i32
  }
  func.func @transform_1(%arg0: i32) -> (i32, i32) {
    %c0_i32 = arith.constant 0 : i32
    %c0_i32_0 = arith.constant 0 : i32
    %c0_i32_1 = arith.constant 0 : i32
    return %c0_i32, %c0_i32_0 : i32, i32
  }
  func.func @transform_2(%arg0: i32) -> (i32, i32) {
    %c0_i32 = arith.constant 0 : i32
    %c0_i32_0 = arith.constant 0 : i32
    %c0_i32_1 = arith.constant 0 : i32
    return %c0_i32, %c0_i32_0 : i32, i32
  }
  func.func @transform_3(%arg0: i32) -> (i32, i32) {
    %c0_i32 = arith.constant 0 : i32
    %c0_i32_0 = arith.constant 0 : i32
    %c0_i32_1 = arith.constant 0 : i32
    return %c0_i32, %c0_i32_0 : i32, i32
  }
  func.func @transform_4(%arg0: i32) -> (i32, i32) {
    %c0_i32 = arith.constant 0 : i32
    %c0_i32_0 = arith.constant 0 : i32
    %c0_i32_1 = arith.constant 0 : i32
    return %c0_i32, %c0_i32_0 : i32, i32
  }
  func.func @transform_5(%arg0: i32) -> (i32, i32) {
    %c0_i32 = arith.constant 0 : i32
    %c0_i32_0 = arith.constant 0 : i32
    %c0_i32_1 = arith.constant 0 : i32
    return %c0_i32, %c0_i32_0 : i32, i32
  }
  func.func @transform_6(%arg0: i32) -> (i32, i32) {
    %c0_i32 = arith.constant 0 : i32
    %c0_i32_0 = arith.constant 0 : i32
    %c0_i32_1 = arith.constant 0 : i32
    return %c0_i32, %c0_i32_0 : i32, i32
  }
  func.func @transform_7(%arg0: i32) -> (i32, i32) {
    %c0_i32 = arith.constant 0 : i32
    %c0_i32_0 = arith.constant 0 : i32
    %c0_i32_1 = arith.constant 0 : i32
    return %c0_i32, %c0_i32_0 : i32, i32
  }
  func.func @transform_8(%arg0: i32) -> (i32, i32) {
    %c0_i32 = arith.constant 0 : i32
    %c0_i32_0 = arith.constant 0 : i32
    %c0_i32_1 = arith.constant 0 : i32
    return %c0_i32, %c0_i32_0 : i32, i32
  }
  func.func @transform_9(%arg0: i32) -> (i32, i32) {
    %c0_i32 = arith.constant 0 : i32
    %c0_i32_0 = arith.constant 0 : i32
    %c0_i32_1 = arith.constant 0 : i32
    return %c0_i32, %c0_i32_0 : i32, i32
  }
  func.func @transform_10(%arg0: i32) -> (i32, i32) {
    %c0_i32 = arith.constant 0 : i32
    %c0_i32_0 = arith.constant 0 : i32
    %c0_i32_1 = arith.constant 0 : i32
    return %c0_i32, %c0_i32_0 : i32, i32
  }
  func.func @transform_11(%arg0: i32) -> (i32, i32) {
    %c0_i32 = arith.constant 0 : i32
    %c0_i32_0 = arith.constant 0 : i32
    %c0_i32_1 = arith.constant 0 : i32
    return %c0_i32, %c0_i32_0 : i32, i32
  }
  func.func @transform_12(%arg0: i32) -> (i32, i32) {
    %c0_i32 = arith.constant 0 : i32
    %c0_i32_0 = arith.constant 0 : i32
    %c0_i32_1 = arith.constant 0 : i32
    return %c0_i32, %c0_i32_0 : i32, i32
  }
}

</mosaic_0001>

<bundles_post_ra>
// kernel: tpu_custom_call.1
= control target key start
LH: loop header
LB: loop body
LE: loop exit
PB: predicated region body
PF: predicated region fallthrough
CT: control target
= control target key end

     0   :  { %17 = vsyncpa [#allocation5], 0  ;;  %s7375_s0 = inlined_call_operand.hbm [shape: f32[8,32], index: 0, kind: input, shape index: {}]   ;;  %s7376_s1 = inlined_call_operand.hbm [shape: f32[8,32], index: 1, kind: input, shape index: {}]   ;;  %s7377_s2 = inlined_call_operand.hbm [shape: f32[32,72], index: 2, kind: input, shape index: {}]   ;;  %s7378_s3 = inlined_call_operand.vmem [shape: f32[1,72], index: 3, kind: input, shape index: {}]   ;;  %s7379_s4 = inlined_call_operand.hbm [shape: f32[32,72], index: 4, kind: input, shape index: {}]   ;;  %s7380_s5 = inlined_call_operand.vmem [shape: f32[1,72], index: 5, kind: input, shape index: {}]   ;;  %s7381_s6 = inlined_call_operand.hbm [shape: f32[32,83], index: 6, kind: input, shape index: {}]   ;;  %s7382_s7 = inlined_call_operand.hbm [shape: f32[32,83], index: 7, kind: input, shape index: {}]   ;;  %s7383_s8 = inlined_call_operand.hbm [shape: f32[32,43], index: 8, kind: input, shape index: {}]   ;;  %s7384_s9 = inlined_call_operand.hbm [shape: f32[32,96], index: 9, kind: input, shape index: {}]   ;;  %s7385_s10 = inlined_call_operand.vmem [shape: f32[1,11], index: 10, kind: input, shape index: {}]   ;;  %s7386_s11 = inlined_call_operand.vmem [shape: f32[1,32], index: 11, kind: input, shape index: {}]   ;;  %s7387_s12 = inlined_call_operand.hbm [shape: f32[8,32], index: 12, kind: output, shape index: {}]  }
   0x1   :  { %18 = vsyncpa [#allocation8], 0 }
   0x2   :  { %19 = vsyncpa [#allocation11], 0 }
   0x3   :  { %20 = vsyncpa [#allocation14], 0 }
   0x4   :  { %21 = vsyncpa [#allocation17], 0 }
   0x5   :  { %22 = vsyncpa [#allocation6], 0  ;;  %s6201_s21 = smov [#allocation7]  }
   0x6   :  { %s39_s22 = sshll.u32 %s6201_s21, 4  ;;  %s40_s22 = int_to_ptr.vmem [resolvable:$true] %s39_s22 }
   0x7   :  { %s6017_s23 = scalar_lea.vmem %s40_s22, 128  ;;  %p6022_p1 = scmp.lt.s32.totalorder %s40_s22, %s40_s22 }
   0x8   :  { %p6018_p0 = scmp.ne.s32.totalorder %s40_s22, %s6017_s23  ;;  %p6023_p2 = scmp.lt.s32.totalorder %s6017_s23, %s6017_s23 }
   0xa   :  { %p6024_p3 = por %p6023_p2, %p6022_p1 }
   0xc   :  { %p6025_p4 = pnand %p6024_p3, %p6018_p0 }
   0xe   :  { %6028 = shalt.err (!%p6025_p4)
}
   0xf   :  { %42 = dma.hbm_to_vmem [thread:$0]  %s7376_s1, 128, %s40_s22, [#allocation8]  }
  0x10   :  { %s6202_s26 = smov [#allocation10]   ;;  %s6203_s28 = smov [#allocation13]  }
  0x11   :  { %s62_s27 = sshll.u32 %s6202_s26, 4  ;;  %s88_s29 = sshll.u32 %s6203_s28, 4  ;;  %s63_s27 = int_to_ptr.vmem [resolvable:$true] %s62_s27  ;;  %s89_s29 = int_to_ptr.vmem [resolvable:$true] %s88_s29 }
  0x12   :  { %s6037_s30 = scalar_lea.vmem %s63_s27, 512  ;;  %p6042_p6 = scmp.lt.s32.totalorder %s63_s27, %s63_s27 }
  0x13   :  { %p6038_p5 = scmp.ne.s32.totalorder %s63_s27, %s6037_s30  ;;  %p6043_p7 = scmp.lt.s32.totalorder %s6037_s30, %s6037_s30 }
  0x15   :  { %p6044_p8 = por %p6043_p7, %p6042_p6 }
  0x17   :  { %p6045_p9 = pnand %p6044_p8, %p6038_p5 }
  0x19   :  { %6048 = shalt.err (!%p6045_p9)
}
  0x1a   :  { %s6204_s13 = smov 128   ;;  %s6205_s14 = smov 8  }
  0x1b   :  { %68 = dma.hbm_to_vmem [thread:$0]  %s7379_s4, 512, %s63_s27, [#allocation11], %s6204_s13, %s6204_s13, %s6205_s14  }
  0x1c   :  { %s6057_s1 = scalar_lea.vmem %s89_s29, 512  ;;  %p6062_p11 = scmp.lt.s32.totalorder %s89_s29, %s89_s29 }
  0x1d   :  { %p6058_p10 = scmp.ne.s32.totalorder %s89_s29, %s6057_s1  ;;  %p6063_p12 = scmp.lt.s32.totalorder %s6057_s1, %s6057_s1 }
  0x1f   :  { %p6064_p13 = por %p6063_p12, %p6062_p11 }
  0x21   :  { %p6065_p0 = pnand %p6064_p13, %p6058_p10 }
  0x23   :  { %6068 = shalt.err (!%p6065_p0)
}
  0x24   :  { %94 = dma.hbm_to_vmem [thread:$0]  %s7382_s7, 512, %s89_s29, [#allocation14], %s6204_s13, %s6204_s13, %s6205_s14  }
  0x25   :  { %s6206_s19 = smov [#allocation4]   ;;  %s6207_s21 = smov [#allocation9]  }
  0x26   :  { %s29_s20 = sshll.u32 %s6206_s19, 4  ;;  %s48_s4 = sshll.u32 %s6207_s21, 4  ;;  %s30_s20 = int_to_ptr.vmem [resolvable:$true] %s29_s20  ;;  %s49_s4 = int_to_ptr.vmem [resolvable:$true] %s48_s4 }
  0x27   :  { %s6077_s22 = scalar_lea.vmem %s30_s20, 128  ;;  %p6082_p2 = scmp.lt.s32.totalorder %s30_s20, %s30_s20 }
  0x28   :  { %p6078_p1 = scmp.ne.s32.totalorder %s30_s20, %s6077_s22  ;;  %p6083_p3 = scmp.lt.s32.totalorder %s6077_s22, %s6077_s22 }
  0x2a   :  { %p6084_p4 = por %p6083_p3, %p6082_p2 }
  0x2c   :  { %p6085_p5 = pnand %p6084_p4, %p6078_p1 }
  0x2e   :  { %6088 = shalt.err (!%p6085_p5)
}
  0x2f   :  { %32 = dma.hbm_to_vmem [thread:$0]  %s7375_s0, 128, %s30_s20, [#allocation5]  }
  0x30   :  { %s6097_s25 = scalar_lea.vmem %s49_s4, 512  ;;  %p6102_p7 = scmp.lt.s32.totalorder %s49_s4, %s49_s4 }
  0x31   :  { %p6098_p6 = scmp.ne.s32.totalorder %s49_s4, %s6097_s25  ;;  %p6103_p8 = scmp.lt.s32.totalorder %s6097_s25, %s6097_s25 }
  0x33   :  { %p6104_p9 = por %p6103_p8, %p6102_p7 }
  0x35   :  { %p6105_p10 = pnand %p6104_p9, %p6098_p6 }
  0x37   :  { %6108 = shalt.err (!%p6105_p10)
}
  0x38   :  { %54 = dma.hbm_to_vmem [thread:$0]  %s7377_s2, 512, %s49_s4, [#allocation8], %s6204_s13, %s6204_s13, %s6205_s14  }
  0x39   :  { %s6208_s27 = smov [#allocation12]   ;;  %s6209_s29 = smov [#allocation15]  }
  0x3a   :  { %s76_s28 = sshll.u32 %s6208_s27, 4  ;;  %s100_s0 = sshll.u32 %s6209_s29, 4  ;;  %s77_s28 = int_to_ptr.vmem [resolvable:$true] %s76_s28  ;;  %s101_s0 = int_to_ptr.vmem [resolvable:$true] %s100_s0 }
  0x3b   :  { %s6117_s30 = scalar_lea.vmem %s77_s28, 512  ;;  %p6122_p12 = scmp.lt.s32.totalorder %s77_s28, %s77_s28 }
  0x3c   :  { %p6118_p11 = scmp.ne.s32.totalorder %s77_s28, %s6117_s30  ;;  %p6123_p13 = scmp.lt.s32.totalorder %s6117_s30, %s6117_s30 }
  0x3e   :  { %p6124_p0 = por %p6123_p13, %p6122_p12 }
  0x40   :  { %p6125_p1 = pnand %p6124_p0, %p6118_p11 }
  0x42   :  { %6128 = shalt.err (!%p6125_p1)
}
  0x43   :  { %82 = dma.hbm_to_vmem [thread:$0]  %s7381_s6, 512, %s77_s28, [#allocation11], %s6204_s13, %s6204_s13, %s6205_s14  }
  0x44   :  { %s6137_s2 = scalar_lea.vmem %s101_s0, 512  ;;  %p6142_p3 = scmp.lt.s32.totalorder %s101_s0, %s101_s0 }
  0x45   :  { %p6138_p2 = scmp.ne.s32.totalorder %s101_s0, %s6137_s2  ;;  %p6143_p4 = scmp.lt.s32.totalorder %s6137_s2, %s6137_s2 }
  0x47   :  { %p6144_p5 = por %p6143_p4, %p6142_p3 }
  0x49   :  { %p6145_p6 = pnand %p6144_p5, %p6138_p2 }
  0x4b   :  { %6148 = shalt.err (!%p6145_p6)
}
  0x4c   :  { %106 = dma.hbm_to_vmem [thread:$0]  %s7383_s8, 512, %s101_s0, [#allocation14], %s6204_s13, %s6204_s13, %s6205_s14  }
  0x4d   :  { %s6210_s18 = smov [#allocation16]  }
  0x4e   :  { %s112_s19 = sshll.u32 %s6210_s18, 4  ;;  %s113_s19 = int_to_ptr.vmem [resolvable:$true] %s112_s19 }
  0x4f   :  { %s6157_s20 = scalar_lea.vmem %s113_s19, 512  ;;  %p6162_p8 = scmp.lt.s32.totalorder %s113_s19, %s113_s19 }
  0x50   :  { %p6158_p7 = scmp.ne.s32.totalorder %s113_s19, %s6157_s20  ;;  %p6163_p9 = scmp.lt.s32.totalorder %s6157_s20, %s6157_s20 }
  0x52   :  { %p6164_p10 = por %p6163_p9, %p6162_p8 }
  0x54   :  { %p6165_p11 = pnand %p6164_p10, %p6158_p7 }
  0x56   :  { %6168 = shalt.err (!%p6165_p11)
}
  0x57   :  { %118 = dma.hbm_to_vmem [thread:$0]  %s7384_s9, 512, %s113_s19, [#allocation17], %s6204_s13, %s6204_s13, %s6205_s14  }
  0x58   :  { %6189 = dma.done.wait [#allocation5], 128  }
  0x59   :  { %6190 = vsyncadd [#allocation5], 4294967168 }
  0x5a   :  { %6191 = dma.done.wait [#allocation8], 640  }
  0x5b   :  { %6192 = vsyncadd [#allocation8], 4294966656 }
  0x5c   :  { %6193 = dma.done.wait [#allocation11], 1024  }
  0x5d   :  { %6194 = vsyncadd [#allocation11], 4294966272 }
  0x5e   :  { %6195 = dma.done.wait [#allocation14], 1024  }
  0x5f   :  { %6196 = vsyncadd [#allocation14], 4294966272 }
  0x60   :  { %6197 = dma.done.wait [#allocation17], 512  }
  0x61   :  { %6198 = vsyncadd [#allocation17], 4294966784  ;;  %v6211_v0 = vmov 0.0   ;;  %vm6212_vm0 = vmmov 0   ;;  %v151_v1 = vld [vmem:[#allocation9 + $0x18] sm:$0xff]  ;;  %v150_v3 = vld [vmem:[#allocation9 + $0x10] sm:$0xff] }
  0x62   :  { %5399 = vmatprep.subr.mxu0 %v6211_v0  ;;  %5410 = vmatprep.subr.mxu1 %v6211_v0  ;;  %v239_v2 = vld [vmem:[#allocation10 + $0x18] sm:$0xff]  ;;  %v238_v4 = vld [vmem:[#allocation10 + $0x10] sm:$0xff]  ;;  %v149_v5 = vld [vmem:[#allocation9 + $0x8] sm:$0xff]  ;;  %vm159_vm1 = vcmask 261120   ;;  %vm233_vm2 = vcmask 588800   ;;  %vm557_vm3 = vcmask 57344  }
  0x63   :  { %5407 = vmatprep.mubr.msk.f32.mxu0 %vm6212_vm0, %v6211_v0  ;;  %5418 = vmatprep.mubr.msk.f32.mxu1 %vm6212_vm0, %v6211_v0  ;;  %v237_v6 = vld [vmem:[#allocation10 + $0x8] sm:$0xff]  ;;  %v148_v7 = vld [vmem:[#allocation9] sm:$0xff]  ;;  %v147_v9 = vld [vmem:[#allocation4] sm:$0xff]  ;;  %vm770_vm4 = vcmask 409944   ;;  %vm569_vm5 = vcmask 81984   ;;  %vm586_vm6 = vcmask 64512  }
  0x64   :  { %5400 = vmatpush3.msra.mxu0 %v151_v1  ;;  %5411 = vmatpush3.msra.mxu1 %v239_v2  ;;  %v236_v8 = vld [vmem:[#allocation10] sm:$0xff]  ;;  %v235_v10 = vld [vmem:[#allocation7] sm:$0xff]  ;;  %v6353_v13 = vld [vmem:[#allocation12 + $0x10] sm:$0xff]  ;;  %s6214_s22 = smov 120   ;;  %s6215_s23 = smov 85   ;;  %vm580_vm7 = vcmask 16384  }
  0x65   :  { %5401 = vmatprep.subr.mxu0 %v6211_v0  ;;  %5412 = vmatprep.subr.mxu1 %v6211_v0  ;;  %v6345_v11 = vld [vmem:[#allocation12 + $0x18] sm:$0xff]  ;;  %v6355_v14 = vld [vmem:[#allocation13 + $0x10] sm:$0xff]  ;;  %v6361_v15 = vld [vmem:[#allocation12 + $0x8] sm:$0xff]  ;;  %s6217_s24 = smov 32   ;;  %s6219_s25 = smov 21   ;;  %vm806_vm8 = vcmask 1040384  }
  0x66   :  { %5402 = vmatpush3.msra.mxu0 %v150_v3  ;;  %5413 = vmatpush3.msra.mxu1 %v238_v4  ;;  %v6347_v12 = vld [vmem:[#allocation13 + $0x18] sm:$0xff]  ;;  %v6363_v16 = vld [vmem:[#allocation13 + $0x8] sm:$0xff]  ;;  %v6369_v17 = vld [vmem:[#allocation12] sm:$0xff]  ;;  %s6220_s7 = smov 53   ;;  %s6221_s26 = smov 64   ;;  %vm946_vm9 = vcmask 253952  }
  0x67   :  { %5403 = vmatprep.subr.mxu0 %v6211_v0  ;;  %5414 = vmatprep.subr.mxu1 %v6211_v0  ;;  %v6373_v18 = vld [vmem:[#allocation13] sm:$0xff]  ;;  %v6380_v19 = vld [vmem:[#allocation15 + $0x18] sm:$0xff]  ;;  %v6387_v20 = vld [vmem:[#allocation15 + $0x10] sm:$0xff]  ;;  %s6222_s27 = smov 117   ;;  %s6223_s28 = smov 77   ;;  %vm866_vm10 = vcmask 1041408  }
  0x68   :  { %5404 = vmatpush3.msra.mxu0 %v149_v5  ;;  %5415 = vmatpush3.msra.mxu1 %v237_v6  ;;  %v6392_v21 = vld [vmem:[#allocation15 + $0x8] sm:$0xff]  ;;  %v6399_v22 = vld [vmem:[#allocation15] sm:$0xff]  ;;  %s6224_s29 = smov 96   ;;  %vm862_vm11 = vcmask 15360  }
  0x69   :  { %5405 = vmatprep.subr.mxu0 %v6211_v0  ;;  %5416 = vmatprep.subr.mxu1 %v6211_v0  ;;  %v5144_v23 = vld [vmem:[%s7378_s3] ss:$0 sm:$0xff]  ;;  %s6213_s3 = smov 11  }
  0x6a   :  { %5406 = vmatpush3.msra.mxu0 %v148_v7  ;;  %5417 = vmatpush3.msra.mxu1 %v236_v8  ;;  %v5146_v24 = vld [vmem:[%s7380_s5] ss:$0 sm:$0xff]  ;;  %v6459_v8 = vld [vmem:[#allocation16 + $0x18] sm:$0xff] }
  0x6b   :  { %5408 = vmatmul.mubr.msk.f32.vlgmr.msra.gmra.mxu0 %vm159_vm1, %v147_v9  ;;  %5419 = vmatmul.mubr.msk.f32.vlgmr.msra.gmra.mxu1 %vm159_vm1, %v235_v10  ;;  %v337_v38 = vld [vmem:[%s7385_s10] sm:$0x1]  ;;  %v6461_v9 = vld [vmem:[#allocation16 + $0x10] sm:$0xff]  ;;  %v6465_v10 = vld [vmem:[#allocation16 + $0x8] sm:$0xff] }
  0x6c   :  { %5421 = vmatprep.subr.mxu0 %v6211_v0  ;;  %5432 = vmatprep.subr.mxu1 %v6211_v0 }
  0x6d   :  { %5422 = vmatpush3.msra.mxu0 %v6345_v11  ;;  %5433 = vmatpush3.msra.mxu1 %v6347_v12 }
  0x6e   :  { %5423 = vmatprep.subr.mxu0 %v6211_v0  ;;  %5434 = vmatprep.subr.mxu1 %v6211_v0 }
  0x6f   :  { %5424 = vmatpush3.msra.mxu0 %v6353_v13  ;;  %5435 = vmatpush3.msra.mxu1 %v6355_v14 }
  0x70   :  { %5425 = vmatprep.subr.mxu0 %v6211_v0  ;;  %5436 = vmatprep.subr.mxu1 %v6211_v0 }
  0x71   :  { %5426 = vmatpush3.msra.mxu0 %v6361_v15  ;;  %5437 = vmatpush3.msra.mxu1 %v6363_v16 }
  0x72   :  { %5427 = vmatprep.subr.mxu0 %v6211_v0  ;;  %5429 = vmatprep.mubr.msk.f32.mxu0 %vm6212_vm0, %v6211_v0 }
  0x73   :  { %5428 = vmatpush3.msra.mxu0 %v6369_v17  ;;  %5438 = vmatprep.subr.mxu1 %v6211_v0 }
  0x74   :  { %5430 = vmatmul.mubr.f32.vlgmr.msra.gmra.mxu0 %v6211_v0  ;;  %5439 = vmatpush3.msra.mxu1 %v6373_v18 }
  0x75   :  { %5440 = vmatprep.mubr.msk.f32.mxu1 %vm6212_vm0, %v6211_v0  ;;  %5443 = vmatprep.subr.mxu0 %v6211_v0 }
  0x76   :  { %5441 = vmatmul.mubr.f32.vlgmr.msra.gmra.mxu1 %v6211_v0  ;;  %5444 = vmatpush3.msra.mxu0 %v6380_v19 }
  0x77   :  { %5445 = vmatprep.subr.mxu0 %v6211_v0  ;;  %5451 = vmatprep.mubr.msk.f32.mxu0 %vm6212_vm0, %v6211_v0 }
  0x78   :  { %5446 = vmatpush3.msra.mxu0 %v6387_v20  ;;  %5454 = vmatprep.subr.mxu1 %v6211_v0 }
  0x79   :  { %5447 = vmatprep.subr.mxu0 %v6211_v0  ;;  %5455 = vmatpush3.msra.mxu1 %v6211_v0 }
  0x7a   :  { %5448 = vmatpush3.msra.mxu0 %v6392_v21  ;;  %5456 = vmatprep.mubr.msk.f32.mxu1 %vm6212_vm0, %v6211_v0 }
  0x7b   :  { %5449 = vmatprep.subr.mxu0 %v6211_v0  ;;  %5459 = vmatprep.subr.mxu1 %v6211_v0 }
  0x7c   :  { %5450 = vmatpush3.msra.mxu0 %v6399_v22 }
  0x7d   :  { %5452 = vmatmul.mubr.f32.vlgmr.msra.gmra.mxu0 %v6211_v0  ;;  %5470 = vmatprep.subr.mxu0 %v6211_v0 }
  0x7e   :  { %5472 = vmatprep.mubr.msk.f32.mxu0 %vm6212_vm0, %v6211_v0 }
 0x12b   :  { %v229_v25 = vpop.f32.mrf.mxu0  ;;  %v316_v26 = vpop.f32.mrf.mxu1 }
 0x12c   :  { %v230_v27 = vadd.f32 %v5144_v23, %v229_v25  ;;  %v317_v28 = vadd.f32 %v5146_v24, %v316_v26  ;;  %v6471_v23 = vld [vmem:[#allocation16] sm:$0xff] }
 0x12d   :  { %v5409_v29 = vpop.f32.mrf.mxu0  ;;  %v5420_v30 = vpop.f32.mrf.mxu1 }
 0x12e   :  { %234 = vst.msk [vmem:[#allocation2] sm:$0xff] %vm233_vm2, %v230_v27  ;;  %320 = vst.msk [vmem:[#allocation3] sm:$0xff] %vm233_vm2, %v317_v28  ;;  %v6216_v30 = vmov 10  }
 0x12f   :  { %5887 = vset.pattern.permute.xlu1 %v6216_v30  ;;  %5889 = vset.pattern.permute.xlu0 %v6216_v30 }
 0x134   :  { %v6418_v31 = vpop.f32.mrf.mxu0 }
 0x135   :  { %v6420_v32 = vld [vmem:[#allocation3] sm:$0x1]  ;;  %v6426_v36 = vld [vmem:[#allocation2] sm:$0x1] }
 0x136   :  { %v6422_v33 = vpop.f32.mrf.mxu1  ;;  %v5431_v34 = vpop.f32.mrf.mxu0  ;;  %766 = vrot.lane.b32.xlu1 %v6420_v32, %s6213_s3 }
 0x137   :  { %v554_v37 = vadd.f32 %v6422_v33, %v6418_v31 }
 0x138   :  { %v5442_v35 = vpop.f32.mrf.mxu1 }
 0x13a   :  { %762 = vrot.lane.b32.xlu1 %v6426_v36, %s6213_s3 }
 0x13d   :  { %v6435_v39 = vpop.f32.mrf.mxu0 }
 0x13e   :  { %v555_v40 = vadd.f32 %v554_v37, %v6435_v39 }
 0x13f   :  { %v5453_v41 = vpop.f32.mrf.mxu0 }
 0x140   :  { %v556_v42 = vadd.f32 %v555_v40, %v337_v38 }
 0x142   :  { %v558_v43 = vsel %vm557_vm3, %v556_v42, -inf  ;;  %v570_v54 = vsel %vm569_vm5, %v556_v42, -inf }
 0x143   :  { %559 = vmax.xlane.f32.xlu0 %v558_v43 }
 0x1a8   :  { %v767_v44 = vpop.permute.xlu1 %766 }
 0x1a9   :  { %v6440_v45 = vadd.f32 %v767_v44, %v6422_v33 }
 0x1ab   :  { %v786_v46 = vsel %vm770_vm4, %v6440_v45, -inf }
 0x1ac   :  { %787 = vmax.xlane.f32.xlu1 %v786_v46  ;;  %v763_v52 = vpop.permute.xlu1 %762 }
 0x1ad   :  { %v6446_v53 = vadd.f32 %v763_v52, %v6418_v31 }
 0x1af   :  { %v771_v55 = vsel %vm770_vm4, %v6446_v53, -inf }
 0x1cc   :  { %v560_v47 = vpop.xlane.xlu0 %559 }
 0x1cd   :  { %v561_v48 = vsub.f32 %v556_v42, %v560_v47 }
 0x1cf   :  { %v562_v49 = vmul.f32 1.442695, %v561_v48 }
 0x1d1   :  { %5893 = vpow2.f32 %v562_v49 }
 0x1de   :  { %v5894_v50 = vpop.eup %5893 }
 0x1df   :  { %v564_v51 = vsel %vm557_vm3, %v5894_v50, 0.0 }
 0x1e0   :  { %565 = vadd.xlane.f32.xlu0 %v564_v51 }
 0x1e4   :  { %571 = vmax.xlane.f32.xlu0 %v570_v54  ;;  %v801_v54 = vmax.f32 %v6446_v53, 0.0 }
 0x1e8   :  { %772 = vmax.xlane.f32.xlu0 %v771_v55 }
 0x235   :  { %v788_v57 = vpop.xlane.xlu1 %787 }
 0x236   :  { %v789_v59 = vsub.f32 %v6440_v45, %v788_v57 }
 0x238   :  { %v790_v63 = vmul.f32 1.442695, %v789_v59 }
 0x269   :  { %v566_v56 = vpop.xlane.xlu0 %565 }
 0x26a   :  { %5895 = vrcp.f32 %v566_v56 }
 0x26d   :  { %v572_v58 = vpop.xlane.xlu0 %571 }
 0x26e   :  { %v573_v60 = vsub.f32 %v556_v42, %v572_v58  ;;  %v6218_v42 = vmov 9  }
 0x270   :  { %v574_v61 = vmul.f32 1.442695, %v573_v60 }
 0x271   :  { %v773_v62 = vpop.xlane.xlu0 %772 }
 0x272   :  { %5897 = vpow2.f32 %v574_v61  ;;  %v774_v1 = vsub.f32 %v6446_v53, %v773_v62 }
 0x273   :  { %5899 = vpow2.f32 %v790_v63 }
 0x274   :  { %v775_v2 = vmul.f32 1.442695, %v774_v1 }
 0x276   :  { %5901 = vpow2.f32 %v775_v2 }
 0x277   :  { %v5896_v3 = vpop.eup %5895 }
 0x278   :  { %v568_v4 = vmul.f32 %v5896_v3, %v5894_v50  ;;  %v338_v3 = vld [vmem:[%s7386_s11] sm:$0x1] }
 0x27a   :  { %5457 = vmatmul.mubr.msk.f32.vlgmr.msra.gmra.mxu1 %vm586_vm6, %v568_v4 }
 0x27b   :  { %5467 = vmatprep.mubr.msk.f32.mxu1 %vm6212_vm0, %v6211_v0  ;;  %5460 = vmatpush3.msra.mxu1 %v6459_v8 }
 0x27c   :  { %5461 = vmatprep.subr.mxu1 %v6211_v0 }
 0x27d   :  { %5462 = vmatpush3.msra.mxu1 %v6461_v9 }
 0x27e   :  { %5463 = vmatprep.subr.mxu1 %v6211_v0 }
 0x27f   :  { %v5898_v5 = vpop.eup %5897  ;;  %5464 = vmatpush3.msra.mxu1 %v6465_v10 }
 0x280   :  { %577 = vrot.lane.b32.xlu0 %v5898_v5, %s6214_s22  ;;  %v5900_v6 = vpop.eup %5899  ;;  %5465 = vmatprep.subr.mxu1 %v6211_v0 }
 0x281   :  { %5466 = vmatpush3.msra.mxu1 %v6471_v23 }
 0x282   :  { %5486 = vmatprep.subr.mxu1 %v6211_v0 }
 0x283   :  { %v5902_v7 = vpop.eup %5901 }
 0x284   :  { %793 = vrot.lane.b32.xlu0 %v5900_v6, %s6215_s23 }
 0x288   :  { %778 = vrot.lane.b32.xlu0 %v5902_v7, %s6215_s23 }
 0x2f2   :  { %v578_v24 = vpop.permute.xlu0 %577 }
 0x2f3   :  { %v581_v25 = vsel %vm580_vm7, %v578_v24, 0.0 }
 0x2f4   :  { %582 = vadd.xlane.f32.xlu1 %v581_v25 }
 0x2f6   :  { %v794_v26 = vpop.permute.xlu0 %793 }
 0x2f7   :  { %v796_v27 = vsel %vm557_vm3, %v794_v26, 0.0 }
 0x2f8   :  { %797 = vadd.xlane.f32.xlu0 %v796_v27 }
 0x2fa   :  { %v779_v28 = vpop.permute.xlu0 %778 }
 0x2fb   :  { %v781_v29 = vsel %vm557_vm3, %v779_v28, 0.0 }
 0x2fc   :  { %782 = vadd.xlane.f32.xlu1 %v781_v29 }
 0x30e   :  { %746 = vrot.lane.b32.xlu0 %v6426_v36, %s6217_s24 }
 0x33a   :  { %v656_v34 = vpop.f32.mrf.mxu1 }
 0x33b   :  { %5468 = vmatmul.mubr.msk.f32.vlgmr.msra.gmra.mxu1 %vm159_vm1, %v656_v34 }
 0x33c   :  { %v5458_v35 = vpop.f32.mrf.mxu1  ;;  %5487 = vmatpush3.msra.mxu1 %v6347_v12  ;;  %5494 = vmatprep.mubr.msk.f32.mxu1 %vm6212_vm0, %v6211_v0 }
 0x33d   :  { %5488 = vmatprep.subr.mxu1 %v6211_v0 }
 0x33e   :  { %5489 = vmatpush3.msra.mxu1 %v6355_v14 }
 0x33f   :  { %5490 = vmatprep.subr.mxu1 %v6211_v0 }
 0x340   :  { %5491 = vmatpush3.msra.mxu1 %v6363_v16 }
 0x341   :  { %5492 = vmatprep.subr.mxu1 %v6211_v0 }
 0x342   :  { %5493 = vmatpush3.msra.mxu1 %v6373_v18 }
 0x343   :  { %5508 = vmatprep.subr.mxu1 %v6211_v0 }
 0x37d   :  { %v583_v36 = vpop.xlane.xlu1 %582 }
 0x37e   :  { %5903 = vrcp.f32 %v583_v36 }
 0x381   :  { %v798_v37 = vpop.xlane.xlu0 %797 }
 0x382   :  { %5905 = vrcp.f32 %v798_v37 }
 0x385   :  { %v783_v40 = vpop.xlane.xlu1 %782  ;;  %v747_v60 = vpop.permute.xlu0 %746 }
 0x386   :  { %5907 = vrcp.f32 %v783_v40  ;;  %v964_v40 = vld [vmem:[%s7385_s10] sm:$0x1] }
 0x38b   :  { %v5904_v38 = vpop.eup %5903 }
 0x38c   :  { %v6493_v41 = vmul.f32 %v5904_v38, %v5898_v5 }
 0x38e   :  { %815 = vperm.xlu1 %5887, %v6493_v41  }
 0x38f   :  { %v5906_v43 = vpop.eup %5905 }
 0x390   :  { %v800_v46 = vmul.f32 %v5906_v43, %v5900_v6 }
 0x392   :  { %5888 = vset.pattern.permute.xlu1 %v6218_v42  ;;  %v804_v48 = vrot.slane %v800_v46, 7 }
 0x393   :  { %810 = vperm.xlu1 %5888, %v6493_v41   ;;  %v5908_v44 = vpop.eup %5907 }
 0x394   :  { %v785_v47 = vmul.f32 %v5908_v44, %v5902_v7 }
 0x396   :  { %v807_v49 = vsel %vm806_vm8, %v785_v47, %v804_v48 }
 0x397   :  { %741 = vrot.lane.b32.xlu1 %v6418_v31, %s6219_s25 }
 0x39b   :  { %752 = vrot.lane.b32.xlu1 %v6422_v33, %s6220_s7  ;;  %v802_v33 = vmax.f32 %v6440_v45, 0.0 }
 0x39f   :  { %757 = vrot.lane.b32.xlu1 %v6420_v32, %s6221_s26 }
 0x3a3   :  { %824 = vrot.lane.b32.xlu1 %v807_v49, %s6215_s23  ;;  %v6563_v49 = vld [vmem:[#allocation3 + $0x1] sm:$0x1] }
 0x3a7   :  { %734 = vrot.lane.b32.xlu1 %v6435_v39, %s6222_s27 }
 0x3fb   :  { %v729_v31 = vpop.f32.mrf.mxu1 }
 0x3fd   :  { %v5469_v50 = vpop.f32.mrf.mxu1 }
 0x409   :  { %v816_v51 = vpop.permute.xlu1 %815 }
 0x40a   :  { %v818_v52 = vmul.f32 %v816_v51, %v802_v33 }
 0x40c   :  { %v820_v32 = vrot.slane %v818_v52, 7 }
 0x40e   :  { %v811_v55 = vpop.permute.xlu1 %810 }
 0x40f   :  { %v813_v56 = vmul.f32 %v811_v55, %v801_v54 }
 0x411   :  { %v822_v57 = vsel %vm806_vm8, %v813_v56, %v820_v32 }
 0x412   :  { %v742_v58 = vpop.permute.xlu1 %741  ;;  %860 = vrot.lane.b32.xlu1 %v822_v57, %s6223_s28 }
 0x413   :  { %v744_v59 = vadd.f32 %v742_v58, %v729_v31 }
 0x415   :  { %v749_v39 = vadd.f32 %v747_v60, %v744_v59 }
 0x416   :  { %v753_v61 = vpop.permute.xlu1 %752 }
 0x417   :  { %v750_v62 = vmax.f32 %v749_v39, 0.0  ;;  %v755_v63 = vadd.f32 %v753_v61, %v729_v31 }
 0x419   :  { %969 = vrot.lane.b32.xlu1 %v750_v62, %s6224_s29 }
 0x41a   :  { %v758_v45 = vpop.permute.xlu1 %757 }
 0x41b   :  { %v760_v53 = vadd.f32 %v758_v45, %v755_v63 }
 0x41d   :  { %v761_v1 = vmax.f32 %v760_v53, 0.0 }
 0x41e   :  { %v825_v2 = vpop.permute.xlu1 %824 }
 0x41f   :  { %1044 = vrot.lane.b32.xlu0 %v761_v1, %s6221_s26 }
 0x422   :  { %v735_v4 = vpop.permute.xlu1 %734 }
 0x423   :  { %v737_v5 = vadd.f32 %v735_v4, %v729_v31  ;;  %v6567_v31 = vld [vmem:[#allocation2 + $0x1] sm:$0x1] }
 0x425   :  { %v738_v6 = vadd.f32 %v737_v5, %v338_v3 }
 0x427   :  { %v739_v7 = vmax.f32 %v738_v6, 0.0 }
 0x429   :  { %947 = vst.msk [vmem:[#allocation18] sm:$0x1] %vm946_vm9, %v739_v7 }
 0x442   :  { %827 = vxpose.xlu1.b32.start.end [1/1] (short) (narrow) %v825_v2, 8 }
 0x484   :  { %v861_v24 = vpop.permute.xlu1 %860 }
 0x485   :  { %5471 = vmatpush3.msk.msra.mxu0 %vm866_vm10, %v861_v24 }
 0x486   :  { %5475 = vmatprep.subr.mxu0 %v6211_v0 }
 0x48b   :  { %v970_v26 = vpop.permute.xlu1 %969 }
 0x491   :  { %v1045_v25 = vpop.permute.xlu0 %1044 }
 0x492   :  { %5495 = vmatmul.mubr.msk.f32.vlgmr.msra.gmra.mxu1 %vm159_vm1, %v1045_v25 }
 0x493   :  { %5510 = vmatprep.mubr.msk.f32.mxu1 %vm6212_vm0, %v6211_v0 }
 0x4be   :  { %v843_v27 = vpop.trf.xlu1 }
 0x4bf   :  { %5473 = vmatmul.mubr.msk.f32.vlgmr.msra.gmra.mxu0 %vm862_vm11, %v843_v27 }
 0x4c0   :  { %5476 = vmatpush3.msra.mxu0 %v6345_v11  ;;  %5483 = vmatprep.mubr.msk.f32.mxu0 %vm6212_vm0, %v6211_v0 }
 0x4c1   :  { %5477 = vmatprep.subr.mxu0 %v6211_v0 }
 0x4c2   :  { %5478 = vmatpush3.msra.mxu0 %v6353_v13 }
 0x4c3   :  { %5479 = vmatprep.subr.mxu0 %v6211_v0 }
 0x4c4   :  { %5480 = vmatpush3.msra.mxu0 %v6361_v15 }
 0x4c5   :  { %5481 = vmatprep.subr.mxu0 %v6211_v0 }
 0x4c6   :  { %5482 = vmatpush3.msra.mxu0 %v6369_v17 }
 0x4c7   :  { %5484 = vmatmul.mubr.msk.f32.vlgmr.msra.gmra.mxu0 %vm159_vm1, %v970_v26  ;;  %5497 = vmatprep.subr.mxu0 %v6211_v0 }
 0x4c8   :  { %5498 = vmatpush3.msra.mxu0 %v6380_v19  ;;  %5505 = vmatprep.mubr.msk.f32.mxu0 %vm6212_vm0, %v6211_v0 }
 0x4c9   :  { %5499 = vmatprep.subr.mxu0 %v6211_v0 }
 0x4ca   :  { %5500 = vmatpush3.msra.mxu0 %v6387_v20 }
 0x4cb   :  { %5501 = vmatprep.subr.mxu0 %v6211_v0 }
 0x4cc   :  { %5502 = vmatpush3.msra.mxu0 %v6392_v21 }
 0x4cd   :  { %5503 = vmatprep.subr.mxu0 %v6211_v0 }
 0x4ce   :  { %5504 = vmatpush3.msra.mxu0 %v6399_v22 }
 0x4cf   :  { %5506 = vmatmul.mubr.msk.f32.vlgmr.msra.gmra.mxu0 %vm159_vm1, %v739_v7  ;;  %5524 = vmatprep.subr.mxu0 %v6211_v0 }
 0x4d0   :  { %5526 = vmatprep.mubr.msk.f32.mxu0 %vm6212_vm0, %v6211_v0 }
 0x552   :  { %v6548_v28 = vpop.f32.mrf.mxu1 }
 0x554   :  { %v5496_v29 = vpop.f32.mrf.mxu1 }
 0x57f   :  { %v935_v34 = vpop.f32.mrf.mxu0 }
 0x581   :  { %v5474_v35 = vpop.f32.mrf.mxu0 }
 0x587   :  { %v6550_v36 = vpop.f32.mrf.mxu0 }
 0x588   :  { %v1191_v38 = vadd.f32 %v6548_v28, %v6550_v36 }
 0x589   :  { %v5485_v37 = vpop.f32.mrf.mxu0 }
 0x58f   :  { %v6557_v43 = vpop.f32.mrf.mxu0 }
 0x590   :  { %v1192_v44 = vadd.f32 %v1191_v38, %v6557_v43 }
 0x591   :  { %v5507_v46 = vpop.f32.mrf.mxu0 }
 0x592   :  { %v1193_v47 = vadd.f32 %v1192_v44, %v964_v40 }
 0x594   :  { %v1194_v48 = vsel %vm557_vm3, %v1193_v47, -inf  ;;  %v1205_v50 = vsel %vm569_vm5, %v1193_v47, -inf }
 0x595   :  { %1195 = vmax.xlane.f32.xlu0 %v1194_v48 }
 0x5ab   :  { %939 = vrot.lane.b32.xlu0 %v6493_v41, %s6214_s22 }
 0x5af   :  { %1399 = vrot.lane.b32.xlu0 %v6563_v49, %s6213_s3 }
 0x5b3   :  { %1395 = vrot.lane.b32.xlu0 %v6567_v31, %s6213_s3 }
 0x5d2   :  { %1206 = vmax.xlane.f32.xlu0 %v1205_v50 }
 0x61e   :  { %v1196_v33 = vpop.xlane.xlu0 %1195 }
 0x61f   :  { %v1197_v51 = vsub.f32 %v1193_v47, %v1196_v33 }
 0x621   :  { %v1198_v52 = vmul.f32 1.442695, %v1197_v51 }
 0x622   :  { %v940_v54 = vpop.permute.xlu0 %939 }
 0x623   :  { %5909 = vpow2.f32 %v1198_v52  ;;  %5848 = vpush %v940_v54 }
 0x626   :  { %v1400_v41 = vpop.permute.xlu0 %1399 }
 0x627   :  { %v6573_v32 = vadd.f32 %v1400_v41, %v6548_v28 }
 0x629   :  { %v1418_v59 = vsel %vm770_vm4, %v6573_v32, -inf }
 0x62a   :  { %v1396_v57 = vpop.permute.xlu0 %1395 }
 0x62b   :  { %v6577_v58 = vadd.f32 %v1396_v57, %v6550_v36 }
 0x62d   :  { %v1403_v60 = vsel %vm770_vm4, %v6577_v58, -inf  ;;  %v1433_v41 = vmax.f32 %v6577_v58, 0.0 }
 0x630   :  { %v5910_v55 = vpop.eup %5909 }
 0x631   :  { %v1200_v56 = vsel %vm557_vm3, %v5910_v55, 0.0 }
 0x632   :  { %1201 = vadd.xlane.f32.xlu1 %v1200_v56 }
 0x636   :  { %1419 = vmax.xlane.f32.xlu1 %v1418_v59 }
 0x63a   :  { %1404 = vmax.xlane.f32.xlu1 %v1403_v60 }
 0x654   :  { %s5849_s2 = spop %5848 }
 0x655   :  { %v942_v39 = vstv %s5849_s2 }
 0x656   :  { %v944_v61 = vmul.f32 0.0, %v942_v39 }
 0x658   :  { %v6583_v62 = vadd.f32 %v944_v61, %v935_v34 }
 0x65a   :  { %5509 = vmatpush3.msra.mxu1 %v6583_v62 }
 0x65b   :  { %v1207_v63 = vpop.xlane.xlu0 %1206  ;;  %5513 = vmatprep.subr.mxu1 %v6211_v0 }
 0x65c   :  { %v1208_v45 = vsub.f32 %v1193_v47, %v1207_v63  ;;  %v965_v63 = vld [vmem:[%s7386_s11] sm:$0x1] }
 0x65e   :  { %v1209_v53 = vmul.f32 1.442695, %v1208_v45 }
 0x660   :  { %5911 = vpow2.f32 %v1209_v53 }
 0x66d   :  { %v5912_v1 = vpop.eup %5911 }
 0x66e   :  { %1212 = vrot.lane.b32.xlu1 %v5912_v1, %s6214_s22 }
 0x6bb   :  { %v1202_v2 = vpop.xlane.xlu1 %1201 }
 0x6bc   :  { %5913 = vrcp.f32 %v1202_v2 }
 0x6bf   :  { %v1420_v3 = vpop.xlane.xlu1 %1419 }
 0x6c0   :  { %v1421_v4 = vsub.f32 %v6573_v32, %v1420_v3 }
 0x6c2   :  { %v1422_v5 = vmul.f32 1.442695, %v1421_v4 }
 0x6c3   :  { %v1405_v6 = vpop.xlane.xlu1 %1404 }
 0x6c4   :  { %5915 = vpow2.f32 %v1422_v5  ;;  %v1406_v7 = vsub.f32 %v6577_v58, %v1405_v6 }
 0x6c6   :  { %v1407_v24 = vmul.f32 1.442695, %v1406_v7 }
 0x6c8   :  { %5917 = vpow2.f32 %v1407_v24 }
 0x6c9   :  { %v5914_v25 = vpop.eup %5913 }
 0x6ca   :  { %v1204_v26 = vmul.f32 %v5914_v25, %v5910_v55 }
 0x6cc   :  { %5511 = vmatmul.mubr.msk.f32.vlgmr.msra.gmra.mxu1 %vm586_vm6, %v1204_v26 }
 0x6cd   :  { %5514 = vmatpush3.msra.mxu1 %v6459_v8  ;;  %5521 = vmatprep.mubr.msk.f32.mxu1 %vm6212_vm0, %v6211_v0 }
 0x6ce   :  { %5515 = vmatprep.subr.mxu1 %v6211_v0 }
 0x6cf   :  { %5516 = vmatpush3.msra.mxu1 %v6461_v9 }
 0x6d0   :  { %5517 = vmatprep.subr.mxu1 %v6211_v0 }
 0x6d1   :  { %v5916_v27 = vpop.eup %5915  ;;  %5518 = vmatpush3.msra.mxu1 %v6465_v10 }
 0x6d2   :  { %1425 = vrot.lane.b32.xlu0 %v5916_v27, %s6215_s23  ;;  %5519 = vmatprep.subr.mxu1 %v6211_v0 }
 0x6d3   :  { %5520 = vmatpush3.msra.mxu1 %v6471_v23 }
 0x6d4   :  { %5540 = vmatprep.subr.mxu1 %v6211_v0 }
 0x6d5   :  { %v5918_v29 = vpop.eup %5917 }
 0x6d6   :  { %1410 = vrot.lane.b32.xlu1 %v5918_v29, %s6215_s23 }
 0x6e0   :  { %v1213_v34 = vpop.permute.xlu1 %1212 }
 0x6e1   :  { %v1215_v35 = vsel %vm580_vm7, %v1213_v34, 0.0 }
 0x6fa   :  { %1216 = vadd.xlane.f32.xlu1 %v1215_v35 }
 0x744   :  { %v1426_v37 = vpop.permute.xlu0 %1425 }
 0x745   :  { %v1428_v38 = vsel %vm557_vm3, %v1426_v37, 0.0 }
 0x746   :  { %1429 = vadd.xlane.f32.xlu0 %v1428_v38 }
 0x748   :  { %v1411_v40 = vpop.permute.xlu1 %1410 }
 0x749   :  { %v1413_v44 = vsel %vm557_vm3, %v1411_v40, 0.0  ;;  %v1592_v40 = vld [vmem:[%s7385_s10] sm:$0x1] }
 0x74a   :  { %1414 = vadd.xlane.f32.xlu1 %v1413_v44 }
 0x783   :  { %v1217_v46 = vpop.xlane.xlu1 %1216 }
 0x784   :  { %5919 = vrcp.f32 %v1217_v46 }
 0x78c   :  { %v1289_v47 = vpop.f32.mrf.mxu1 }
 0x78d   :  { %5522 = vmatmul.mubr.msk.f32.vlgmr.msra.gmra.mxu1 %vm159_vm1, %v1289_v47 }
 0x78e   :  { %v5512_v48 = vpop.f32.mrf.mxu1  ;;  %5541 = vmatpush3.msra.mxu1 %v6347_v12  ;;  %5548 = vmatprep.mubr.msk.f32.mxu1 %vm6212_vm0, %v6211_v0 }
 0x78f   :  { %5542 = vmatprep.subr.mxu1 %v6211_v0 }
 0x790   :  { %5543 = vmatpush3.msra.mxu1 %v6355_v14 }
 0x791   :  { %v5920_v50 = vpop.eup %5919  ;;  %5544 = vmatprep.subr.mxu1 %v6211_v0 }
 0x792   :  { %v1219_v33 = vmul.f32 %v5920_v50, %v5912_v1  ;;  %5545 = vmatpush3.msra.mxu1 %v6363_v16 }
 0x793   :  { %5546 = vmatprep.subr.mxu1 %v6211_v0 }
 0x794   :  { %1441 = vperm.xlu1 %5888, %v1219_v33   ;;  %1446 = vperm.xlu0 %5889, %v1219_v33  }
 0x795   :  { %5547 = vmatpush3.msra.mxu1 %v6373_v18 }
 0x796   :  { %5562 = vmatprep.subr.mxu1 %v6211_v0 }
 0x798   :  { %1374 = vrot.lane.b32.xlu1 %v6550_v36, %s6219_s25  ;;  %1367 = vrot.lane.b32.xlu0 %v6557_v43, %s6222_s27 }
 0x79c   :  { %1379 = vrot.lane.b32.xlu1 %v6567_v31, %s6217_s24  ;;  %v1434_v31 = vmax.f32 %v6573_v32, 0.0 }
 0x7a0   :  { %1385 = vrot.lane.b32.xlu1 %v6548_v28, %s6220_s7 }
 0x7a4   :  { %1390 = vrot.lane.b32.xlu1 %v6563_v49, %s6221_s26 }
 0x7cf   :  { %v1430_v12 = vpop.xlane.xlu0 %1429 }
 0x7d0   :  { %5921 = vrcp.f32 %v1430_v12 }
 0x7d3   :  { %v1415_v14 = vpop.xlane.xlu1 %1414 }
 0x7d4   :  { %5923 = vrcp.f32 %v1415_v14 }
 0x7dd   :  { %v5922_v16 = vpop.eup %5921 }
 0x7de   :  { %v1432_v18 = vmul.f32 %v5922_v16, %v5916_v27 }
 0x7e0   :  { %v1436_v52 = vrot.slane %v1432_v18, 7  ;;  %v6689_v18 = vld [vmem:[#allocation3 + $0x2] sm:$0x1] }
 0x7e1   :  { %v5924_v51 = vpop.eup %5923 }
 0x7e2   :  { %v1417_v36 = vmul.f32 %v5924_v51, %v5918_v29  ;;  %v6693_v51 = vld [vmem:[#allocation2 + $0x2] sm:$0x1] }
 0x7e4   :  { %v1438_v43 = vsel %vm806_vm8, %v1417_v36, %v1436_v52 }
 0x7e5   :  { %1455 = vrot.lane.b32.xlu1 %v1438_v43, %s6215_s23 }
 0x80f   :  { %v1442_v54 = vpop.permute.xlu1 %1441  ;;  %v1447_v28 = vpop.permute.xlu0 %1446 }
 0x810   :  { %v1449_v49 = vmul.f32 %v1447_v28, %v1434_v31  ;;  %v1444_v55 = vmul.f32 %v1442_v54, %v1433_v41 }
 0x812   :  { %v1451_v56 = vrot.slane %v1449_v49, 7 }
 0x813   :  { %v1375_v59 = vpop.permute.xlu1 %1374  ;;  %v1368_v61 = vpop.permute.xlu0 %1367 }
 0x814   :  { %v1453_v57 = vsel %vm806_vm8, %v1444_v55, %v1451_v56 }
 0x815   :  { %1491 = vrot.lane.b32.xlu1 %v1453_v57, %s6223_s28 }
 0x817   :  { %v1380_v60 = vpop.permute.xlu1 %1379 }
 0x81b   :  { %v1386_v39 = vpop.permute.xlu1 %1385 }
 0x81f   :  { %v1391_v4 = vpop.permute.xlu1 %1390 }
 0x84d   :  { %v1362_v32 = vpop.f32.mrf.mxu1 }
 0x84e   :  { %v1370_v45 = vadd.f32 %v1368_v61, %v1362_v32  ;;  %v1377_v53 = vadd.f32 %v1375_v59, %v1362_v32  ;;  %v1388_v1 = vadd.f32 %v1386_v39, %v1362_v32 }
 0x84f   :  { %v5523_v58 = vpop.f32.mrf.mxu1 }
 0x850   :  { %v1371_v2 = vadd.f32 %v1370_v45, %v965_v63  ;;  %v1382_v3 = vadd.f32 %v1380_v60, %v1377_v53  ;;  %v1393_v7 = vadd.f32 %v1391_v4, %v1388_v1 }
 0x852   :  { %v1372_v5 = vmax.f32 %v1371_v2, 0.0  ;;  %v1383_v6 = vmax.f32 %v1382_v3, 0.0  ;;  %v1394_v24 = vmax.f32 %v1393_v7, 0.0 }
 0x854   :  { %1575 = vst.msk [vmem:[#allocation18 + $0x1] sm:$0x1] %vm946_vm9, %v1372_v5  ;;  %1597 = vrot.lane.b32.xlu1 %v1383_v6, %s6224_s29 }
 0x857   :  { %v1456_v25 = vpop.permute.xlu1 %1455 }
 0x858   :  { %1458 = vxpose.xlu0.b32.start.end [1/1] (short) (narrow) %v1456_v25, 8  ;;  %1672 = vrot.lane.b32.xlu1 %v1394_v24, %s6221_s26 }
 0x881   :  { %1568 = vrot.lane.b32.xlu0 %v1219_v33, %s6214_s22 }
 0x887   :  { %v1492_v26 = vpop.permute.xlu1 %1491 }
 0x888   :  { %5525 = vmatpush3.msk.msra.mxu0 %vm866_vm10, %v1492_v26 }
 0x889   :  { %5529 = vmatprep.subr.mxu0 %v6211_v0 }
 0x8c6   :  { %v1598_v27 = vpop.permute.xlu1 %1597 }
 0x8ca   :  { %v1673_v29 = vpop.permute.xlu1 %1672 }
 0x8cb   :  { %5549 = vmatmul.mubr.msk.f32.vlgmr.msra.gmra.mxu1 %vm159_vm1, %v1673_v29 }
 0x8cc   :  { %5564 = vmatprep.mubr.msk.f32.mxu1 %vm6212_vm0, %v6211_v0 }
 0x8d4   :  { %v1474_v34 = vpop.trf.xlu0 }
 0x8d5   :  { %5527 = vmatmul.mubr.msk.f32.vlgmr.msra.gmra.mxu0 %vm862_vm11, %v1474_v34 }
 0x8d6   :  { %5530 = vmatpush3.msra.mxu0 %v6345_v11  ;;  %5537 = vmatprep.mubr.msk.f32.mxu0 %vm6212_vm0, %v6211_v0 }
 0x8d7   :  { %5531 = vmatprep.subr.mxu0 %v6211_v0 }
 0x8d8   :  { %5532 = vmatpush3.msra.mxu0 %v6353_v13 }
 0x8d9   :  { %5533 = vmatprep.subr.mxu0 %v6211_v0 }
 0x8da   :  { %5534 = vmatpush3.msra.mxu0 %v6361_v15 }
 0x8db   :  { %5535 = vmatprep.subr.mxu0 %v6211_v0 }
 0x8dc   :  { %5536 = vmatpush3.msra.mxu0 %v6369_v17 }
 0x8dd   :  { %5538 = vmatmul.mubr.msk.f32.vlgmr.msra.gmra.mxu0 %vm159_vm1, %v1598_v27  ;;  %5551 = vmatprep.subr.mxu0 %v6211_v0 }
 0x8de   :  { %5552 = vmatpush3.msra.mxu0 %v6380_v19  ;;  %5559 = vmatprep.mubr.msk.f32.mxu0 %vm6212_vm0, %v6211_v0 }
 0x8df   :  { %5553 = vmatprep.subr.mxu0 %v6211_v0 }
 0x8e0   :  { %5554 = vmatpush3.msra.mxu0 %v6387_v20 }
 0x8e1   :  { %5555 = vmatprep.subr.mxu0 %v6211_v0 }
 0x8e2   :  { %5556 = vmatpush3.msra.mxu0 %v6392_v21 }
 0x8e3   :  { %5557 = vmatprep.subr.mxu0 %v6211_v0 }
 0x8e4   :  { %5558 = vmatpush3.msra.mxu0 %v6399_v22 }
 0x8e5   :  { %5560 = vmatmul.mubr.msk.f32.vlgmr.msra.gmra.mxu0 %vm159_vm1, %v1372_v5  ;;  %5578 = vmatprep.subr.mxu0 %v6211_v0 }
 0x8e6   :  { %5580 = vmatprep.mubr.msk.f32.mxu0 %vm6212_vm0, %v6211_v0 }
 0x8f3   :  { %v1569_v11 = vpop.permute.xlu0 %1568 }
 0x8f4   :  { %5850 = vpush %v1569_v11 }
 0x925   :  { %s5851_s18 = spop %5850 }
 0x926   :  { %v1571_v17 = vstv %s5851_s18 }
 0x927   :  { %v1573_v19 = vmul.f32 %v1571_v17, %v6583_v62 }
 0x98b   :  { %v6670_v13 = vpop.f32.mrf.mxu1 }
 0x98d   :  { %v5550_v15 = vpop.f32.mrf.mxu1 }
 0x995   :  { %v1564_v20 = vpop.f32.mrf.mxu0 }
 0x996   :  { %v6673_v21 = vadd.f32 %v1573_v19, %v1564_v20 }
 0x997   :  { %v5528_v22 = vpop.f32.mrf.mxu0 }
 0x998   :  { %5563 = vmatpush3.msra.mxu1 %v6673_v21 }
 0x999   :  { %5567 = vmatprep.subr.mxu1 %v6211_v0 }
 0x99d   :  { %v6677_v35 = vpop.f32.mrf.mxu0 }
 0x99e   :  { %v1819_v38 = vadd.f32 %v6670_v13, %v6677_v35 }
 0x99f   :  { %v5539_v37 = vpop.f32.mrf.mxu0 }
 0x9a0   :  { %v6748_v37 = vld [vmem:[#allocation13 + $0x8] sm:$0xff] }
 0x9a5   :  { %v6684_v44 = vpop.f32.mrf.mxu0 }
 0x9a6   :  { %v1820_v62 = vadd.f32 %v1819_v38, %v6684_v44 }
 0x9a7   :  { %v5561_v46 = vpop.f32.mrf.mxu0 }
 0x9a8   :  { %v1821_v47 = vadd.f32 %v1820_v62, %v1592_v40  ;;  %v6753_v46 = vld [vmem:[#allocation13] sm:$0xff] }
 0x9aa   :  { %v1822_v48 = vsel %vm557_vm3, %v1821_v47, -inf  ;;  %v1833_v36 = vsel %vm569_vm5, %v1821_v47, -inf }
 0x9ab   :  { %1823 = vmax.xlane.f32.xlu1 %v1822_v48 }
 0xa34   :  { %v1824_v50 = vpop.xlane.xlu1 %1823 }
 0xa35   :  { %v1825_v33 = vsub.f32 %v1821_v47, %v1824_v50 }
 0xa37   :  { %v1826_v12 = vmul.f32 1.442695, %v1825_v33 }
 0xa39   :  { %5925 = vpow2.f32 %v1826_v12 }
 0xa46   :  { %v5926_v14 = vpop.eup %5925 }
 0xa47   :  { %v1828_v16 = vsel %vm557_vm3, %v5926_v14, 0.0 }
 0xa48   :  { %1829 = vadd.xlane.f32.xlu1 %v1828_v16 }
 0xa59   :  { %2027 = vrot.lane.b32.xlu1 %v6689_v18, %s6213_s3 }
 0xa5d   :  { %2023 = vrot.lane.b32.xlu1 %v6693_v51, %s6213_s3 }
 0xa81   :  { %1834 = vmax.xlane.f32.xlu1 %v1833_v36 }
 0xad1   :  { %v1830_v52 = vpop.xlane.xlu1 %1829 }
 0xad2   :  { %5927 = vrcp.f32 %v1830_v52 }
 0xad5   :  { %v2028_v43 = vpop.permute.xlu1 %2027 }
 0xad6   :  { %v6699_v31 = vadd.f32 %v2028_v43, %v6670_v13 }
 0xad8   :  { %v2046_v54 = vsel %vm770_vm4, %v6699_v31, -inf  ;;  %v2062_v38 = vmax.f32 %v6699_v31, 0.0 }
 0xad9   :  { %2047 = vmax.xlane.f32.xlu0 %v2046_v54  ;;  %v2024_v28 = vpop.permute.xlu1 %2023 }
 0xada   :  { %v6704_v41 = vadd.f32 %v2024_v28, %v6677_v35 }
 0xadc   :  { %v2031_v49 = vsel %vm770_vm4, %v6704_v41, -inf  ;;  %v2061_v48 = vmax.f32 %v6704_v41, 0.0 }
 0xadd   :  { %2032 = vmax.xlane.f32.xlu1 %v2031_v49 }
 0xadf   :  { %v5928_v55 = vpop.eup %5927 }
 0xae0   :  { %v1832_v56 = vmul.f32 %v5928_v55, %v5926_v14  ;;  %v1593_v55 = vld [vmem:[%s7386_s11] sm:$0x1] }
 0xae2   :  { %5565 = vmatmul.mubr.msk.f32.vlgmr.msra.gmra.mxu1 %vm586_vm6, %v1832_v56 }
 0xae3   :  { %5568 = vmatpush3.msra.mxu1 %v6459_v8  ;;  %5575 = vmatprep.mubr.msk.f32.mxu1 %vm6212_vm0, %v6211_v0 }
 0xae4   :  { %5569 = vmatprep.subr.mxu1 %v6211_v0 }
 0xae5   :  { %5570 = vmatpush3.msra.mxu1 %v6461_v9 }
 0xae6   :  { %5571 = vmatprep.subr.mxu1 %v6211_v0 }
 0xae7   :  { %5572 = vmatpush3.msra.mxu1 %v6465_v10 }
 0xae8   :  { %5573 = vmatprep.subr.mxu1 %v6211_v0 }
 0xae9   :  { %5574 = vmatpush3.msra.mxu1 %v6471_v23 }
 0xaea   :  { %5594 = vmatprep.subr.mxu1 %v6211_v0 }
 0xb0a   :  { %v1835_v57 = vpop.xlane.xlu1 %1834 }
 0xb0b   :  { %v1836_v59 = vsub.f32 %v1821_v47, %v1835_v57 }
 0xb0d   :  { %v1837_v8 = vmul.f32 1.442695, %v1836_v59 }
 0xb0f   :  { %5929 = vpow2.f32 %v1837_v8 }
 0xb1c   :  { %v5930_v60 = vpop.eup %5929 }
 0xb1d   :  { %1840 = vrot.lane.b32.xlu0 %v5930_v60, %s6214_s22 }
 0xb62   :  { %v2048_v39 = vpop.xlane.xlu0 %2047 }
 0xb63   :  { %v2049_v9 = vsub.f32 %v6699_v31, %v2048_v39  ;;  %v6774_v39 = vld [vmem:[#allocation12 + $0x18] sm:$0xff] }
 0xb65   :  { %v2050_v61 = vmul.f32 1.442695, %v2049_v9 }
 0xb66   :  { %v2033_v63 = vpop.xlane.xlu1 %2032 }
 0xb67   :  { %5931 = vpow2.f32 %v2050_v61  ;;  %v2034_v10 = vsub.f32 %v6704_v41, %v2033_v63  ;;  %v6777_v61 = vld [vmem:[#allocation12 + $0x10] sm:$0xff]  ;;  %v6783_v63 = vld [vmem:[#allocation12 + $0x8] sm:$0xff] }
 0xb69   :  { %v2035_v32 = vmul.f32 1.442695, %v2034_v10  ;;  %v6787_v10 = vld [vmem:[#allocation12] sm:$0xff] }
 0xb6b   :  { %5933 = vpow2.f32 %v2035_v32  ;;  %v6791_v32 = vld [vmem:[#allocation15 + $0x18] sm:$0xff] }
 0xb74   :  { %v5932_v23 = vpop.eup %5931 }
 0xb75   :  { %2053 = vrot.lane.b32.xlu1 %v5932_v23, %s6215_s23 }
 0xb78   :  { %v5934_v45 = vpop.eup %5933 }
 0xb79   :  { %2038 = vrot.lane.b32.xlu1 %v5934_v45, %s6215_s23 }
 0xb8f   :  { %v1841_v53 = vpop.permute.xlu0 %1840 }
 0xb90   :  { %v1843_v1 = vsel %vm580_vm7, %v1841_v53, 0.0  ;;  %v6806_v53 = vld [vmem:[#allocation15] sm:$0xff] }
 0xb91   :  { %1844 = vadd.xlane.f32.xlu0 %v1843_v1 }
 0xba2   :  { %v1917_v58 = vpop.f32.mrf.mxu1 }
 0xba3   :  { %5576 = vmatmul.mubr.msk.f32.vlgmr.msra.gmra.mxu1 %vm159_vm1, %v1917_v58 }
 0xba4   :  { %v5566_v2 = vpop.f32.mrf.mxu1  ;;  %5602 = vmatprep.mubr.msk.f32.mxu1 %vm6212_vm0, %v6211_v0 }
 0xbe7   :  { %v2054_v3 = vpop.permute.xlu1 %2053 }
 0xbe8   :  { %v2056_v4 = vsel %vm557_vm3, %v2054_v3, 0.0 }
 0xbe9   :  { %2057 = vadd.xlane.f32.xlu1 %v2056_v4 }
 0xbeb   :  { %v2039_v5 = vpop.permute.xlu1 %2038 }
 0xbec   :  { %v2041_v6 = vsel %vm557_vm3, %v2039_v5, 0.0 }
 0xbed   :  { %2042 = vadd.xlane.f32.xlu0 %v2041_v6 }
 0xc1a   :  { %v1845_v7 = vpop.xlane.xlu0 %1844 }
 0xc1b   :  { %5935 = vrcp.f32 %v1845_v7 }
 0xc28   :  { %v5936_v24 = vpop.eup %5935 }
 0xc29   :  { %v1847_v25 = vmul.f32 %v5936_v24, %v5930_v60 }
 0xc2b   :  { %2069 = vperm.xlu1 %5888, %v1847_v25   ;;  %2074 = vperm.xlu0 %5889, %v1847_v25  }
 0xc2f   :  { %2002 = vrot.lane.b32.xlu1 %v6677_v35, %s6219_s25  ;;  %2007 = vrot.lane.b32.xlu0 %v6693_v51, %s6217_s24  ;;  %v6740_v35 = vld [vmem:[#allocation13 + $0x18] sm:$0xff] }
 0xc30   :  { %5595 = vmatpush3.msra.mxu1 %v6740_v35 }
 0xc31   :  { %5596 = vmatprep.subr.mxu1 %v6211_v0 }
 0xc33   :  { %2013 = vrot.lane.b32.xlu1 %v6670_v13, %s6220_s7  ;;  %2018 = vrot.lane.b32.xlu0 %v6689_v18, %s6221_s26  ;;  %v6744_v13 = vld [vmem:[#allocation13 + $0x10] sm:$0xff] }
 0xc34   :  { %5597 = vmatpush3.msra.mxu1 %v6744_v13 }
 0xc35   :  { %5598 = vmatprep.subr.mxu1 %v6211_v0 }
 0xc36   :  { %5599 = vmatpush3.msra.mxu1 %v6748_v37 }
 0xc37   :  { %5600 = vmatprep.subr.mxu1 %v6211_v0 }
 0xc38   :  { %5601 = vmatpush3.msra.mxu1 %v6753_v46 }
 0xc39   :  { %5616 = vmatprep.subr.mxu1 %v6211_v0 }
 0xc63   :  { %v1990_v26 = vpop.f32.mrf.mxu1 }
 0xc65   :  { %v5577_v27 = vpop.f32.mrf.mxu1 }
 0xc66   :  { %v2220_v27 = vld [vmem:[%s7385_s10] sm:$0x1] }
 0xc72   :  { %v2058_v29 = vpop.xlane.xlu1 %2057 }
 0xc73   :  { %5937 = vrcp.f32 %v2058_v29 }
 0xc76   :  { %v2043_v34 = vpop.xlane.xlu0 %2042 }
 0xc77   :  { %5939 = vrcp.f32 %v2043_v34 }
 0xc80   :  { %v5938_v11 = vpop.eup %5937 }
 0xc81   :  { %v2060_v15 = vmul.f32 %v5938_v11, %v5932_v23  ;;  %v6796_v23 = vld [vmem:[#allocation15 + $0x10] sm:$0xff] }
 0xc83   :  { %v2064_v20 = vrot.slane %v2060_v15, 7 }
 0xc84   :  { %v5940_v17 = vpop.eup %5939 }
 0xc85   :  { %v2045_v19 = vmul.f32 %v5940_v17, %v5934_v45  ;;  %v6802_v45 = vld [vmem:[#allocation15 + $0x8] sm:$0xff] }
 0xc87   :  { %v2066_v22 = vsel %vm806_vm8, %v2045_v19, %v2064_v20 }
 0xc88   :  { %2083 = vrot.lane.b32.xlu1 %v2066_v22, %s6215_s23 }
 0xca6   :  { %v2075_v40 = vpop.permute.xlu0 %2074  ;;  %v2070_v62 = vpop.permute.xlu1 %2069 }
 0xca7   :  { %v2077_v47 = vmul.f32 %v2075_v40, %v2062_v38  ;;  %v2072_v33 = vmul.f32 %v2070_v62, %v2061_v48  ;;  %v6834_v40 = vld [vmem:[#allocation3 + $0x3] sm:$0x1]  ;;  %v6838_v62 = vld [vmem:[#allocation2 + $0x3] sm:$0x1] }
 0xca9   :  { %v2079_v50 = vrot.slane %v2077_v47, 7 }
 0xcaa   :  { %v2008_v12 = vpop.permute.xlu0 %2007  ;;  %v2003_v14 = vpop.permute.xlu1 %2002 }
 0xcab   :  { %v2005_v16 = vadd.f32 %v2003_v14, %v1990_v26  ;;  %v2081_v18 = vsel %vm806_vm8, %v2072_v33, %v2079_v50 }
 0xcac   :  { %2119 = vrot.lane.b32.xlu0 %v2081_v18, %s6223_s28 }
 0xcad   :  { %v2010_v51 = vadd.f32 %v2008_v12, %v2005_v16 }
 0xcae   :  { %v2014_v36 = vpop.permute.xlu1 %2013  ;;  %v2019_v31 = vpop.permute.xlu0 %2018 }
 0xcaf   :  { %v2016_v52 = vadd.f32 %v2014_v36, %v1990_v26  ;;  %v2011_v43 = vmax.f32 %v2010_v51, 0.0 }
 0xcb0   :  { %1995 = vrot.lane.b32.xlu0 %v6684_v44, %s6222_s27 }
 0xcb1   :  { %v2021_v54 = vadd.f32 %v2019_v31, %v2016_v52  ;;  %2225 = vrot.lane.b32.xlu1 %v2011_v43, %s6224_s29 }
 0xcb3   :  { %v2022_v28 = vmax.f32 %v2021_v54, 0.0  ;;  %v6856_v54 = vld [vmem:[#allocation16 + $0x18] sm:$0xff] }
 0xcb5   :  { %2300 = vrot.lane.b32.xlu1 %v2022_v28, %s6221_s26 }
 0xcfa   :  { %v2084_v41 = vpop.permute.xlu1 %2083 }
 0xcfb   :  { %2086 = vxpose.xlu0.b32.start.end [1/1] (short) (narrow) %v2084_v41, 8  ;;  %v6861_v41 = vld [vmem:[#allocation16 + $0x10] sm:$0xff] }
 0xd1e   :  { %v2120_v49 = vpop.permute.xlu0 %2119 }
 0xd1f   :  { %5579 = vmatpush3.msk.msra.mxu0 %vm866_vm10, %v2120_v49  ;;  %v6863_v49 = vld [vmem:[#allocation16 + $0x8] sm:$0xff] }
 0xd20   :  { %5583 = vmatprep.subr.mxu0 %v6211_v0 }
 0xd22   :  { %v1996_v56 = vpop.permute.xlu0 %1995 }
 0xd23   :  { %v1998_v57 = vadd.f32 %v1996_v56, %v1990_v26  ;;  %v2226_v44 = vpop.permute.xlu1 %2225 }
 0xd24   :  { %2196 = vrot.lane.b32.xlu0 %v1847_v25, %s6214_s22 }
 0xd25   :  { %v1999_v59 = vadd.f32 %v1998_v57, %v1593_v55  ;;  %v6869_v55 = vld [vmem:[#allocation16] sm:$0xff] }
 0xd27   :  { %v2000_v8 = vmax.f32 %v1999_v59, 0.0  ;;  %v2301_v60 = vpop.permute.xlu1 %2300 }
 0xd28   :  { %5603 = vmatmul.mubr.msk.f32.vlgmr.msra.gmra.mxu1 %vm159_vm1, %v2301_v60 }
 0xd29   :  { %2203 = vst.msk [vmem:[#allocation18 + $0x2] sm:$0x1] %vm946_vm9, %v2000_v8  ;;  %5618 = vmatprep.mubr.msk.f32.mxu1 %vm6212_vm0, %v6211_v0 }
 0xd77   :  { %v2102_v9 = vpop.trf.xlu0 }
 0xd78   :  { %5581 = vmatmul.mubr.msk.f32.vlgmr.msra.gmra.mxu0 %vm862_vm11, %v2102_v9 }
 0xd79   :  { %5584 = vmatpush3.msra.mxu0 %v6774_v39  ;;  %5591 = vmatprep.mubr.msk.f32.mxu0 %vm6212_vm0, %v6211_v0 }
 0xd7a   :  { %5585 = vmatprep.subr.mxu0 %v6211_v0 }
 0xd7b   :  { %5586 = vmatpush3.msra.mxu0 %v6777_v61 }
 0xd7c   :  { %5587 = vmatprep.subr.mxu0 %v6211_v0 }
 0xd7d   :  { %5588 = vmatpush3.msra.mxu0 %v6783_v63 }
 0xd7e   :  { %5589 = vmatprep.subr.mxu0 %v6211_v0 }
 0xd7f   :  { %5590 = vmatpush3.msra.mxu0 %v6787_v10 }
 0xd80   :  { %5592 = vmatmul.mubr.msk.f32.vlgmr.msra.gmra.mxu0 %vm159_vm1, %v2226_v44  ;;  %5605 = vmatprep.subr.mxu0 %v6211_v0 }
 0xd81   :  { %5606 = vmatpush3.msra.mxu0 %v6791_v32  ;;  %5613 = vmatprep.mubr.msk.f32.mxu0 %vm6212_vm0, %v6211_v0 }
 0xd82   :  { %5607 = vmatprep.subr.mxu0 %v6211_v0 }
 0xd83   :  { %5608 = vmatpush3.msra.mxu0 %v6796_v23 }
 0xd84   :  { %5609 = vmatprep.subr.mxu0 %v6211_v0 }
 0xd85   :  { %5610 = vmatpush3.msra.mxu0 %v6802_v45 }
 0xd86   :  { %5611 = vmatprep.subr.mxu0 %v6211_v0 }
 0xd87   :  { %5612 = vmatpush3.msra.mxu0 %v6806_v53 }
 0xd88   :  { %5614 = vmatmul.mubr.msk.f32.vlgmr.msra.gmra.mxu0 %vm159_vm1, %v2000_v8  ;;  %5632 = vmatprep.subr.mxu0 %v6211_v0 }
 0xd89   :  { %5634 = vmatprep.mubr.msk.f32.mxu0 %vm6212_vm0, %v6211_v0 }
 0xd96   :  { %v2197_v1 = vpop.permute.xlu0 %2196 }
 0xd97   :  { %5852 = vpush %v2197_v1 }
 0xdc8   :  { %s5853_s8 = spop %5852 }
 0xdc9   :  { %v2199_v3 = vstv %s5853_s8 }
 0xdca   :  { %v2201_v4 = vmul.f32 %v2199_v3, %v6673_v21 }
 0xde8   :  { %v6815_v58 = vpop.f32.mrf.mxu1 }
 0xdea   :  { %v5604_v2 = vpop.f32.mrf.mxu1 }
 0xe38   :  { %v2192_v5 = vpop.f32.mrf.mxu0 }
 0xe39   :  { %v6818_v6 = vadd.f32 %v2201_v4, %v2192_v5 }
 0xe3a   :  { %v5582_v7 = vpop.f32.mrf.mxu0 }
 0xe3b   :  { %5617 = vmatpush3.msra.mxu1 %v6818_v6 }
 0xe3c   :  { %5621 = vmatprep.subr.mxu1 %v6211_v0 }
 0xe40   :  { %v6822_v24 = vpop.f32.mrf.mxu0 }
 0xe41   :  { %v2447_v26 = vadd.f32 %v6815_v58, %v6822_v24 }
 0xe42   :  { %v5593_v25 = vpop.f32.mrf.mxu0 }
 0xe48   :  { %v6829_v29 = vpop.f32.mrf.mxu0 }
 0xe49   :  { %v2448_v21 = vadd.f32 %v2447_v26, %v6829_v29 }
 0xe4a   :  { %v5615_v34 = vpop.f32.mrf.mxu0 }
 0xe4b   :  { %v2449_v11 = vadd.f32 %v2448_v21, %v2220_v27 }
 0xe4d   :  { %v2450_v15 = vsel %vm557_vm3, %v2449_v11, -inf  ;;  %v2461_v47 = vsel %vm569_vm5, %v2449_v11, -inf }
 0xe4e   :  { %2451 = vmax.xlane.f32.xlu1 %v2450_v15 }
 0xed7   :  { %v2452_v17 = vpop.xlane.xlu1 %2451 }
 0xed8   :  { %v2453_v19 = vsub.f32 %v2449_v11, %v2452_v17 }
 0xeda   :  { %v2454_v20 = vmul.f32 1.442695, %v2453_v19 }
 0xedc   :  { %5941 = vpow2.f32 %v2454_v20 }
 0xee9   :  { %v5942_v22 = vpop.eup %5941 }
 0xeea   :  { %v2456_v38 = vsel %vm557_vm3, %v5942_v22, 0.0 }
 0xeeb   :  { %2457 = vadd.xlane.f32.xlu1 %v2456_v38 }
 0xefc   :  { %2655 = vrot.lane.b32.xlu1 %v6834_v40, %s6213_s3 }
 0xf00   :  { %2651 = vrot.lane.b32.xlu1 %v6838_v62, %s6213_s3 }
 0xf24   :  { %2462 = vmax.xlane.f32.xlu1 %v2461_v47 }
 0xf74   :  { %v2458_v48 = vpop.xlane.xlu1 %2457 }
 0xf75   :  { %5943 = vrcp.f32 %v2458_v48 }
 0xf78   :  { %v2656_v50 = vpop.permute.xlu1 %2655 }
 0xf79   :  { %v6844_v33 = vadd.f32 %v2656_v50, %v6815_v58 }
 0xf7b   :  { %v2674_v12 = vsel %vm770_vm4, %v6844_v33, -inf }
 0xf7c   :  { %2675 = vmax.xlane.f32.xlu0 %v2674_v12  ;;  %v2652_v14 = vpop.permute.xlu1 %2651 }
 0xf7d   :  { %v6849_v16 = vadd.f32 %v2652_v14, %v6822_v24 }
 0xf7f   :  { %v2659_v18 = vsel %vm770_vm4, %v6849_v16, -inf }
 0xf80   :  { %2660 = vmax.xlane.f32.xlu1 %v2659_v18 }
 0xf82   :  { %v5944_v51 = vpop.eup %5943 }
 0xf83   :  { %v2460_v36 = vmul.f32 %v5944_v51, %v5942_v22 }
 0xf85   :  { %5619 = vmatmul.mubr.msk.f32.vlgmr.msra.gmra.mxu1 %vm586_vm6, %v2460_v36 }
 0xf86   :  { %5629 = vmatprep.mubr.msk.f32.mxu1 %vm6212_vm0, %v6211_v0  ;;  %5622 = vmatpush3.msra.mxu1 %v6856_v54 }
 0xf87   :  { %5623 = vmatprep.subr.mxu1 %v6211_v0 }
 0xf88   :  { %5624 = vmatpush3.msra.mxu1 %v6861_v41 }
 0xf89   :  { %5625 = vmatprep.subr.mxu1 %v6211_v0 }
 0xf8a   :  { %5626 = vmatpush3.msra.mxu1 %v6863_v49 }
 0xf8b   :  { %5627 = vmatprep.subr.mxu1 %v6211_v0 }
 0xf8c   :  { %5628 = vmatpush3.msra.mxu1 %v6869_v55 }
 0xf8d   :  { %5648 = vmatprep.subr.mxu1 %v6211_v0 }
 0xfad   :  { %v2463_v52 = vpop.xlane.xlu1 %2462 }
 0xfae   :  { %v2464_v43 = vsub.f32 %v2449_v11, %v2463_v52 }
 0xfb0   :  { %v2465_v31 = vmul.f32 1.442695, %v2464_v43 }
 0xfb2   :  { %5945 = vpow2.f32 %v2465_v31 }
 0xfbf   :  { %v5946_v28 = vpop.eup %5945 }
 0xfc0   :  { %2468 = vrot.lane.b32.xlu0 %v5946_v28, %s6214_s22 }
0x1005   :  { %v2676_v56 = vpop.xlane.xlu0 %2675 }
0x1006   :  { %v2677_v57 = vsub.f32 %v6844_v33, %v2676_v56 }
0x1008   :  { %v2678_v44 = vmul.f32 1.442695, %v2677_v57 }
0x1009   :  { %v2661_v59 = vpop.xlane.xlu1 %2660 }
0x100a   :  { %5947 = vpow2.f32 %v2678_v44  ;;  %v2662_v8 = vsub.f32 %v6849_v16, %v2661_v59 }
0x100c   :  { %v2663_v60 = vmul.f32 1.442695, %v2662_v8 }
0x100e   :  { %5949 = vpow2.f32 %v2663_v60 }
0x1017   :  { %v5948_v9 = vpop.eup %5947 }
0x1018   :  { %2681 = vrot.lane.b32.xlu1 %v5948_v9, %s6215_s23 }
0x101b   :  { %v5950_v1 = vpop.eup %5949 }
0x101c   :  { %2666 = vrot.lane.b32.xlu1 %v5950_v1, %s6215_s23 }
0x1032   :  { %v2469_v2 = vpop.permute.xlu0 %2468 }
0x1033   :  { %v2471_v3 = vsel %vm580_vm7, %v2469_v2, 0.0 }
0x1040   :  { %2472 = vadd.xlane.f32.xlu1 %v2471_v3 }
0x1045   :  { %v2545_v4 = vpop.f32.mrf.mxu1 }
0x1046   :  { %5630 = vmatmul.mubr.msk.f32.vlgmr.msra.gmra.mxu1 %vm159_vm1, %v2545_v4 }
0x1047   :  { %v5620_v5 = vpop.f32.mrf.mxu1  ;;  %5649 = vmatpush3.msra.mxu1 %v6740_v35  ;;  %5656 = vmatprep.mubr.msk.f32.mxu1 %vm6212_vm0, %v6211_v0 }
0x1048   :  { %5650 = vmatprep.subr.mxu1 %v6211_v0 }
0x1049   :  { %5651 = vmatpush3.msra.mxu1 %v6744_v13 }
0x104a   :  { %5652 = vmatprep.subr.mxu1 %v6211_v0 }
0x104b   :  { %5653 = vmatpush3.msra.mxu1 %v6748_v37 }
0x104c   :  { %5654 = vmatprep.subr.mxu1 %v6211_v0 }
0x104d   :  { %5655 = vmatpush3.msra.mxu1 %v6753_v46 }
0x104e   :  { %5670 = vmatprep.subr.mxu1 %v6211_v0 }
0x108a   :  { %v2682_v7 = vpop.permute.xlu1 %2681 }
0x108b   :  { %v2684_v25 = vsel %vm557_vm3, %v2682_v7, 0.0 }
0x108c   :  { %2685 = vadd.xlane.f32.xlu0 %v2684_v25 }
0x108e   :  { %v2667_v26 = vpop.permute.xlu1 %2666 }
0x108f   :  { %v2669_v27 = vsel %vm557_vm3, %v2667_v26, 0.0 }
0x1090   :  { %2670 = vadd.xlane.f32.xlu0 %v2669_v27 }
0x10c9   :  { %v2473_v21 = vpop.xlane.xlu1 %2472 }
0x10ca   :  { %5951 = vrcp.f32 %v2473_v21 }
0x10d7   :  { %v5952_v34 = vpop.eup %5951 }
0x10d8   :  { %v6891_v11 = vmul.f32 %v5952_v34, %v5946_v28 }
0x10da   :  { %2697 = vperm.xlu1 %5888, %v6891_v11   ;;  %2702 = vperm.xlu0 %5889, %v6891_v11  }
0x10de   :  { %2630 = vrot.lane.b32.xlu1 %v6822_v24, %s6219_s25  ;;  %2641 = vrot.lane.b32.xlu0 %v6815_v58, %s6220_s7  ;;  %v2690_v58 = vmax.f32 %v6844_v33, 0.0 }
0x10e2   :  { %2635 = vrot.lane.b32.xlu1 %v6838_v62, %s6217_s24 }
0x10e6   :  { %2646 = vrot.lane.b32.xlu1 %v6834_v40, %s6221_s26  ;;  %v2689_v40 = vmax.f32 %v6849_v16, 0.0 }
0x1106   :  { %v2618_v15 = vpop.f32.mrf.mxu1 }
0x1108   :  { %v5631_v17 = vpop.f32.mrf.mxu1 }
0x1115   :  { %v2686_v19 = vpop.xlane.xlu0 %2685 }
0x1116   :  { %5953 = vrcp.f32 %v2686_v19  ;;  %v2848_v19 = vld [vmem:[%s7385_s10] sm:$0x1] }
0x1119   :  { %v2671_v20 = vpop.xlane.xlu0 %2670 }
0x111a   :  { %5955 = vrcp.f32 %v2671_v20 }
0x1123   :  { %v5954_v22 = vpop.eup %5953 }
0x1124   :  { %v2688_v38 = vmul.f32 %v5954_v22, %v5948_v9 }
0x1126   :  { %v2692_v24 = vrot.slane %v2688_v38, 7 }
0x1127   :  { %v5956_v47 = vpop.eup %5955 }
0x1128   :  { %v2673_v48 = vmul.f32 %v5956_v47, %v5950_v1 }
0x112a   :  { %v2694_v50 = vsel %vm806_vm8, %v2673_v48, %v2692_v24  ;;  %v6962_v24 = vld [vmem:[#allocation3 + $0x4] sm:$0x1] }
0x112b   :  { %2711 = vrot.lane.b32.xlu0 %v2694_v50, %s6215_s23  ;;  %v6966_v50 = vld [vmem:[#allocation2 + $0x4] sm:$0x1] }
0x1155   :  { %v2698_v62 = vpop.permute.xlu1 %2697  ;;  %v2703_v12 = vpop.permute.xlu0 %2702 }
0x1156   :  { %v2705_v14 = vmul.f32 %v2703_v12, %v2690_v58  ;;  %v2700_v18 = vmul.f32 %v2698_v62, %v2689_v40 }
0x1158   :  { %v2707_v51 = vrot.slane %v2705_v14, 7 }
0x1159   :  { %v2631_v36 = vpop.permute.xlu1 %2630  ;;  %v2642_v31 = vpop.permute.xlu0 %2641 }
0x115a   :  { %v2709_v52 = vsel %vm806_vm8, %v2700_v18, %v2707_v51  ;;  %v2633_v43 = vadd.f32 %v2631_v36, %v2618_v15  ;;  %v2644_v33 = vadd.f32 %v2642_v31, %v2618_v15 }
0x115b   :  { %2747 = vrot.lane.b32.xlu1 %v2709_v52, %s6223_s28 }
0x115d   :  { %v2636_v28 = vpop.permute.xlu1 %2635 }
0x115e   :  { %v2638_v56 = vadd.f32 %v2636_v28, %v2633_v43 }
0x115f   :  { %2623 = vrot.lane.b32.xlu1 %v6829_v29, %s6222_s27  ;;  %v2221_v29 = vld [vmem:[%s7386_s11] sm:$0x1] }
0x1160   :  { %v2639_v57 = vmax.f32 %v2638_v56, 0.0 }
0x1161   :  { %v2647_v44 = vpop.permute.xlu1 %2646 }
0x1162   :  { %v2649_v59 = vadd.f32 %v2647_v44, %v2644_v33  ;;  %2853 = vrot.lane.b32.xlu0 %v2639_v57, %s6224_s29 }
0x1164   :  { %v2650_v16 = vmax.f32 %v2649_v59, 0.0 }
0x1166   :  { %2928 = vrot.lane.b32.xlu0 %v2650_v16, %s6221_s26 }
0x119d   :  { %v2712_v8 = vpop.permute.xlu0 %2711 }
0x119e   :  { %2714 = vxpose.xlu1.b32.start.end [1/1] (short) (narrow) %v2712_v8, 8 }
0x11cd   :  { %v2748_v60 = vpop.permute.xlu1 %2747 }
0x11ce   :  { %5633 = vmatpush3.msk.msra.mxu0 %vm866_vm10, %v2748_v60 }
0x11cf   :  { %5637 = vmatprep.subr.mxu0 %v6211_v0 }
0x11d1   :  { %v2624_v9 = vpop.permute.xlu1 %2623 }
0x11d2   :  { %v2626_v1 = vadd.f32 %v2624_v9, %v2618_v15 }
0x11d4   :  { %v2627_v2 = vadd.f32 %v2626_v1, %v2221_v29  ;;  %v2854_v3 = vpop.permute.xlu0 %2853 }
0x11d6   :  { %v2628_v4 = vmax.f32 %v2627_v2, 0.0 }
0x11d8   :  { %2831 = vst.msk [vmem:[#allocation18 + $0x3] sm:$0x1] %vm946_vm9, %v2628_v4  ;;  %v2929_v5 = vpop.permute.xlu0 %2928 }
0x11d9   :  { %5657 = vmatmul.mubr.msk.f32.vlgmr.msra.gmra.mxu1 %vm159_vm1, %v2929_v5 }
0x11da   :  { %5672 = vmatprep.mubr.msk.f32.mxu1 %vm6212_vm0, %v6211_v0 }
0x121a   :  { %v2730_v7 = vpop.trf.xlu1 }
0x121b   :  { %5635 = vmatmul.mubr.msk.f32.vlgmr.msra.gmra.mxu0 %vm862_vm11, %v2730_v7 }
0x121c   :  { %5638 = vmatpush3.msra.mxu0 %v6774_v39  ;;  %5645 = vmatprep.mubr.msk.f32.mxu0 %vm6212_vm0, %v6211_v0 }
0x121d   :  { %5639 = vmatprep.subr.mxu0 %v6211_v0 }
0x121e   :  { %5640 = vmatpush3.msra.mxu0 %v6777_v61 }
0x121f   :  { %5641 = vmatprep.subr.mxu0 %v6211_v0 }
0x1220   :  { %5642 = vmatpush3.msra.mxu0 %v6783_v63 }
0x1221   :  { %5643 = vmatprep.subr.mxu0 %v6211_v0 }
0x1222   :  { %5644 = vmatpush3.msra.mxu0 %v6787_v10 }
0x1223   :  { %5646 = vmatmul.mubr.msk.f32.vlgmr.msra.gmra.mxu0 %vm159_vm1, %v2854_v3  ;;  %5659 = vmatprep.subr.mxu0 %v6211_v0 }
0x1224   :  { %5660 = vmatpush3.msra.mxu0 %v6791_v32  ;;  %5667 = vmatprep.mubr.msk.f32.mxu0 %vm6212_vm0, %v6211_v0 }
0x1225   :  { %5661 = vmatprep.subr.mxu0 %v6211_v0 }
0x1226   :  { %5662 = vmatpush3.msra.mxu0 %v6796_v23 }
0x1227   :  { %5663 = vmatprep.subr.mxu0 %v6211_v0 }
0x1228   :  { %5664 = vmatpush3.msra.mxu0 %v6802_v45 }
0x1229   :  { %5665 = vmatprep.subr.mxu0 %v6211_v0 }
0x122a   :  { %5666 = vmatpush3.msra.mxu0 %v6806_v53 }
0x122b   :  { %5668 = vmatmul.mubr.msk.f32.vlgmr.msra.gmra.mxu0 %vm159_vm1, %v2628_v4  ;;  %5686 = vmatprep.subr.mxu0 %v6211_v0 }
0x122c   :  { %5688 = vmatprep.mubr.msk.f32.mxu0 %vm6212_vm0, %v6211_v0 }
0x1299   :  { %v6947_v25 = vpop.f32.mrf.mxu1 }
0x129b   :  { %v5658_v26 = vpop.f32.mrf.mxu1 }
0x12db   :  { %v2820_v27 = vpop.f32.mrf.mxu0 }
0x12dd   :  { %v5636_v21 = vpop.f32.mrf.mxu0 }
0x12e3   :  { %v6949_v34 = vpop.f32.mrf.mxu0 }
0x12e4   :  { %v3075_v17 = vadd.f32 %v6947_v25, %v6949_v34 }
0x12e5   :  { %v5647_v15 = vpop.f32.mrf.mxu0 }
0x12eb   :  { %v6956_v20 = vpop.f32.mrf.mxu0 }
0x12ec   :  { %v3076_v22 = vadd.f32 %v3075_v17, %v6956_v20 }
0x12ed   :  { %v5669_v38 = vpop.f32.mrf.mxu0 }
0x12ee   :  { %v3077_v47 = vadd.f32 %v3076_v22, %v2848_v19 }
0x12f0   :  { %v3078_v48 = vsel %vm557_vm3, %v3077_v47, -inf  ;;  %v3089_v58 = vsel %vm569_vm5, %v3077_v47, -inf }
0x12f1   :  { %3079 = vmax.xlane.f32.xlu0 %v3078_v48 }
0x1307   :  { %2824 = vrot.lane.b32.xlu0 %v6891_v11, %s6214_s22 }
0x130b   :  { %3283 = vrot.lane.b32.xlu0 %v6962_v24, %s6213_s3 }
0x130f   :  { %3279 = vrot.lane.b32.xlu0 %v6966_v50, %s6213_s3 }
0x132e   :  { %3090 = vmax.xlane.f32.xlu0 %v3089_v58 }
0x137a   :  { %v3080_v62 = vpop.xlane.xlu0 %3079 }
0x137b   :  { %v3081_v12 = vsub.f32 %v3077_v47, %v3080_v62 }
0x137d   :  { %v3082_v40 = vmul.f32 1.442695, %v3081_v12 }
0x137e   :  { %v2825_v14 = vpop.permute.xlu0 %2824 }
0x137f   :  { %5957 = vpow2.f32 %v3082_v40  ;;  %5854 = vpush %v2825_v14 }
0x1382   :  { %v3284_v11 = vpop.permute.xlu0 %3283 }
0x1383   :  { %v6972_v51 = vadd.f32 %v3284_v11, %v6947_v25 }
0x1385   :  { %v3302_v31 = vsel %vm770_vm4, %v6972_v51, -inf }
0x1386   :  { %v3280_v52 = vpop.permute.xlu0 %3279 }
0x1387   :  { %v6976_v43 = vadd.f32 %v3280_v52, %v6949_v34 }
0x1389   :  { %v3287_v28 = vsel %vm770_vm4, %v6976_v43, -inf }
0x138c   :  { %v5958_v18 = vpop.eup %5957 }
0x138d   :  { %v3084_v36 = vsel %vm557_vm3, %v5958_v18, 0.0 }
0x138e   :  { %3085 = vadd.xlane.f32.xlu1 %v3084_v36 }
0x1392   :  { %3303 = vmax.xlane.f32.xlu1 %v3302_v31 }
0x1396   :  { %3288 = vmax.xlane.f32.xlu1 %v3287_v28 }
0x13b0   :  { %s5855_s30 = spop %5854 }
0x13b1   :  { %v2827_v56 = vstv %s5855_s30 }
0x13b2   :  { %v2829_v33 = vmul.f32 %v2827_v56, %v6818_v6 }
0x13b4   :  { %v6983_v57 = vadd.f32 %v2829_v33, %v2820_v27 }
0x13b6   :  { %5671 = vmatpush3.msra.mxu1 %v6983_v57 }
0x13b7   :  { %v3091_v44 = vpop.xlane.xlu0 %3090  ;;  %5675 = vmatprep.subr.mxu1 %v6211_v0 }
0x13b8   :  { %v3092_v59 = vsub.f32 %v3077_v47, %v3091_v44 }
0x13ba   :  { %v3093_v16 = vmul.f32 1.442695, %v3092_v59 }
0x13bc   :  { %5959 = vpow2.f32 %v3093_v16 }
0x13c9   :  { %v5960_v8 = vpop.eup %5959 }
0x13ca   :  { %3096 = vrot.lane.b32.xlu1 %v5960_v8, %s6214_s22 }
0x1417   :  { %v3086_v60 = vpop.xlane.xlu1 %3085 }
0x1418   :  { %5961 = vrcp.f32 %v3086_v60 }
0x141b   :  { %v3304_v29 = vpop.xlane.xlu1 %3303 }
0x141c   :  { %v3305_v9 = vsub.f32 %v6972_v51, %v3304_v29 }
0x141e   :  { %v3306_v1 = vmul.f32 1.442695, %v3305_v9 }
0x141f   :  { %v3289_v6 = vpop.xlane.xlu1 %3288 }
0x1420   :  { %5963 = vpow2.f32 %v3306_v1  ;;  %v3290_v2 = vsub.f32 %v6976_v43, %v3289_v6  ;;  %v2849_v6 = vld [vmem:[%s7386_s11] sm:$0x1] }
0x1422   :  { %v3291_v3 = vmul.f32 1.442695, %v3290_v2 }
0x1424   :  { %5965 = vpow2.f32 %v3291_v3 }
0x1425   :  { %v5962_v4 = vpop.eup %5961 }
0x1426   :  { %v3088_v5 = vmul.f32 %v5962_v4, %v5958_v18  ;;  %v3317_v18 = vmax.f32 %v6976_v43, 0.0 }
0x1428   :  { %5673 = vmatmul.mubr.msk.f32.vlgmr.msra.gmra.mxu1 %vm586_vm6, %v3088_v5 }
0x1429   :  { %5676 = vmatpush3.msra.mxu1 %v6856_v54  ;;  %5683 = vmatprep.mubr.msk.f32.mxu1 %vm6212_vm0, %v6211_v0 }
0x142a   :  { %5677 = vmatprep.subr.mxu1 %v6211_v0 }
0x142b   :  { %5678 = vmatpush3.msra.mxu1 %v6861_v41 }
0x142c   :  { %5679 = vmatprep.subr.mxu1 %v6211_v0 }
0x142d   :  { %v5964_v7 = vpop.eup %5963  ;;  %5680 = vmatpush3.msra.mxu1 %v6863_v49 }
0x142e   :  { %3309 = vrot.lane.b32.xlu0 %v5964_v7, %s6215_s23  ;;  %5681 = vmatprep.subr.mxu1 %v6211_v0 }
0x142f   :  { %5682 = vmatpush3.msra.mxu1 %v6869_v55 }
0x1430   :  { %5702 = vmatprep.subr.mxu1 %v6211_v0 }
0x1431   :  { %v5966_v26 = vpop.eup %5965 }
0x1432   :  { %3294 = vrot.lane.b32.xlu1 %v5966_v26, %s6215_s23 }
0x143c   :  { %v3097_v27 = vpop.permute.xlu1 %3096 }
0x143d   :  { %v3099_v21 = vsel %vm580_vm7, %v3097_v27, 0.0 }
0x1456   :  { %3100 = vadd.xlane.f32.xlu1 %v3099_v21 }
0x14a0   :  { %v3310_v15 = vpop.permute.xlu0 %3309 }
0x14a1   :  { %v3312_v17 = vsel %vm557_vm3, %v3310_v15, 0.0 }
0x14a2   :  { %3313 = vadd.xlane.f32.xlu0 %v3312_v17 }
0x14a4   :  { %v3295_v19 = vpop.permute.xlu1 %3294 }
0x14a5   :  { %v3297_v22 = vsel %vm557_vm3, %v3295_v19, 0.0  ;;  %v3476_v19 = vld [vmem:[%s7385_s10] sm:$0x1] }
0x14a6   :  { %3298 = vadd.xlane.f32.xlu1 %v3297_v22 }
0x14df   :  { %v3101_v38 = vpop.xlane.xlu1 %3100 }
0x14e0   :  { %5967 = vrcp.f32 %v3101_v38 }
0x14e8   :  { %v3173_v47 = vpop.f32.mrf.mxu1 }
0x14e9   :  { %5684 = vmatmul.mubr.msk.f32.vlgmr.msra.gmra.mxu1 %vm159_vm1, %v3173_v47 }
0x14ea   :  { %v5674_v48 = vpop.f32.mrf.mxu1  ;;  %5703 = vmatpush3.msra.mxu1 %v6740_v35  ;;  %5710 = vmatprep.mubr.msk.f32.mxu1 %vm6212_vm0, %v6211_v0 }
0x14eb   :  { %5704 = vmatprep.subr.mxu1 %v6211_v0 }
0x14ec   :  { %5705 = vmatpush3.msra.mxu1 %v6744_v13 }
0x14ed   :  { %v5968_v58 = vpop.eup %5967  ;;  %5706 = vmatprep.subr.mxu1 %v6211_v0 }
0x14ee   :  { %v3103_v62 = vmul.f32 %v5968_v58, %v5960_v8  ;;  %5707 = vmatpush3.msra.mxu1 %v6748_v37 }
0x14ef   :  { %5708 = vmatprep.subr.mxu1 %v6211_v0 }
0x14f0   :  { %3325 = vperm.xlu1 %5888, %v3103_v62   ;;  %3330 = vperm.xlu0 %5889, %v3103_v62  }
0x14f1   :  { %5709 = vmatpush3.msra.mxu1 %v6753_v46 }
0x14f2   :  { %5724 = vmatprep.subr.mxu1 %v6211_v0 }
0x14f4   :  { %3258 = vrot.lane.b32.xlu1 %v6949_v34, %s6219_s25  ;;  %3263 = vrot.lane.b32.xlu0 %v6966_v50, %s6217_s24  ;;  %v3318_v50 = vmax.f32 %v6972_v51, 0.0 }
0x14f8   :  { %3269 = vrot.lane.b32.xlu1 %v6947_v25, %s6220_s7  ;;  %3274 = vrot.lane.b32.xlu0 %v6962_v24, %s6221_s26 }
0x152b   :  { %v3314_v35 = vpop.xlane.xlu0 %3313 }
0x152c   :  { %5969 = vrcp.f32 %v3314_v35 }
0x152f   :  { %v3299_v13 = vpop.xlane.xlu1 %3298 }
0x1530   :  { %5971 = vrcp.f32 %v3299_v13 }
0x1539   :  { %v5970_v37 = vpop.eup %5969 }
0x153a   :  { %v3316_v46 = vmul.f32 %v5970_v37, %v5964_v7 }
0x153c   :  { %v3320_v14 = vrot.slane %v3316_v46, 7  ;;  %v7089_v46 = vld [vmem:[#allocation3 + $0x5] sm:$0x1] }
0x153d   :  { %v5972_v12 = vpop.eup %5971 }
0x153e   :  { %v3301_v40 = vmul.f32 %v5972_v12, %v5966_v26  ;;  %v7093_v12 = vld [vmem:[#allocation2 + $0x5] sm:$0x1] }
0x1540   :  { %v3322_v34 = vsel %vm806_vm8, %v3301_v40, %v3320_v14 }
0x1541   :  { %3339 = vrot.lane.b32.xlu1 %v3322_v34, %s6215_s23 }
0x156b   :  { %v3326_v11 = vpop.permute.xlu1 %3325  ;;  %v3331_v25 = vpop.permute.xlu0 %3330 }
0x156c   :  { %v3333_v24 = vmul.f32 %v3331_v25, %v3318_v50  ;;  %v3328_v36 = vmul.f32 %v3326_v11, %v3317_v18 }
0x156e   :  { %v3335_v52 = vrot.slane %v3333_v24, 7 }
0x156f   :  { %v3259_v28 = vpop.permute.xlu1 %3258  ;;  %v3264_v56 = vpop.permute.xlu0 %3263 }
0x1570   :  { %v3337_v31 = vsel %vm806_vm8, %v3328_v36, %v3335_v52 }
0x1571   :  { %3375 = vrot.lane.b32.xlu0 %v3337_v31, %s6223_s28 }
0x1573   :  { %v3270_v33 = vpop.permute.xlu1 %3269  ;;  %v3275_v60 = vpop.permute.xlu0 %3274 }
0x1575   :  { %3251 = vrot.lane.b32.xlu0 %v6956_v20, %s6222_s27 }
0x15a9   :  { %v3246_v44 = vpop.f32.mrf.mxu1 }
0x15aa   :  { %v3261_v59 = vadd.f32 %v3259_v28, %v3246_v44  ;;  %v3272_v51 = vadd.f32 %v3270_v33, %v3246_v44 }
0x15ab   :  { %v5685_v16 = vpop.f32.mrf.mxu1 }
0x15ac   :  { %v3266_v8 = vadd.f32 %v3264_v56, %v3261_v59  ;;  %v3277_v29 = vadd.f32 %v3275_v60, %v3272_v51 }
0x15ae   :  { %v3267_v43 = vmax.f32 %v3266_v8, 0.0  ;;  %v3278_v9 = vmax.f32 %v3277_v29, 0.0 }
0x15b0   :  { %3481 = vrot.lane.b32.xlu1 %v3267_v43, %s6224_s29 }
0x15b3   :  { %v3340_v1 = vpop.permute.xlu1 %3339 }
0x15b4   :  { %3342 = vxpose.xlu0.b32.start.end [1/1] (short) (narrow) %v3340_v1, 8  ;;  %3556 = vrot.lane.b32.xlu1 %v3278_v9, %s6221_s26 }
0x15dd   :  { %3452 = vrot.lane.b32.xlu0 %v3103_v62, %s6214_s22 }
0x15e3   :  { %v3376_v20 = vpop.permute.xlu0 %3375 }
0x15e4   :  { %5687 = vmatpush3.msk.msra.mxu0 %vm866_vm10, %v3376_v20 }
0x15e5   :  { %5691 = vmatprep.subr.mxu0 %v6211_v0 }
0x15e7   :  { %v3252_v2 = vpop.permute.xlu0 %3251 }
0x15e8   :  { %v3254_v3 = vadd.f32 %v3252_v2, %v3246_v44 }
0x15ea   :  { %v3255_v4 = vadd.f32 %v3254_v3, %v2849_v6 }
0x15ec   :  { %v3256_v5 = vmax.f32 %v3255_v4, 0.0 }
0x15ee   :  { %3459 = vst.msk [vmem:[#allocation18 + $0x4] sm:$0x1] %vm946_vm9, %v3256_v5 }
0x1622   :  { %v3482_v7 = vpop.permute.xlu1 %3481 }
0x1626   :  { %v3557_v26 = vpop.permute.xlu1 %3556 }
0x1627   :  { %5711 = vmatmul.mubr.msk.f32.vlgmr.msra.gmra.mxu1 %vm159_vm1, %v3557_v26 }
0x1628   :  { %5726 = vmatprep.mubr.msk.f32.mxu1 %vm6212_vm0, %v6211_v0 }
0x1630   :  { %v3358_v27 = vpop.trf.xlu0 }
0x1631   :  { %5689 = vmatmul.mubr.msk.f32.vlgmr.msra.gmra.mxu0 %vm862_vm11, %v3358_v27 }
0x1632   :  { %5692 = vmatpush3.msra.mxu0 %v6774_v39  ;;  %5699 = vmatprep.mubr.msk.f32.mxu0 %vm6212_vm0, %v6211_v0 }
0x1633   :  { %5693 = vmatprep.subr.mxu0 %v6211_v0 }
0x1634   :  { %5694 = vmatpush3.msra.mxu0 %v6777_v61 }
0x1635   :  { %5695 = vmatprep.subr.mxu0 %v6211_v0 }
0x1636   :  { %5696 = vmatpush3.msra.mxu0 %v6783_v63 }
0x1637   :  { %5697 = vmatprep.subr.mxu0 %v6211_v0 }
0x1638   :  { %5698 = vmatpush3.msra.mxu0 %v6787_v10 }
0x1639   :  { %5700 = vmatmul.mubr.msk.f32.vlgmr.msra.gmra.mxu0 %vm159_vm1, %v3482_v7  ;;  %5713 = vmatprep.subr.mxu0 %v6211_v0 }
0x163a   :  { %5714 = vmatpush3.msra.mxu0 %v6791_v32  ;;  %5721 = vmatprep.mubr.msk.f32.mxu0 %vm6212_vm0, %v6211_v0 }
0x163b   :  { %5715 = vmatprep.subr.mxu0 %v6211_v0 }
0x163c   :  { %5716 = vmatpush3.msra.mxu0 %v6796_v23 }
0x163d   :  { %5717 = vmatprep.subr.mxu0 %v6211_v0 }
0x163e   :  { %5718 = vmatpush3.msra.mxu0 %v6802_v45 }
0x163f   :  { %5719 = vmatprep.subr.mxu0 %v6211_v0 }
0x1640   :  { %5720 = vmatpush3.msra.mxu0 %v6806_v53 }
0x1641   :  { %5722 = vmatmul.mubr.msk.f32.vlgmr.msra.gmra.mxu0 %vm159_vm1, %v3256_v5  ;;  %5740 = vmatprep.subr.mxu0 %v6211_v0 }
0x1642   :  { %5742 = vmatprep.mubr.msk.f32.mxu0 %vm6212_vm0, %v6211_v0 }
0x164f   :  { %v3453_v39 = vpop.permute.xlu0 %3452 }
0x1650   :  { %5856 = vpush %v3453_v39 }
0x1681   :  { %s5857_s2 = spop %5856 }
0x1682   :  { %v3455_v10 = vstv %s5857_s2 }
0x1683   :  { %v3457_v32 = vmul.f32 %v3455_v10, %v6983_v57 }
0x16e7   :  { %v7070_v61 = vpop.f32.mrf.mxu1 }
0x16e9   :  { %v5712_v63 = vpop.f32.mrf.mxu1 }
0x16f1   :  { %v3448_v23 = vpop.f32.mrf.mxu0 }
0x16f2   :  { %v7073_v45 = vadd.f32 %v3457_v32, %v3448_v23 }
0x16f3   :  { %v5690_v53 = vpop.f32.mrf.mxu0 }
0x16f4   :  { %5725 = vmatpush3.msra.mxu1 %v7073_v45 }
0x16f5   :  { %5729 = vmatprep.subr.mxu1 %v6211_v0 }
0x16f9   :  { %v7077_v21 = vpop.f32.mrf.mxu0 }
0x16fa   :  { %v3703_v17 = vadd.f32 %v7070_v61, %v7077_v21 }
0x16fb   :  { %v5701_v15 = vpop.f32.mrf.mxu0 }
0x16fc   :  { %v7153_v15 = vld [vmem:[#allocation13 + $0x8] sm:$0xff] }
0x1701   :  { %v7084_v22 = vpop.f32.mrf.mxu0 }
0x1702   :  { %v3704_v57 = vadd.f32 %v3703_v17, %v7084_v22 }
0x1703   :  { %v5723_v38 = vpop.f32.mrf.mxu0 }
0x1704   :  { %v3705_v47 = vadd.f32 %v3704_v57, %v3476_v19  ;;  %v7158_v38 = vld [vmem:[#allocation13] sm:$0xff] }
0x1706   :  { %v3706_v48 = vsel %vm557_vm3, %v3705_v47, -inf  ;;  %v3717_v40 = vsel %vm569_vm5, %v3705_v47, -inf }
0x1707   :  { %3707 = vmax.xlane.f32.xlu1 %v3706_v48 }
0x1790   :  { %v3708_v58 = vpop.xlane.xlu1 %3707 }
0x1791   :  { %v3709_v62 = vsub.f32 %v3705_v47, %v3708_v58 }
0x1793   :  { %v3710_v35 = vmul.f32 1.442695, %v3709_v62 }
0x1795   :  { %5973 = vpow2.f32 %v3710_v35 }
0x17a2   :  { %v5974_v13 = vpop.eup %5973 }
0x17a3   :  { %v3712_v37 = vsel %vm557_vm3, %v5974_v13, 0.0 }
0x17a4   :  { %3713 = vadd.xlane.f32.xlu1 %v3712_v37 }
0x17b5   :  { %3911 = vrot.lane.b32.xlu1 %v7089_v46, %s6213_s3 }
0x17b9   :  { %3907 = vrot.lane.b32.xlu1 %v7093_v12, %s6213_s3 }
0x17dd   :  { %3718 = vmax.xlane.f32.xlu1 %v3717_v40 }
0x182d   :  { %v3714_v14 = vpop.xlane.xlu1 %3713 }
0x182e   :  { %5975 = vrcp.f32 %v3714_v14 }
0x1831   :  { %v3912_v34 = vpop.permute.xlu1 %3911 }
0x1832   :  { %v7099_v50 = vadd.f32 %v3912_v34, %v7070_v61 }
0x1834   :  { %v3930_v11 = vsel %vm770_vm4, %v7099_v50, -inf  ;;  %v3946_v17 = vmax.f32 %v7099_v50, 0.0 }
0x1835   :  { %3931 = vmax.xlane.f32.xlu0 %v3930_v11  ;;  %v3908_v25 = vpop.permute.xlu1 %3907 }
0x1836   :  { %v7104_v18 = vadd.f32 %v3908_v25, %v7077_v21 }
0x1838   :  { %v3915_v24 = vsel %vm770_vm4, %v7104_v18, -inf  ;;  %v3945_v48 = vmax.f32 %v7104_v18, 0.0 }
0x1839   :  { %3916 = vmax.xlane.f32.xlu1 %v3915_v24 }
0x183b   :  { %v5976_v36 = vpop.eup %5975 }
0x183c   :  { %v3716_v52 = vmul.f32 %v5976_v36, %v5974_v13  ;;  %v3477_v36 = vld [vmem:[%s7386_s11] sm:$0x1] }
0x183e   :  { %5727 = vmatmul.mubr.msk.f32.vlgmr.msra.gmra.mxu1 %vm586_vm6, %v3716_v52 }
0x183f   :  { %5730 = vmatpush3.msra.mxu1 %v6856_v54  ;;  %5737 = vmatprep.mubr.msk.f32.mxu1 %vm6212_vm0, %v6211_v0 }
0x1840   :  { %5731 = vmatprep.subr.mxu1 %v6211_v0 }
0x1841   :  { %5732 = vmatpush3.msra.mxu1 %v6861_v41 }
0x1842   :  { %5733 = vmatprep.subr.mxu1 %v6211_v0 }
0x1843   :  { %5734 = vmatpush3.msra.mxu1 %v6863_v49 }
0x1844   :  { %5735 = vmatprep.subr.mxu1 %v6211_v0 }
0x1845   :  { %5736 = vmatpush3.msra.mxu1 %v6869_v55 }
0x1846   :  { %5756 = vmatprep.subr.mxu1 %v6211_v0 }
0x1866   :  { %v3719_v31 = vpop.xlane.xlu1 %3718 }
0x1867   :  { %v3720_v28 = vsub.f32 %v3705_v47, %v3719_v31 }
0x1869   :  { %v3721_v54 = vmul.f32 1.442695, %v3720_v28 }
0x186b   :  { %5977 = vpow2.f32 %v3721_v54 }
0x1878   :  { %v5978_v56 = vpop.eup %5977 }
0x1879   :  { %3724 = vrot.lane.b32.xlu0 %v5978_v56, %s6214_s22 }
0x18be   :  { %v3932_v33 = vpop.xlane.xlu0 %3931 }
0x18bf   :  { %v3933_v41 = vsub.f32 %v7099_v50, %v3932_v33  ;;  %v7181_v33 = vld [vmem:[#allocation12 + $0x18] sm:$0xff] }
0x18c1   :  { %v3934_v44 = vmul.f32 1.442695, %v3933_v41 }
0x18c2   :  { %v3917_v59 = vpop.xlane.xlu1 %3916 }
0x18c3   :  { %5979 = vpow2.f32 %v3934_v44  ;;  %v3918_v49 = vsub.f32 %v7104_v18, %v3917_v59  ;;  %v7184_v44 = vld [vmem:[#allocation12 + $0x10] sm:$0xff]  ;;  %v7194_v59 = vld [vmem:[#allocation12] sm:$0xff] }
0x18c5   :  { %v3919_v51 = vmul.f32 1.442695, %v3918_v49  ;;  %v7198_v49 = vld [vmem:[#allocation15 + $0x18] sm:$0xff] }
0x18c7   :  { %5981 = vpow2.f32 %v3919_v51  ;;  %v7203_v51 = vld [vmem:[#allocation15 + $0x10] sm:$0xff] }
0x18d0   :  { %v5980_v55 = vpop.eup %5979 }
0x18d1   :  { %3937 = vrot.lane.b32.xlu1 %v5980_v55, %s6215_s23 }
0x18d4   :  { %v5982_v16 = vpop.eup %5981 }
0x18d5   :  { %3922 = vrot.lane.b32.xlu1 %v5982_v16, %s6215_s23 }
0x18eb   :  { %v3725_v8 = vpop.permute.xlu0 %3724 }
0x18ec   :  { %v3727_v60 = vsel %vm580_vm7, %v3725_v8, 0.0 }
0x18ed   :  { %3728 = vadd.xlane.f32.xlu0 %v3727_v60 }
0x18fe   :  { %v3801_v43 = vpop.f32.mrf.mxu1 }
0x18ff   :  { %5738 = vmatmul.mubr.msk.f32.vlgmr.msra.gmra.mxu1 %vm159_vm1, %v3801_v43 }
0x1900   :  { %v5728_v29 = vpop.f32.mrf.mxu1  ;;  %5764 = vmatprep.mubr.msk.f32.mxu1 %vm6212_vm0, %v6211_v0 }
0x1943   :  { %v3938_v9 = vpop.permute.xlu1 %3937 }
0x1944   :  { %v3940_v1 = vsel %vm557_vm3, %v3938_v9, 0.0 }
0x1945   :  { %3941 = vadd.xlane.f32.xlu1 %v3940_v1 }
0x1947   :  { %v3923_v20 = vpop.permute.xlu1 %3922 }
0x1948   :  { %v3925_v6 = vsel %vm557_vm3, %v3923_v20, 0.0 }
0x1949   :  { %3926 = vadd.xlane.f32.xlu0 %v3925_v6 }
0x1976   :  { %v3729_v2 = vpop.xlane.xlu0 %3728 }
0x1977   :  { %5983 = vrcp.f32 %v3729_v2 }
0x1984   :  { %v5984_v3 = vpop.eup %5983 }
0x1985   :  { %v7130_v4 = vmul.f32 %v5984_v3, %v5978_v56 }
0x1987   :  { %3953 = vperm.xlu1 %5888, %v7130_v4   ;;  %3958 = vperm.xlu0 %5889, %v7130_v4  }
0x198b   :  { %3886 = vrot.lane.b32.xlu1 %v7077_v21, %s6219_s25  ;;  %3891 = vrot.lane.b32.xlu0 %v7093_v12, %s6217_s24  ;;  %v7145_v21 = vld [vmem:[#allocation13 + $0x18] sm:$0xff] }
0x198c   :  { %5890 = vset.pattern.permute.xlu1 %v6216_v30  ;;  %5757 = vmatpush3.msra.mxu1 %v7145_v21 }
0x198d   :  { %5758 = vmatprep.subr.mxu1 %v6211_v0 }
0x198f   :  { %3897 = vrot.lane.b32.xlu1 %v7070_v61, %s6220_s7  ;;  %3902 = vrot.lane.b32.xlu0 %v7089_v46, %s6221_s26  ;;  %v7149_v61 = vld [vmem:[#allocation13 + $0x10] sm:$0xff] }
0x1990   :  { %5759 = vmatpush3.msra.mxu1 %v7149_v61 }
0x1991   :  { %5760 = vmatprep.subr.mxu1 %v6211_v0 }
0x1992   :  { %5761 = vmatpush3.msra.mxu1 %v7153_v15 }
0x1993   :  { %5762 = vmatprep.subr.mxu1 %v6211_v0 }
0x1994   :  { %5763 = vmatpush3.msra.mxu1 %v7158_v38 }
0x1995   :  { %5778 = vmatprep.subr.mxu1 %v6211_v0 }
0x19bf   :  { %v3874_v5 = vpop.f32.mrf.mxu1 }
0x19c1   :  { %v5739_v7 = vpop.f32.mrf.mxu1 }
0x19ce   :  { %v3942_v26 = vpop.xlane.xlu1 %3941 }
0x19cf   :  { %5985 = vrcp.f32 %v3942_v26 }
0x19d2   :  { %v3927_v27 = vpop.xlane.xlu0 %3926 }
0x19d3   :  { %5987 = vrcp.f32 %v3927_v27 }
0x19dc   :  { %v5986_v39 = vpop.eup %5985 }
0x19dd   :  { %v3944_v63 = vmul.f32 %v5986_v39, %v5980_v55  ;;  %v7209_v55 = vld [vmem:[#allocation15 + $0x8] sm:$0xff] }
0x19df   :  { %v3948_v23 = vrot.slane %v3944_v63, 7 }
0x19e0   :  { %v5988_v10 = vpop.eup %5987 }
0x19e1   :  { %v3929_v32 = vmul.f32 %v5988_v10, %v5982_v16  ;;  %v7213_v16 = vld [vmem:[#allocation15] sm:$0xff] }
0x19e3   :  { %v3950_v53 = vsel %vm806_vm8, %v3929_v32, %v3948_v23 }
0x19e4   :  { %3967 = vrot.lane.b32.xlu1 %v3950_v53, %s6215_s23 }
0x1a02   :  { %v3959_v19 = vpop.permute.xlu0 %3958  ;;  %v3954_v57 = vpop.permute.xlu1 %3953 }
0x1a03   :  { %v3961_v47 = vmul.f32 %v3959_v19, %v3946_v17  ;;  %v3956_v62 = vmul.f32 %v3954_v57, %v3945_v48  ;;  %v7241_v17 = vld [vmem:[#allocation3 + $0x6] sm:$0x1]  ;;  %v7245_v19 = vld [vmem:[#allocation2 + $0x6] sm:$0x1] }
0x1a05   :  { %v3963_v58 = vrot.slane %v3961_v47, 7 }
0x1a06   :  { %v3892_v35 = vpop.permute.xlu0 %3891  ;;  %v3887_v13 = vpop.permute.xlu1 %3886 }
0x1a07   :  { %v3889_v37 = vadd.f32 %v3887_v13, %v3874_v5  ;;  %v3965_v46 = vsel %vm806_vm8, %v3956_v62, %v3963_v58 }
0x1a08   :  { %4003 = vrot.lane.b32.xlu0 %v3965_v46, %s6223_s28 }
0x1a09   :  { %v3894_v12 = vadd.f32 %v3892_v35, %v3889_v37 }
0x1a0a   :  { %v3898_v40 = vpop.permute.xlu1 %3897  ;;  %v3903_v50 = vpop.permute.xlu0 %3902 }
0x1a0b   :  { %v3895_v14 = vmax.f32 %v3894_v12, 0.0  ;;  %v3900_v34 = vadd.f32 %v3898_v40, %v3874_v5 }
0x1a0c   :  { %3879 = vrot.lane.b32.xlu0 %v7084_v22, %s6222_s27 }
0x1a0d   :  { %v3905_v11 = vadd.f32 %v3903_v50, %v3900_v34  ;;  %4109 = vrot.lane.b32.xlu1 %v3895_v14, %s6224_s29  ;;  %v7263_v50 = vld [vmem:[#allocation16 + $0x18] sm:$0xff] }
0x1a0f   :  { %v3906_v25 = vmax.f32 %v3905_v11, 0.0 }
0x1a11   :  { %4184 = vrot.lane.b32.xlu1 %v3906_v25, %s6221_s26  ;;  %v7268_v25 = vld [vmem:[#allocation16 + $0x10] sm:$0xff] }
0x1a56   :  { %v3968_v18 = vpop.permute.xlu1 %3967 }
0x1a57   :  { %3970 = vxpose.xlu0.b32.start.end [1/1] (short) (narrow) %v3968_v18, 8  ;;  %v7270_v18 = vld [vmem:[#allocation16 + $0x8] sm:$0xff] }
0x1a7a   :  { %v4004_v24 = vpop.permute.xlu0 %4003 }
0x1a7b   :  { %5741 = vmatpush3.msk.msra.mxu0 %vm866_vm10, %v4004_v24  ;;  %v7276_v24 = vld [vmem:[#allocation16] sm:$0xff] }
0x1a7c   :  { %5745 = vmatprep.subr.mxu0 %v6211_v0 }
0x1a7e   :  { %v3880_v52 = vpop.permute.xlu0 %3879 }
0x1a7f   :  { %v3882_v31 = vadd.f32 %v3880_v52, %v3874_v5  ;;  %v4110_v22 = vpop.permute.xlu1 %4109  ;;  %v4104_v5 = vld [vmem:[%s7385_s10] sm:$0x1] }
0x1a80   :  { %4080 = vrot.lane.b32.xlu0 %v7130_v4, %s6214_s22 }
0x1a81   :  { %v3883_v28 = vadd.f32 %v3882_v31, %v3477_v36  ;;  %5891 = vset.pattern.permute.xlu0 %v6218_v42  ;;  %v7190_v42 = vld [vmem:[#allocation12 + $0x8] sm:$0xff] }
0x1a83   :  { %v3884_v54 = vmax.f32 %v3883_v28, 0.0  ;;  %v4185_v56 = vpop.permute.xlu1 %4184 }
0x1a84   :  { %5765 = vmatmul.mubr.msk.f32.vlgmr.msra.gmra.mxu1 %vm159_vm1, %v4185_v56 }
0x1a85   :  { %4087 = vst.msk [vmem:[#allocation18 + $0x5] sm:$0x1] %vm946_vm9, %v3884_v54  ;;  %5780 = vmatprep.mubr.msk.f32.mxu1 %vm6212_vm0, %v6211_v0 }
0x1ad3   :  { %v3986_v41 = vpop.trf.xlu0 }
0x1ad4   :  { %5743 = vmatmul.mubr.msk.f32.vlgmr.msra.gmra.mxu0 %vm862_vm11, %v3986_v41 }
0x1ad5   :  { %5746 = vmatpush3.msra.mxu0 %v7181_v33  ;;  %5753 = vmatprep.mubr.msk.f32.mxu0 %vm6212_vm0, %v6211_v0 }
0x1ad6   :  { %5747 = vmatprep.subr.mxu0 %v6211_v0 }
0x1ad7   :  { %5748 = vmatpush3.msra.mxu0 %v7184_v44 }
0x1ad8   :  { %5749 = vmatprep.subr.mxu0 %v6211_v0 }
0x1ad9   :  { %5750 = vmatpush3.msra.mxu0 %v7190_v42 }
0x1ada   :  { %5751 = vmatprep.subr.mxu0 %v6211_v0 }
0x1adb   :  { %5752 = vmatpush3.msra.mxu0 %v7194_v59 }
0x1adc   :  { %5754 = vmatmul.mubr.msk.f32.vlgmr.msra.gmra.mxu0 %vm159_vm1, %v4110_v22  ;;  %5767 = vmatprep.subr.mxu0 %v6211_v0 }
0x1add   :  { %5768 = vmatpush3.msra.mxu0 %v7198_v49  ;;  %5775 = vmatprep.mubr.msk.f32.mxu0 %vm6212_vm0, %v6211_v0 }
0x1ade   :  { %5769 = vmatprep.subr.mxu0 %v6211_v0 }
0x1adf   :  { %5770 = vmatpush3.msra.mxu0 %v7203_v51 }
0x1ae0   :  { %5771 = vmatprep.subr.mxu0 %v6211_v0 }
0x1ae1   :  { %5772 = vmatpush3.msra.mxu0 %v7209_v55 }
0x1ae2   :  { %5773 = vmatprep.subr.mxu0 %v6211_v0 }
0x1ae3   :  { %5774 = vmatpush3.msra.mxu0 %v7213_v16 }
0x1ae4   :  { %5776 = vmatmul.mubr.msk.f32.vlgmr.msra.gmra.mxu0 %vm159_vm1, %v3884_v54  ;;  %5794 = vmatprep.subr.mxu0 %v6211_v0 }
0x1ae5   :  { %5796 = vmatprep.mubr.msk.f32.mxu0 %vm6212_vm0, %v6211_v0 }
0x1af2   :  { %v4081_v8 = vpop.permute.xlu0 %4080 }
0x1af3   :  { %5858 = vpush %v4081_v8 }
0x1b24   :  { %s5859_s20 = spop %5858 }
0x1b25   :  { %v4083_v29 = vstv %s5859_s20 }
0x1b26   :  { %v4085_v9 = vmul.f32 %v4083_v29, %v7073_v45 }
0x1b44   :  { %v7222_v60 = vpop.f32.mrf.mxu1 }
0x1b46   :  { %v5766_v43 = vpop.f32.mrf.mxu1 }
0x1b94   :  { %v4076_v1 = vpop.f32.mrf.mxu0 }
0x1b95   :  { %v7225_v20 = vadd.f32 %v4085_v9, %v4076_v1 }
0x1b96   :  { %v5744_v6 = vpop.f32.mrf.mxu0 }
0x1b97   :  { %5779 = vmatpush3.msra.mxu1 %v7225_v20 }
0x1b98   :  { %5783 = vmatprep.subr.mxu1 %v6211_v0 }
0x1b9c   :  { %v7229_v2 = vpop.f32.mrf.mxu0 }
0x1b9d   :  { %v4331_v4 = vadd.f32 %v7222_v60, %v7229_v2 }
0x1b9e   :  { %v5755_v3 = vpop.f32.mrf.mxu0 }
0x1ba4   :  { %v7236_v7 = vpop.f32.mrf.mxu0 }
0x1ba5   :  { %v4332_v45 = vadd.f32 %v4331_v4, %v7236_v7 }
0x1ba6   :  { %v5777_v26 = vpop.f32.mrf.mxu0 }
0x1ba7   :  { %v4333_v27 = vadd.f32 %v4332_v45, %v4104_v5 }
0x1ba9   :  { %v4334_v39 = vsel %vm557_vm3, %v4333_v27, -inf  ;;  %v4345_v57 = vsel %vm569_vm5, %v4333_v27, -inf }
0x1baa   :  { %4335 = vmax.xlane.f32.xlu1 %v4334_v39 }
0x1c33   :  { %v4336_v63 = vpop.xlane.xlu1 %4335 }
0x1c34   :  { %v4337_v10 = vsub.f32 %v4333_v27, %v4336_v63 }
0x1c36   :  { %v4338_v32 = vmul.f32 1.442695, %v4337_v10 }
0x1c38   :  { %5989 = vpow2.f32 %v4338_v32 }
0x1c45   :  { %v5990_v23 = vpop.eup %5989 }
0x1c46   :  { %v4340_v53 = vsel %vm557_vm3, %v5990_v23, 0.0 }
0x1c47   :  { %4341 = vadd.xlane.f32.xlu1 %v4340_v53 }
0x1c58   :  { %4539 = vrot.lane.b32.xlu1 %v7241_v17, %s6213_s3 }
0x1c5c   :  { %4535 = vrot.lane.b32.xlu1 %v7245_v19, %s6213_s3 }
0x1c80   :  { %4346 = vmax.xlane.f32.xlu1 %v4345_v57 }
0x1cd0   :  { %v4342_v47 = vpop.xlane.xlu1 %4341 }
0x1cd1   :  { %5991 = vrcp.f32 %v4342_v47  ;;  %v4105_v47 = vld [vmem:[%s7386_s11] sm:$0x1] }
0x1cd4   :  { %v4540_v48 = vpop.permute.xlu1 %4539 }
0x1cd5   :  { %v7251_v58 = vadd.f32 %v4540_v48, %v7222_v60 }
0x1cd7   :  { %v4558_v62 = vsel %vm770_vm4, %v7251_v58, -inf }
0x1cd8   :  { %4559 = vmax.xlane.f32.xlu0 %v4558_v62  ;;  %v4536_v35 = vpop.permute.xlu1 %4535 }
0x1cd9   :  { %v7256_v13 = vadd.f32 %v4536_v35, %v7229_v2 }
0x1cdb   :  { %v4543_v37 = vsel %vm770_vm4, %v7256_v13, -inf  ;;  %v4573_v53 = vmax.f32 %v7256_v13, 0.0 }
0x1cdc   :  { %4544 = vmax.xlane.f32.xlu1 %v4543_v37 }
0x1cde   :  { %v5992_v46 = vpop.eup %5991 }
0x1cdf   :  { %v4344_v12 = vmul.f32 %v5992_v46, %v5990_v23 }
0x1ce1   :  { %5781 = vmatmul.mubr.msk.f32.vlgmr.msra.gmra.mxu1 %vm586_vm6, %v4344_v12 }
0x1ce2   :  { %5791 = vmatprep.mubr.msk.f32.mxu1 %vm6212_vm0, %v6211_v0  ;;  %5784 = vmatpush3.msra.mxu1 %v7263_v50 }
0x1ce3   :  { %5785 = vmatprep.subr.mxu1 %v6211_v0 }
0x1ce4   :  { %5786 = vmatpush3.msra.mxu1 %v7268_v25 }
0x1ce5   :  { %5787 = vmatprep.subr.mxu1 %v6211_v0 }
0x1ce6   :  { %5788 = vmatpush3.msra.mxu1 %v7270_v18 }
0x1ce7   :  { %5789 = vmatprep.subr.mxu1 %v6211_v0 }
0x1ce8   :  { %5790 = vmatpush3.msra.mxu1 %v7276_v24 }
0x1ce9   :  { %5810 = vmatprep.subr.mxu1 %v6211_v0 }
0x1d09   :  { %v4347_v40 = vpop.xlane.xlu1 %4346 }
0x1d0a   :  { %v4348_v14 = vsub.f32 %v4333_v27, %v4347_v40 }
0x1d0c   :  { %v4349_v34 = vmul.f32 1.442695, %v4348_v14 }
0x1d0e   :  { %5993 = vpow2.f32 %v4349_v34 }
0x1d1b   :  { %v5994_v11 = vpop.eup %5993 }
0x1d1c   :  { %4352 = vrot.lane.b32.xlu1 %v5994_v11, %s6214_s22 }
0x1d61   :  { %v4560_v36 = vpop.xlane.xlu0 %4559 }
0x1d62   :  { %v4561_v52 = vsub.f32 %v7251_v58, %v4560_v36 }
0x1d64   :  { %v4562_v31 = vmul.f32 1.442695, %v4561_v52 }
0x1d65   :  { %v4545_v22 = vpop.xlane.xlu1 %4544 }
0x1d66   :  { %5995 = vpow2.f32 %v4562_v31  ;;  %v4546_v28 = vsub.f32 %v7256_v13, %v4545_v22 }
0x1d68   :  { %v4547_v54 = vmul.f32 1.442695, %v4546_v28 }
0x1d6a   :  { %5997 = vpow2.f32 %v4547_v54 }
0x1d73   :  { %v5996_v56 = vpop.eup %5995 }
0x1d74   :  { %4565 = vrot.lane.b32.xlu0 %v5996_v56, %s6215_s23 }
0x1d77   :  { %v5998_v41 = vpop.eup %5997 }
0x1d78   :  { %4550 = vrot.lane.b32.xlu1 %v5998_v41, %s6215_s23 }
0x1d8e   :  { %v4353_v8 = vpop.permute.xlu1 %4352 }
0x1d8f   :  { %v4355_v43 = vsel %vm580_vm7, %v4353_v8, 0.0 }
0x1d9c   :  { %4356 = vadd.xlane.f32.xlu1 %v4355_v43 }
0x1da1   :  { %v4429_v29 = vpop.f32.mrf.mxu1 }
0x1da2   :  { %5792 = vmatmul.mubr.msk.f32.vlgmr.msra.gmra.mxu1 %vm159_vm1, %v4429_v29 }
0x1da3   :  { %v5782_v9 = vpop.f32.mrf.mxu1  ;;  %5811 = vmatpush3.msra.mxu1 %v7145_v21  ;;  %5818 = vmatprep.mubr.msk.f32.mxu1 %vm6212_vm0, %v6211_v0 }
0x1da4   :  { %5812 = vmatprep.subr.mxu1 %v6211_v0  ;;  %v4732_v9 = vld [vmem:[%s7385_s10] sm:$0x1] }
0x1da5   :  { %5813 = vmatpush3.msra.mxu1 %v7149_v61 }
0x1da6   :  { %5814 = vmatprep.subr.mxu1 %v6211_v0 }
0x1da7   :  { %5815 = vmatpush3.msra.mxu1 %v7153_v15 }
0x1da8   :  { %5816 = vmatprep.subr.mxu1 %v6211_v0 }
0x1da9   :  { %5817 = vmatpush3.msra.mxu1 %v7158_v38 }
0x1daa   :  { %5832 = vmatprep.subr.mxu1 %v6211_v0 }
0x1de6   :  { %v4566_v1 = vpop.permute.xlu0 %4565 }
0x1de7   :  { %v4568_v21 = vsel %vm557_vm3, %v4566_v1, 0.0 }
0x1de8   :  { %4569 = vadd.xlane.f32.xlu0 %v4568_v21 }
0x1dea   :  { %v4551_v6 = vpop.permute.xlu1 %4550 }
0x1deb   :  { %v4553_v3 = vsel %vm557_vm3, %v4551_v6, 0.0 }
0x1dec   :  { %4554 = vadd.xlane.f32.xlu0 %v4553_v3 }
0x1e25   :  { %v4357_v4 = vpop.xlane.xlu1 %4356 }
0x1e26   :  { %5999 = vrcp.f32 %v4357_v4 }
0x1e33   :  { %v6000_v61 = vpop.eup %5999 }
0x1e34   :  { %v4359_v5 = vmul.f32 %v6000_v61, %v5994_v11 }
0x1e36   :  { %4581 = vperm.xlu0 %5891, %v4359_v5   ;;  %4586 = vperm.xlu1 %5890, %v4359_v5  }
0x1e3a   :  { %4507 = vrot.lane.b32.xlu0 %v7236_v7, %s6222_s27  ;;  %4514 = vrot.lane.b32.xlu1 %v7229_v2, %s6219_s25 }
0x1e3e   :  { %4519 = vrot.lane.b32.xlu1 %v7245_v19, %s6217_s24 }
0x1e42   :  { %4525 = vrot.lane.b32.xlu1 %v7222_v60, %s6220_s7  ;;  %v4574_v60 = vmax.f32 %v7251_v58, 0.0 }
0x1e46   :  { %4530 = vrot.lane.b32.xlu1 %v7241_v17, %s6221_s26 }
0x1e62   :  { %v4502_v15 = vpop.f32.mrf.mxu1 }
0x1e64   :  { %v5793_v38 = vpop.f32.mrf.mxu1 }
0x1e71   :  { %v4570_v45 = vpop.xlane.xlu0 %4569 }
0x1e72   :  { %6001 = vrcp.f32 %v4570_v45 }
0x1e75   :  { %v4555_v26 = vpop.xlane.xlu0 %4554 }
0x1e76   :  { %6003 = vrcp.f32 %v4555_v26 }
0x1e7f   :  { %v6002_v27 = vpop.eup %6001 }
0x1e80   :  { %v4572_v7 = vmul.f32 %v6002_v27, %v5996_v56 }
0x1e82   :  { %v4576_v2 = vrot.slane %v4572_v7, 7 }
0x1e83   :  { %v6004_v39 = vpop.eup %6003 }
0x1e84   :  { %v4557_v63 = vmul.f32 %v6004_v39, %v5998_v41  ;;  %v4733_v39 = vld [vmem:[%s7386_s11] sm:$0x1] }
0x1e86   :  { %v4578_v10 = vsel %vm806_vm8, %v4557_v63, %v4576_v2 }
0x1e87   :  { %4595 = vrot.lane.b32.xlu1 %v4578_v10, %s6215_s23 }
0x1eb1   :  { %v4582_v32 = vpop.permute.xlu0 %4581  ;;  %v4587_v23 = vpop.permute.xlu1 %4586 }
0x1eb2   :  { %v4589_v17 = vmul.f32 %v4587_v23, %v4574_v60  ;;  %v4584_v19 = vmul.f32 %v4582_v32, %v4573_v53 }
0x1eb4   :  { %v4591_v57 = vrot.slane %v4589_v17, 7 }
0x1eb5   :  { %v4508_v48 = vpop.permute.xlu0 %4507  ;;  %v4515_v62 = vpop.permute.xlu1 %4514 }
0x1eb6   :  { %v4510_v35 = vadd.f32 %v4508_v48, %v4502_v15  ;;  %v4593_v37 = vsel %vm806_vm8, %v4584_v19, %v4591_v57  ;;  %v4517_v58 = vadd.f32 %v4515_v62, %v4502_v15 }
0x1eb7   :  { %4631 = vrot.lane.b32.xlu1 %v4593_v37, %s6223_s28 }
0x1eb8   :  { %v4511_v46 = vadd.f32 %v4510_v35, %v4105_v47 }
0x1eb9   :  { %v4520_v12 = vpop.permute.xlu1 %4519 }
0x1eba   :  { %v4512_v40 = vmax.f32 %v4511_v46, 0.0  ;;  %v4522_v14 = vadd.f32 %v4520_v12, %v4517_v58 }
0x1ebc   :  { %4715 = vst.msk [vmem:[#allocation18 + $0x6] sm:$0x1] %vm946_vm9, %v4512_v40  ;;  %v4523_v13 = vmax.f32 %v4522_v14, 0.0 }
0x1ebd   :  { %v4526_v34 = vpop.permute.xlu1 %4525 }
0x1ebe   :  { %4735 = vrot.lane.b32.xlu1 %v4523_v13, %s6224_s29  ;;  %v4528_v11 = vadd.f32 %v4526_v34, %v4502_v15 }
0x1ec1   :  { %v4531_v36 = vpop.permute.xlu1 %4530 }
0x1ec2   :  { %v4533_v52 = vadd.f32 %v4531_v36, %v4528_v11 }
0x1ec4   :  { %v4534_v31 = vmax.f32 %v4533_v52, 0.0 }
0x1ec6   :  { %4810 = vrot.lane.b32.xlu1 %v4534_v31, %s6221_s26  ;;  %s6225_s26 = smov [#allocation18]  }
0x1ef9   :  { %v4596_v22 = vpop.permute.xlu1 %4595 }
0x1efa   :  { %4598 = vxpose.xlu0.b32.start.end [1/1] (short) (narrow) %v4596_v22, 8 }
0x1f23   :  { %4708 = vrot.lane.b32.xlu0 %v4359_v5, %s6214_s22 }
0x1f24   :  { %5892 = vset.pattern.permute.xlu0 %v6216_v30 }
0x1f29   :  { %v4632_v28 = vpop.permute.xlu1 %4631 }
0x1f2a   :  { %5795 = vmatpush3.msk.msra.mxu0 %vm866_vm10, %v4632_v28 }
0x1f2b   :  { %5799 = vmatprep.subr.mxu0 %v6211_v0 }
0x1f30   :  { %v4736_v54 = vpop.permute.xlu1 %4735 }
0x1f38   :  { %v4811_v56 = vpop.permute.xlu1 %4810 }
0x1f39   :  { %5819 = vmatmul.mubr.msk.f32.vlgmr.msra.gmra.mxu1 %vm159_vm1, %v4811_v56 }
0x1f3a   :  { %5834 = vmatprep.mubr.msk.f32.mxu1 %vm6212_vm0, %v6211_v0 }
0x1f76   :  { %v4614_v41 = vpop.trf.xlu0 }
0x1f77   :  { %5797 = vmatmul.mubr.msk.f32.vlgmr.msra.gmra.mxu0 %vm862_vm11, %v4614_v41 }
0x1f78   :  { %5800 = vmatpush3.msra.mxu0 %v7181_v33  ;;  %5807 = vmatprep.mubr.msk.f32.mxu0 %vm6212_vm0, %v6211_v0 }
0x1f79   :  { %5801 = vmatprep.subr.mxu0 %v6211_v0 }
0x1f7a   :  { %5802 = vmatpush3.msra.mxu0 %v7184_v44 }
0x1f7b   :  { %5803 = vmatprep.subr.mxu0 %v6211_v0 }
0x1f7c   :  { %5804 = vmatpush3.msra.mxu0 %v7190_v42 }
0x1f7d   :  { %5805 = vmatprep.subr.mxu0 %v6211_v0 }
0x1f7e   :  { %5806 = vmatpush3.msra.mxu0 %v7194_v59 }
0x1f7f   :  { %5808 = vmatmul.mubr.msk.f32.vlgmr.msra.gmra.mxu0 %vm159_vm1, %v4736_v54  ;;  %5821 = vmatprep.subr.mxu0 %v6211_v0 }
0x1f80   :  { %5822 = vmatpush3.msra.mxu0 %v7198_v49  ;;  %5829 = vmatprep.mubr.msk.f32.mxu0 %vm6212_vm0, %v6211_v0 }
0x1f81   :  { %5823 = vmatprep.subr.mxu0 %v6211_v0 }
0x1f82   :  { %5824 = vmatpush3.msra.mxu0 %v7203_v51 }
0x1f83   :  { %5825 = vmatprep.subr.mxu0 %v6211_v0 }
0x1f84   :  { %5826 = vmatpush3.msra.mxu0 %v7209_v55 }
0x1f85   :  { %5827 = vmatprep.subr.mxu0 %v6211_v0 }
0x1f86   :  { %5828 = vmatpush3.msra.mxu0 %v7213_v16 }
0x1f87   :  { %5830 = vmatmul.mubr.msk.f32.vlgmr.msra.gmra.mxu0 %vm159_vm1, %v4512_v40 }
0x1f95   :  { %v4709_v30 = vpop.permute.xlu0 %4708 }
0x1f96   :  { %5860 = vpush %v4709_v30 }
0x1fc7   :  { %s5861_s22 = spop %5860 }
0x1fc8   :  { %v4711_v42 = vstv %s5861_s22 }
0x1fc9   :  { %v4713_v59 = vmul.f32 %v4711_v42, %v7225_v20 }
0x1ff9   :  { %v4880_v33 = vpop.f32.mrf.mxu1 }
0x1ffb   :  { %v5820_v44 = vpop.f32.mrf.mxu1 }
0x2037   :  { %v4704_v49 = vpop.f32.mrf.mxu0 }
0x2038   :  { %v4714_v51 = vadd.f32 %v4713_v59, %v4704_v49 }
0x2039   :  { %v5798_v8 = vpop.f32.mrf.mxu0 }
0x203a   :  { %5833 = vmatpush3.msra.mxu1 %v4714_v51 }
0x203b   :  { %5837 = vmatprep.subr.mxu1 %v6211_v0 }
0x203f   :  { %v4805_v55 = vpop.f32.mrf.mxu0 }
0x2040   :  { %v4957_v29 = vadd.f32 %v4880_v33, %v4805_v55 }
0x2041   :  { %v5809_v43 = vpop.f32.mrf.mxu0 }
0x2047   :  { %v4953_v16 = vpop.f32.mrf.mxu0 }
0x2048   :  { %v4958_v1 = vadd.f32 %v4957_v29, %v4953_v16 }
0x2049   :  { %v5831_v21 = vpop.f32.mrf.mxu0 }
0x204a   :  { %v4959_v6 = vadd.f32 %v4958_v1, %v4732_v9 }
0x204c   :  { %v4960_v3 = vsel %vm557_vm3, %v4959_v6, -inf }
0x204d   :  { %4961 = vmax.xlane.f32.xlu1 %v4960_v3 }
0x20d6   :  { %v4962_v20 = vpop.xlane.xlu1 %4961 }
0x20d7   :  { %v4963_v4 = vsub.f32 %v4959_v6, %v4962_v20 }
0x20d9   :  { %v4964_v61 = vmul.f32 1.442695, %v4963_v4 }
0x20db   :  { %6005 = vpow2.f32 %v4964_v61 }
0x20e8   :  { %v6006_v5 = vpop.eup %6005 }
0x20e9   :  { %v4966_v15 = vsel %vm557_vm3, %v6006_v5, 0.0 }
0x20ea   :  { %4967 = vadd.xlane.f32.xlu1 %v4966_v15 }
0x20fb   :  { %5118 = vrot.lane.b32.xlu1 %v4953_v16, %s6222_s27  ;;  %s5131_s27 = sshll.u32 %s6225_s26, 4  ;;  %s5132_s27 = int_to_ptr.vmem [resolvable:$true] %s5131_s27 }
0x20fc   :  { %s6169_s28 = scalar_lea.vmem %s5132_s27, 128  ;;  %p6174_p13 = scmp.lt.s32.totalorder %s5132_s27, %s5132_s27 }
0x20fd   :  { %p6170_p12 = scmp.ne.s32.totalorder %s5132_s27, %s6169_s28  ;;  %p6175_p0 = scmp.lt.s32.totalorder %s6169_s28, %s6169_s28 }
0x20ff   :  { %p6176_p1 = por %p6175_p0, %p6174_p13 }
0x2101   :  { %p6177_p2 = pnand %p6176_p1, %p6170_p12 }
0x2173   :  { %v4968_v38 = vpop.xlane.xlu1 %4967 }
0x2174   :  { %6007 = vrcp.f32 %v4968_v38 }
0x2181   :  { %v6008_v45 = vpop.eup %6007 }
0x2182   :  { %v4970_v26 = vmul.f32 %v6008_v45, %v6006_v5 }
0x2184   :  { %5835 = vmatmul.mubr.msk.f32.vlgmr.msra.gmra.mxu1 %vm586_vm6, %v4970_v26 }
0x2185   :  { %5838 = vmatpush3.msra.mxu1 %v7263_v50  ;;  %5845 = vmatprep.mubr.msk.f32.mxu1 %vm6212_vm0, %v6211_v0  ;;  %v5119_v50 = vpop.permute.xlu1 %5118 }
0x2186   :  { %5839 = vmatprep.subr.mxu1 %v6211_v0 }
0x2187   :  { %5840 = vmatpush3.msra.mxu1 %v7268_v25 }
0x2188   :  { %5841 = vmatprep.subr.mxu1 %v6211_v0 }
0x2189   :  { %5842 = vmatpush3.msra.mxu1 %v7270_v18 }
0x218a   :  { %5843 = vmatprep.subr.mxu1 %v6211_v0 }
0x218b   :  { %5844 = vmatpush3.msra.mxu1 %v7276_v24 }
0x2244   :  { %v5040_v27 = vpop.f32.mrf.mxu1 }
0x2245   :  { %5846 = vmatmul.mubr.msk.f32.vlgmr.msra.gmra.mxu1 %vm159_vm1, %v5040_v27 }
0x2246   :  { %v5836_v7 = vpop.f32.mrf.mxu1 }
0x2305   :  { %v5113_v63 = vpop.f32.mrf.mxu1 }
0x2306   :  { %v5121_v2 = vadd.f32 %v5119_v50, %v5113_v63 }
0x2307   :  { %v5847_v25 = vpop.f32.mrf.mxu1 }
0x2308   :  { %v5122_v10 = vadd.f32 %v5121_v2, %v4733_v39 }
0x230a   :  { %v5123_v18 = vmax.f32 %v5122_v10, 0.0 }
0x230c   :  { %5124 = vst.msk [vmem:[#allocation18 + $0x7] sm:$0x1] %vm946_vm9, %v5123_v18 }
0x230d   :  { %6180 = shalt.err (!%p6177_p2)
}
0x230e   :  { %5134 = dma.vmem_to_hbm [thread:$0]  %s5132_s27, 128, %s7387_s12, [#allocation6]  }
0x230f   :  { %6199 = dma.done.wait [#allocation6], 128  }
0x2310   :  { %6200 = vsyncadd [#allocation6], 4294967168 }
0x2311   :  { %5138 = vsyncpa [#allocation5], 1 }
0x2312   :  { %5139 = vsyncpa [#allocation8], 1 }
0x2313   :  { %5140 = vsyncpa [#allocation11], 1 }
0x2314   :  { %5141 = vsyncpa [#allocation14], 1 }
0x2315   :  { %5142 = vsyncpa [#allocation17], 1 }
0x2316   :  { %5143 = vsyncpa [#allocation6], 1 }

</bundles_post_ra>
